<compile_context>
chip_gen: v7x
topology: tpu7x:2x2x1
jax: 0.10.0
libtpu: 0.0.40
codegen_flags: <defaults>
</compile_context>

<pallas_src>
import math

import numpy as np
import jax
import jax.numpy as jnp
from jax.experimental import pallas as pl
from jax.experimental.pallas import tpu as pltpu

CROP_T, CROP_B = 35, 223     # rows 35:223
CROP_L, CROP_R = 32, 220     # cols 32:220
CROP_H = CROP_B - CROP_T     # 188
CROP_W = CROP_R - CROP_L     # 188
POOL = 112
EMB = 512

# Embed matmul tiling: K = C*112*112 = 37632 is split into TK-wide grid steps;
# inside each step the int8 weight tile is dequantized and fed to the MXU in
# SUB-row sub-chunks (bounds the f32/bf16 dequant temporaries in VMEM).
TK = 12544           # 3 grid steps over K; int8 tile (12544, 512) = 6.4 MB
SUB = 1792           # 14 * 128 lanes; dequant temporaries <= ~6.5 MB


# ---------------------------------------------------------------------------
# Adaptive average pool (with the crop fused in) as two matmuls:
#   out = Ph_full @ X_full @ PwT_full
# Row i of the pool matrix averages cropped rows
#   [floor(i*crop/out), ceil((i+1)*crop/out))   — exactly PyTorch AdaptiveAvgPool2d —
# shifted by the crop offset, so the crop needs no separate slice/copy.
# ---------------------------------------------------------------------------
def _crop_pool_matrix(in_full: int, crop_start: int, crop_size: int,
                      out_size: int) -> np.ndarray:
    P = np.zeros((out_size, in_full), dtype=np.float32)
    for i in range(out_size):
        s = (i * crop_size) // out_size
        e = math.ceil((i + 1) * crop_size / out_size)
        P[i, crop_start + s:crop_start + e] = 1.0 / (e - s)
    return P


def _pool_kernel(ph_ref, pwt_ref, x_ref, y_ref, o_ref):
    # ph_ref: (112, H) bf16, pwt_ref: (W, 112) bf16 (crop folded in, resident),
    # x_ref / y_ref: (H, W) f32  (one sample, one channel each),
    # o_ref: (2, 112, 112) bf16  ([0] = pooled x, [1] = pooled y_hat).
    ph = ph_ref[...]
    pwt = pwt_ref[...]

    def pool_one(img_ref):
        img = img_ref[...].astype(jnp.bfloat16)
        t = jnp.dot(ph, img, preferred_element_type=jnp.float32)        # (112, W)
        return jnp.dot(t.astype(jnp.bfloat16), pwt,
                       preferred_element_type=jnp.float32)               # (112, 112)

    o_ref[0] = pool_one(x_ref).astype(o_ref.dtype)
    o_ref[1] = pool_one(y_ref).astype(o_ref.dtype)


def crop_pool_112(x, y_hat, ph, pwt):
    """Crop + AdaptiveAvgPool2d((112, 112)) for x and y_hat in one gridded call.

    Returns (2, N, C, 112, 112) bf16 with [0] = pooled x, [1] = pooled y_hat.
    """
    n, c, h, w = x.shape
    return pl.pallas_call(
        _pool_kernel,
        out_shape=jax.ShapeDtypeStruct((2, n, c, POOL, POOL), jnp.bfloat16),
        grid=(n, c),
        in_specs=[
            pl.BlockSpec((POOL, h), lambda i, j: (0, 0)),
            pl.BlockSpec((w, POOL), lambda i, j: (0, 0)),
            pl.BlockSpec((None, None, h, w), lambda i, j: (i, j, 0, 0)),
            pl.BlockSpec((None, None, h, w), lambda i, j: (i, j, 0, 0)),
        ],
        out_specs=pl.BlockSpec((2, None, None, POOL, POOL),
                               lambda i, j: (0, i, j, 0, 0)),
        compiler_params=pltpu.CompilerParams(
            dimension_semantics=("parallel", "parallel")),
    )(ph, pwt, x, y_hat)


# ---------------------------------------------------------------------------
# Synthetic facenet embedding head + fused ID loss:
#   (2N, K) bf16  @  (K, 512) int8  (per-column f32 scale), K-tiled,
#   f32 accumulation in a resident VMEM scratch; on the last K-step the
#   accumulator is dequantized, l2-normalized, and reduced to the scalar loss.
# ---------------------------------------------------------------------------
def _embed_loss_kernel(a_ref, w_ref, s_ref, o_ref, acc_ref):
    k = pl.program_id(0)

    @pl.when(k == 0)
    def _():
        acc_ref[...] = jnp.zeros_like(acc_ref)

    nsub = w_ref.shape[0] // SUB

    def body(s, carry):
        off = pl.multiple_of(s * SUB, SUB)
        # int8 -> f32 -> bf16 dequant (int8 values are exact in bf16); the
        # per-column scale is applied once to the f32 accumulator in the epilogue.
        wsub = w_ref[pl.ds(off, SUB), :].astype(jnp.float32).astype(jnp.bfloat16)
        asub = a_ref[:, pl.ds(off, SUB)]
        acc_ref[...] += jnp.dot(asub, wsub, preferred_element_type=jnp.float32)
        return carry

    jax.lax.fori_loop(0, nsub, body, 0)

    @pl.when(k == pl.num_programs(0) - 1)
    def _():
        feats = acc_ref[...] * s_ref[...]                 # dequant: (2N, 512) f32
        n = feats.shape[0] // 2
        xf = feats[:n]                                    # x features
        yf = feats[n:]                                    # y_hat features
        # l2_norm of both feature sets folded into the cosine (with eps for
        # robustness against an all-zero row).
        pxy = jnp.sum(xf * yf, axis=-1, keepdims=True)
        pxx = jnp.sum(xf * xf, axis=-1, keepdims=True)
        pyy = jnp.sum(yf * yf, axis=-1, keepdims=True)
        cos = pxy * jax.lax.rsqrt(pxx * pyy + 1e-12)      # (N, 1) cosine sims
        o_ref[...] = jnp.mean(1.0 - cos).reshape(1, 1)


def embed_id_loss(flat, w_int8, w_scale, *, tk=TK):
    n2, k = flat.shape
    kw, emb = w_int8.shape
    assert k == kw and k % tk == 0 and tk % SUB == 0 and SUB % 128 == 0
    return pl.pallas_call(
        _embed_loss_kernel,
        out_shape=jax.ShapeDtypeStruct((1, 1), jnp.float32),
        grid=(k // tk,),
        in_specs=[
            pl.BlockSpec((n2, tk), lambda i: (0, i)),
            pl.BlockSpec((tk, emb), lambda i: (i, 0)),
            pl.BlockSpec((1, emb), lambda i: (0, 0)),
        ],
        out_specs=pl.BlockSpec((1, 1), lambda i: (0, 0)),
        scratch_shapes=[pltpu.VMEM((n2, emb), jnp.float32)],
        compiler_params=pltpu.CompilerParams(
            dimension_semantics=("arbitrary",),
            # Ceiling only (~20 MB actually used): 12.8 MB double-buffered int8
            # weight tile + ~6.5 MB dequant temps + activations.  48 MiB is
            # below v7x's 64 MiB physical VMEM and well below v5e/v6e's 128 MiB.
            vmem_limit_bytes=48 * 1024 * 1024,
        ),
    )(flat, w_int8, w_scale)


# ---------------------------------------------------------------------------
# IDLoss forward.
# ---------------------------------------------------------------------------
@jax.jit
def id_loss_forward(y_hat, x, ph, pwt, w_int8, w_scale):
    assert x.shape == y_hat.shape
    n, c, h, w = x.shape
    # The fixed crop (35:223, 32:220) and the trace-time pool matrices require
    # this input resolution; ph/pwt must have been built for (h, w).
    assert h >= CROP_B and w >= CROP_R
    assert ph.shape == (POOL, h) and pwt.shape == (w, POOL)

    pooled = crop_pool_112(x, y_hat, ph, pwt)            # (2, N, C, 112, 112) bf16
    # Flatten to the (2N, K) embed layout (x rows first, then y_hat rows).
    # This is a small (~0.6 MB) bf16 relayout in XLA; the in-kernel
    # (112,112)->(12544,) lane flatten was deliberately not used (non-native
    # reshape inside the kernel).
    flat = pooled.reshape(2 * n, c * POOL * POOL)        # (2N, K) bf16
    loss = embed_id_loss(flat, w_int8, w_scale)          # (1, 1) f32
    return loss[0, 0]


if __name__ == "__main__":
    key = jax.random.PRNGKey(0)
    k1, k2, k3 = jax.random.split(key, 3)

    # Smallest spatial size compatible with the fixed crop 35:223, 32:220.
    N, C, H, W = 2, 3, 224, 224
    x = jax.random.normal(k1, (N, C, H, W), dtype=jnp.float32)
    y_hat = jax.random.normal(k2, (N, C, H, W), dtype=jnp.float32)

    # Deterministic synthetic embedding weights (stand-in for the ir_se50
    # checkpoint), quantized to int8 with a per-column f32 scale so the dominant
    # HBM stream is 1 byte/weight.
    K = C * POOL * POOL
    w_f32 = jax.random.normal(k3, (K, EMB), dtype=jnp.float32) * 0.02
    w_scale = (jnp.max(jnp.abs(w_f32), axis=0, keepdims=True) / 127.0
               ).astype(jnp.float32)                                   # (1, 512)
    w_int8 = jnp.clip(jnp.round(w_f32 / w_scale), -127, 127).astype(jnp.int8)

    # Crop-fused adaptive-pool matrices (bf16; window weights are 1/2, 1/3, ...).
    ph = jnp.asarray(_crop_pool_matrix(H, CROP_T, CROP_H, POOL)).astype(jnp.bfloat16)
    pwt = jnp.asarray(_crop_pool_matrix(W, CROP_L, CROP_W, POOL).T).astype(jnp.bfloat16)

    loss = id_loss_forward(y_hat, x, ph, pwt, w_int8, w_scale)
    jax.block_until_ready(loss)
    assert loss.shape == () and bool(jnp.isfinite(loss))
    print("KERNEL_OK")
</pallas_src>

<mosaic_0001>
module attributes {stable_mosaic.version = 11 : i64} {
  func.func @_pool_kernel(%arg0: i32, %arg1: i32, %arg2: memref<112x224xbf16, #tpu.memory_space<vmem>>, %arg3: memref<224x112xbf16, #tpu.memory_space<vmem>>, %arg4: memref<1x1x224x224xf32, #tpu.memory_space<vmem>>, %arg5: memref<1x1x224x224xf32, #tpu.memory_space<vmem>>, %arg6: memref<2x1x1x112x112xbf16, #tpu.memory_space<vmem>>) attributes {dimension_semantics = [#tpu.dimension_semantics<parallel>, #tpu.dimension_semantics<parallel>], iteration_bounds = array<i64: 2, 3>, scalar_prefetch = 0 : i64, scratch_operands = 0 : i64, tpu.core_type = #tpu.core_type<tc>, window_params = [{pipeline_mode = #tpu.pipeline_mode<synchronous>, transform_indices = @transform_0, window_bounds = array<i64: 112, 224>}, {pipeline_mode = #tpu.pipeline_mode<synchronous>, transform_indices = @transform_1, window_bounds = array<i64: 224, 112>}, {transform_indices = @transform_2, window_bounds = array<i64: 1, 1, 224, 224>}, {transform_indices = @transform_3, window_bounds = array<i64: 1, 1, 224, 224>}, {transform_indices = @transform_4, window_bounds = array<i64: 2, 1, 1, 112, 112>}]} {
    %c0 = arith.constant 0 : index
    %c0_0 = arith.constant 0 : index
    %0 = vector.load %arg2[%c0, %c0_0] : memref<112x224xbf16, #tpu.memory_space<vmem>>, vector<112x224xbf16>
    %c0_1 = arith.constant 0 : index
    %c0_2 = arith.constant 0 : index
    %1 = vector.load %arg3[%c0_1, %c0_2] : memref<224x112xbf16, #tpu.memory_space<vmem>>, vector<224x112xbf16>
    %c0_3 = arith.constant 0 : index
    %c0_4 = arith.constant 0 : index
    %c0_5 = arith.constant 0 : index
    %c0_6 = arith.constant 0 : index
    %2 = vector.load %arg4[%c0_3, %c0_4, %c0_5, %c0_6] : memref<1x1x224x224xf32, #tpu.memory_space<vmem>>, vector<1x1x224x224xf32>
    %3 = vector.shape_cast %2 : vector<1x1x224x224xf32> to vector<224x224xf32>
    %4 = arith.truncf %3 : vector<224x224xf32> to vector<224x224xbf16>
    %cst = arith.constant dense<0.000000e+00> : vector<112x224xf32>
    %5 = tpu.matmul %0, %4, %cst {dimension_numbers = #tpu.dot_dimension_numbers<[1], [0], [0], [1], [0, 0, 1, 1], [], []>} : vector<112x224xbf16>, vector<224x224xbf16>, vector<112x224xf32> -> vector<112x224xf32>
    %6 = arith.truncf %5 : vector<112x224xf32> to vector<112x224xbf16>
    %cst_7 = arith.constant dense<0.000000e+00> : vector<112x112xf32>
    %7 = tpu.matmul %6, %1, %cst_7 {dimension_numbers = #tpu.dot_dimension_numbers<[1], [0], [0], [1], [0, 0, 1, 1], [], []>} : vector<112x224xbf16>, vector<224x112xbf16>, vector<112x112xf32> -> vector<112x112xf32>
    %8 = arith.truncf %7 : vector<112x112xf32> to vector<112x112xbf16>
    %c0_8 = arith.constant 0 : index
    %c0_9 = arith.constant 0 : index
    %c0_10 = arith.constant 0 : index
    %c0_11 = arith.constant 0 : index
    %c0_12 = arith.constant 0 : index
    %9 = vector.load %arg6[%c0_8, %c0_9, %c0_10, %c0_11, %c0_12] : memref<2x1x1x112x112xbf16, #tpu.memory_space<vmem>>, vector<1x1x1x112x112xbf16>
    %10 = vector.shape_cast %9 : vector<1x1x1x112x112xbf16> to vector<112x112xbf16>
    %11 = vector.shape_cast %8 : vector<112x112xbf16> to vector<1x1x1x112x112xbf16>
    tpu.vector_store %arg6[%c0_8, %c0_9, %c0_10, %c0_11, %c0_12], %11 {strides = array<i32>} : memref<2x1x1x112x112xbf16, #tpu.memory_space<vmem>>, vector<1x1x1x112x112xbf16>,
    %c0_13 = arith.constant 0 : index
    %c0_14 = arith.constant 0 : index
    %c0_15 = arith.constant 0 : index
    %c0_16 = arith.constant 0 : index
    %12 = vector.load %arg5[%c0_13, %c0_14, %c0_15, %c0_16] : memref<1x1x224x224xf32, #tpu.memory_space<vmem>>, vector<1x1x224x224xf32>
    %13 = vector.shape_cast %12 : vector<1x1x224x224xf32> to vector<224x224xf32>
    %14 = arith.truncf %13 : vector<224x224xf32> to vector<224x224xbf16>
    %cst_17 = arith.constant dense<0.000000e+00> : vector<112x224xf32>
    %15 = tpu.matmul %0, %14, %cst_17 {dimension_numbers = #tpu.dot_dimension_numbers<[1], [0], [0], [1], [0, 0, 1, 1], [], []>} : vector<112x224xbf16>, vector<224x224xbf16>, vector<112x224xf32> -> vector<112x224xf32>
    %16 = arith.truncf %15 : vector<112x224xf32> to vector<112x224xbf16>
    %cst_18 = arith.constant dense<0.000000e+00> : vector<112x112xf32>
    %17 = tpu.matmul %16, %1, %cst_18 {dimension_numbers = #tpu.dot_dimension_numbers<[1], [0], [0], [1], [0, 0, 1, 1], [], []>} : vector<112x224xbf16>, vector<224x112xbf16>, vector<112x112xf32> -> vector<112x112xf32>
    %18 = arith.truncf %17 : vector<112x112xf32> to vector<112x112xbf16>
    %c1 = arith.constant 1 : index
    %c0_19 = arith.constant 0 : index
    %c0_20 = arith.constant 0 : index
    %c0_21 = arith.constant 0 : index
    %c0_22 = arith.constant 0 : index
    %19 = vector.load %arg6[%c1, %c0_19, %c0_20, %c0_21, %c0_22] : memref<2x1x1x112x112xbf16, #tpu.memory_space<vmem>>, vector<1x1x1x112x112xbf16>
    %20 = vector.shape_cast %19 : vector<1x1x1x112x112xbf16> to vector<112x112xbf16>
    %21 = vector.shape_cast %18 : vector<112x112xbf16> to vector<1x1x1x112x112xbf16>
    tpu.vector_store %arg6[%c1, %c0_19, %c0_20, %c0_21, %c0_22], %21 {strides = array<i32>} : memref<2x1x1x112x112xbf16, #tpu.memory_space<vmem>>, vector<1x1x1x112x112xbf16>,
    return
  }
  func.func @transform_0(%arg0: i32, %arg1: i32) -> (i32, i32) {
    %c0_i32 = arith.constant 0 : i32
    %c0_i32_0 = arith.constant 0 : i32
    %c0_i32_1 = arith.constant 0 : i32
    return %c0_i32, %c0_i32_0 : i32, i32
  }
  func.func @transform_1(%arg0: i32, %arg1: i32) -> (i32, i32) {
    %c0_i32 = arith.constant 0 : i32
    %c0_i32_0 = arith.constant 0 : i32
    %c0_i32_1 = arith.constant 0 : i32
    return %c0_i32, %c0_i32_0 : i32, i32
  }
  func.func @transform_2(%arg0: i32, %arg1: i32) -> (i32, i32, i32, i32) {
    %c0_i32 = arith.constant 0 : i32
    %c0_i32_0 = arith.constant 0 : i32
    %c0_i32_1 = arith.constant 0 : i32
    return %arg0, %arg1, %c0_i32, %c0_i32_0 : i32, i32, i32, i32
  }
  func.func @transform_3(%arg0: i32, %arg1: i32) -> (i32, i32, i32, i32) {
    %c0_i32 = arith.constant 0 : i32
    %c0_i32_0 = arith.constant 0 : i32
    %c0_i32_1 = arith.constant 0 : i32
    return %arg0, %arg1, %c0_i32, %c0_i32_0 : i32, i32, i32, i32
  }
  func.func @transform_4(%arg0: i32, %arg1: i32) -> (i32, i32, i32, i32, i32) {
    %c0_i32 = arith.constant 0 : i32
    %c0_i32_0 = arith.constant 0 : i32
    %c0_i32_1 = arith.constant 0 : i32
    %c0_i32_2 = arith.constant 0 : i32
    return %c0_i32, %arg0, %arg1, %c0_i32_0, %c0_i32_1 : i32, i32, i32, i32, i32
  }
}

module attributes {stable_mosaic.version = 11 : i64} {
  func.func @_embed_loss_kernel(%arg0: i32, %arg1: memref<4x12544xbf16, #tpu.memory_space<vmem>>, %arg2: memref<12544x512xi8, #tpu.memory_space<vmem>>, %arg3: memref<1x512xf32, #tpu.memory_space<vmem>>, %arg4: memref<1x1xf32, #tpu.memory_space<vmem>>, %arg5: memref<4x512xf32, #tpu.memory_space<vmem>>) attributes {dimension_semantics = [#tpu.dimension_semantics<arbitrary>], iteration_bounds = array<i64: 3>, scalar_prefetch = 0 : i64, scratch_operands = 1 : i64, tpu.core_type = #tpu.core_type<tc>, window_params = [{transform_indices = @transform_0, window_bounds = array<i64: 4, 12544>}, {transform_indices = @transform_1, window_bounds = array<i64: 12544, 512>}, {pipeline_mode = #tpu.pipeline_mode<synchronous>, transform_indices = @transform_2, window_bounds = array<i64: 1, 512>}, {pipeline_mode = #tpu.pipeline_mode<synchronous>, transform_indices = @transform_3, window_bounds = array<i64: 1, 1>}]} {
    %c0_i32 = arith.constant 0 : i32
    %0 = arith.cmpi eq, %arg0, %c0_i32 : i32
    %1 = arith.extui %0 : i1 to i32
    %c0_i32_0 = arith.constant 0 : i32
    %2 = arith.cmpi ne, %1, %c0_i32_0 : i32
    scf.if %2 {
      %cst = arith.constant 0.000000e+00 : f32
      %7 = vector.broadcast %cst : f32 to vector<4x512xf32>
      %c0 = arith.constant 0 : index
      %c0_4 = arith.constant 0 : index
      %8 = vector.load %arg5[%c0, %c0_4] : memref<4x512xf32, #tpu.memory_space<vmem>>, vector<4x512xf32>
      tpu.vector_store %arg5[%c0, %c0_4], %7 {strides = array<i32>} : memref<4x512xf32, #tpu.memory_space<vmem>>, vector<4x512xf32>,
    } else {
    }
    %c0_i32_1 = arith.constant 0 : i32
    %c7_i32 = arith.constant 7 : i32
    %3 = arith.addi %c0_i32_1, %c7_i32 : i32
    %c1_i32 = arith.constant 1 : i32
    scf.for %arg6 = %c0_i32_1 to %3 step %c1_i32  : i32 {
      %c1792_i32 = arith.constant 1792 : i32
      %7 = arith.muli %arg6, %c1792_i32 : i32
      %8 = tpu.assume_multiple %7, 1792 : i32
      %9 = arith.index_cast %8 : i32 to index
      %c0 = arith.constant 0 : index
      %10 = vector.load %arg2[%9, %c0] : memref<12544x512xi8, #tpu.memory_space<vmem>>, vector<1792x512xi8>
      %11 = arith.sitofp %10 : vector<1792x512xi8> to vector<1792x512xf32>
      %12 = arith.truncf %11 : vector<1792x512xf32> to vector<1792x512xbf16>
      %c0_4 = arith.constant 0 : index
      %13 = arith.index_cast %8 : i32 to index
      %14 = vector.load %arg1[%c0_4, %13] : memref<4x12544xbf16, #tpu.memory_space<vmem>>, vector<4x1792xbf16>
      %c0_5 = arith.constant 0 : index
      %c0_6 = arith.constant 0 : index
      %15 = vector.load %arg5[%c0_5, %c0_6] : memref<4x512xf32, #tpu.memory_space<vmem>>, vector<4x512xf32>
      %cst = arith.constant dense<0.000000e+00> : vector<4x512xf32>
      %16 = tpu.matmul %14, %12, %cst {dimension_numbers = #tpu.dot_dimension_numbers<[1], [0], [0], [1], [0, 0, 1, 1], [], []>} : vector<4x1792xbf16>, vector<1792x512xbf16>, vector<4x512xf32> -> vector<4x512xf32>
      %17 = arith.addf %15, %16 : vector<4x512xf32>
      %c0_7 = arith.constant 0 : index
      %c0_8 = arith.constant 0 : index
      %18 = vector.load %arg5[%c0_7, %c0_8] : memref<4x512xf32, #tpu.memory_space<vmem>>, vector<4x512xf32>
      tpu.vector_store %arg5[%c0_7, %c0_8], %17 {strides = array<i32>} : memref<4x512xf32, #tpu.memory_space<vmem>>, vector<4x512xf32>,
    }
    %c7_i32_2 = arith.constant 7 : i32
    %c2_i32 = arith.constant 2 : i32
    %4 = arith.cmpi eq, %arg0, %c2_i32 : i32
    %5 = arith.extui %4 : i1 to i32
    %c0_i32_3 = arith.constant 0 : i32
    %6 = arith.cmpi ne, %5, %c0_i32_3 : i32
    scf.if %6 {
      %c0 = arith.constant 0 : index
      %c0_4 = arith.constant 0 : index
      %7 = vector.load %arg5[%c0, %c0_4] : memref<4x512xf32, #tpu.memory_space<vmem>>, vector<4x512xf32>
      %c0_5 = arith.constant 0 : index
      %c0_6 = arith.constant 0 : index
      %8 = vector.load %arg3[%c0_5, %c0_6] : memref<1x512xf32, #tpu.memory_space<vmem>>, vector<1x512xf32>
      %9 = vector.broadcast %8 : vector<1x512xf32> to vector<4x512xf32>
      %10 = arith.mulf %7, %9 : vector<4x512xf32>
      %11 = vector.extract_strided_slice %10 {offsets = [0, 0], sizes = [2, 512], strides = [1, 1]} : vector<4x512xf32> to vector<2x512xf32>
      %12 = vector.extract_strided_slice %10 {offsets = [2, 0], sizes = [2, 512], strides = [1, 1]} : vector<4x512xf32> to vector<2x512xf32>
      %13 = arith.mulf %11, %12 : vector<2x512xf32>
      %cst = arith.constant dense<0.000000e+00> : vector<2xf32>
      %14 = vector.multi_reduction <add>, %13, %cst [1] : vector<2x512xf32> to vector<2xf32>
      %15 = vector.shape_cast %14 : vector<2xf32> to vector<2x1xf32>
      %16 = arith.mulf %11, %11 : vector<2x512xf32>
      %cst_7 = arith.constant dense<0.000000e+00> : vector<2xf32>
      %17 = vector.multi_reduction <add>, %16, %cst_7 [1] : vector<2x512xf32> to vector<2xf32>
      %18 = vector.shape_cast %17 : vector<2xf32> to vector<2x1xf32>
      %19 = arith.mulf %12, %12 : vector<2x512xf32>
      %cst_8 = arith.constant dense<0.000000e+00> : vector<2xf32>
      %20 = vector.multi_reduction <add>, %19, %cst_8 [1] : vector<2x512xf32> to vector<2xf32>
      %21 = vector.shape_cast %20 : vector<2xf32> to vector<2x1xf32>
      %22 = arith.mulf %18, %21 : vector<2x1xf32>
      %cst_9 = arith.constant 9.99999996E-13 : f32
      %23 = vector.broadcast %cst_9 : f32 to vector<2x1xf32>
      %24 = arith.addf %22, %23 : vector<2x1xf32>
      %25 = math.rsqrt %24 : vector<2x1xf32>
      %26 = arith.mulf %15, %25 : vector<2x1xf32>
      %cst_10 = arith.constant 1.000000e+00 : f32
      %27 = vector.broadcast %cst_10 : f32 to vector<2x1xf32>
      %28 = arith.subf %27, %26 : vector<2x1xf32>
      %29 = vector.shape_cast %28 : vector<2x1xf32> to vector<1x2x1xf32>
      %cst_11 = arith.constant dense<0.000000e+00> : vector<1xf32>
      %30 = vector.multi_reduction <add>, %29, %cst_11 [1, 2] : vector<1x2x1xf32> to vector<1xf32>
      %31 = vector.shape_cast %30 : vector<1xf32> to vector<1x1x1xf32>
      %32 = vector.extract %31[0, 0, 0] : f32 from vector<1x1x1xf32>
      %cst_12 = arith.constant 2.000000e+00 : f32
      %33 = arith.divf %32, %cst_12 : f32
      %34 = vector.broadcast %33 : f32 to vector<1x1xf32>
      %c0_13 = arith.constant 0 : index
      %c0_14 = arith.constant 0 : index
      %35 = vector.load %arg4[%c0_13, %c0_14] : memref<1x1xf32, #tpu.memory_space<vmem>>, vector<1x1xf32>
      tpu.vector_store %arg4[%c0_13, %c0_14], %34 {strides = array<i32>} : memref<1x1xf32, #tpu.memory_space<vmem>>, vector<1x1xf32>,
    } else {
    }
    return
  }
  func.func @transform_0(%arg0: i32) -> (i32, i32) {
    %c0_i32 = arith.constant 0 : i32
    %c0_i32_0 = arith.constant 0 : i32
    return %c0_i32, %arg0 : i32, i32
  }
  func.func @transform_1(%arg0: i32) -> (i32, i32) {
    %c0_i32 = arith.constant 0 : i32
    %c0_i32_0 = arith.constant 0 : i32
    return %arg0, %c0_i32 : i32, i32
  }
  func.func @transform_2(%arg0: i32) -> (i32, i32) {
    %c0_i32 = arith.constant 0 : i32
    %c0_i32_0 = arith.constant 0 : i32
    %c0_i32_1 = arith.constant 0 : i32
    return %c0_i32, %c0_i32_0 : i32, i32
  }
  func.func @transform_3(%arg0: i32) -> (i32, i32) {
    %c0_i32 = arith.constant 0 : i32
    %c0_i32_0 = arith.constant 0 : i32
    %c0_i32_1 = arith.constant 0 : i32
    return %c0_i32, %c0_i32_0 : i32, i32
  }
}

</mosaic_0001>

<bundles_post_ra>
// kernel: id_loss_forward.2
= control target key start
LH: loop header
LB: loop body
LE: loop exit
PB: predicated region body
PF: predicated region fallthrough
CT: control target
= control target key end

     0   :  { %s2698_s0 = inlined_call_operand.hbm [shape: bf16[112,224], index: 0, kind: input, shape index: {}]   ;;  %s2699_s1 = inlined_call_operand.hbm [shape: bf16[224,112], index: 1, kind: input, shape index: {}]   ;;  %s2700_s2 = inlined_call_operand.hbm [shape: f32[2,3,224,224], index: 2, kind: input, shape index: {}]   ;;  %s2701_s3 = inlined_call_operand.hbm [shape: f32[2,3,224,224], index: 3, kind: input, shape index: {}]   ;;  %s2702_s4 = inlined_call_operand.vmem [shape: bf16[2,2,3,112,112], index: 4, kind: output, shape index: {}]  }
   0x1   :  { %2716 = sst [smem:[#allocation16_spill]] %s2698_s0 }
   0x2   :  { %2717 = sst [smem:[#allocation17_spill]] %s2700_s2 }
   0x3   :  { %9 = vsyncpa [#allocation3], 0 }
   0x4   :  { %10 = vsyncpa [#allocation5], 0  ;;  %s2071_s15 = smov 0   ;;  %s2073_s16 = smov 0  }
   0x5   :  { %s2075_s17 = smov 0   ;;  %s2077_s18 = smov 0  }
   0x6   :  { %s2079_s19 = smov 0   ;;  %s2081_s20 = smov 0  }
   0x7   :  { %s2083_s21 = smov 0   ;;  %s2085_s22 = smov 0  }
   0x8 LB: > { %2718 = sst [smem:[#allocation12_spill]] %s2025_s20  ;;  %s2110_s23 = sadd.s32 4294967295, %s2033_s22   ;;  %s2033_s22 = sphi %s2085_s22, %s16_s22   ;;  %s2029_s21 = sphi %s2083_s21, %s2749_s21   ;;  %s2025_s20 = sphi %s2081_s20, %s2748_s20   ;;  %s2021_s19 = sphi %s2079_s19, %s2747_s19   ;;  %s2017_s18 = sphi %s2077_s18, %s2746_s18   ;;  %s2013_s17 = sphi %s2075_s17, %s2752_s17   ;;  %s2009_s16 = sphi %s2073_s16, %s2751_s16   ;;  %s2005_s15 = sphi %s2071_s15, %s2750_s15  }
   0x9   : > { %2719 = sst [smem:[#allocation13_spill]] %s2029_s21  ;;  %p86_p0 = scmp.ne.s32.totalorder %s2013_s17, %s2009_s16 }
   0xa   : > { %p87_p1 = scmp.eq.s32.totalorder %s2033_s22, 0  ;;  %p92_p2 = scmp.ne.s32.totalorder %s2009_s16, %s2005_s15 }
   0xb   : > { %p2703_p3 = scmp.eq.s32.totalorder %s2110_s23, 0  ;;  %p146_p5 = scmp.eq.s32.totalorder %s2110_s23, 5 }
   0xc   : > { %p2118_p4 = por %p87_p1, %p86_p0  ;;  %p1556_p7 = scmp.ge.s32.totalorder %s2033_s22, 1 }
   0xd   : > { %p2125_p6 = por %p2703_p3, %p92_p2  ;;  %p2130_p8 = por %p146_p5, %p86_p0 }
   0xe   : > { %p159_p9 = scmp.lt.s32.totalorder %s2033_s22, 7  ;;  %s2035_s29 = smov [#allocation2]  }
   0xf   : > { %s2721_s26 = scalar_select %p2125_p6, 1, 0 }
  0x10   : > { %s2722_s27 = scalar_select %p2130_p8, 1, 0 }
  0x11   : > { %p2135_p10 = pnand %p1556_p7, %p159_p9  ;;  %s171_s30 = sshll.u32 %s2035_s29, 4  ;;  %s172_s30 = int_to_ptr.vmem [resolvable:$true] %s171_s30 }
  0x12   : > { %p1732_p12 = scmp.lt.s32.totalorder %s2033_s22, 6  ;;  %s2726_s0 = sld [smem:[#allocation16_spill]] }
  0x13   : > { %s2723_s28 = scalar_select %p2135_p10, 1, 0 }
  0x14   : > { %p1716_p11 = pneg %p2135_p10  ;;  %p2150_p0 = pnand %p1732_p12, %p2118_p4 }
  0x16   : > { %p2144_p13 = pnand %p1716_p11, %p2703_p3 }
  0x17   : > { %s2725_s6 = scalar_select %p2150_p0, 1, 0 }
  0x18   : > { %s1843_s9 = scalar_lea.hbm %s2726_s0, 1792  ;;  %p2710_p2 = pneg %p2144_p13 }
  0x19   : > { %p1844_p1 = scmp.ne.s32.totalorder %s2726_s0, %s1843_s9  ;;  %p1850_p4 = scmp.lt.u32.totalorder %s1843_s9, %s2726_s0 }
  0x1b   : > { %p1846_p5 = pnand %p2710_p2, %p1844_p1 }
  0x1d   : > { %p1847_p7 = pneg %p1846_p5 }
  0x1f   : > { %p1852_p9 = pnand %p1850_p4, %p1847_p7 }
  0x21   : > { %1855 = shalt.err (!%p1852_p9)
}
  0x22   : > { %s1856_s14 = scalar_lea.vmem %s172_s30, 1792  ;;  %p1864_p8 = scmp.lt.s32.totalorder %s172_s30, %s172_s30 }
  0x23   : > { %p1857_p11 = scmp.ne.s32.totalorder %s172_s30, %s1856_s14  ;;  %p1865_p6 = scmp.lt.s32.totalorder %s1856_s14, %s1856_s14 }
  0x25   : > { %p1859_p12 = pnand %p1857_p11, %p2710_p2  ;;  %p1866_p10 = por %p1865_p6, %p1864_p8 }
  0x27   : > { %p1860_p3 = pneg %p1859_p12 }
  0x29   : > { %p1867_p0 = pnand %p1866_p10, %p1860_p3 }
  0x2b   : > { %1870 = shalt.err (!%p1867_p0)
}
  0x2c   : > { %s2036_s15 = smov 128   ;;  %s2037_s25 = smov 8  }
  0x2d   : > { %1719 = dma.hbm_to_vmem [thread:$0]  (!%p2144_p13), %s2726_s0, 1792, %s172_s30, [#allocation3], %s2036_s15, %s2036_s15, %s2037_s25  }
  0x2e   : > { %s25_s8 = sadd.s32 1, %s2025_s20  ;;  %s28_s9 = sadd.s32 1, %s2029_s21 }
  0x2f   : > { %p26_p3 = scmp.ge.s32.totalorder %s25_s8, 3  ;;  %s198_s10 = sand.u32 1, %s2033_s22  }
  0x30   : > { %s200_s11 = sand.u32 1, %s2013_s17   ;;  %s1695_s14 = smul.u32 56, %s2025_s20 }
  0x31   : > { %s2754_s8 = smov (%p26_p3, %s25_s8), 0  ;;  %s2756_s9 = smov (!%p26_p3, %s28_s9), %s2029_s21 }
  0x32   : > { %2727 = sst [smem:[#allocation14_spill]] %s2754_s8  ;;  %s75_s12 = ssub.s32 %s2025_s20, %s2754_s8 }
  0x33   : > { %s2185_s13 = smul.u32 448, %s200_s11  ;;  %p30_p6 = scmp.ge.s32.totalorder %s2756_s9, 2 }
  0x34   : > { %s1696_s30 = smul.u32 168, %s2029_s21  ;;  %s2729_s2 = sld [smem:[#allocation17_spill]] }
  0x35   : > { %s2758_s9 = smov (%p30_p6, %s2756_s9), 0  ;;  %s202_s25 = scalar_lea.vmem [#allocation6], %s2185_s13 }
  0x36   : > { %2728 = sst [smem:[#allocation15_spill]] %s2758_s9  ;;  %s2191_s15 = sadd.s32 %s1696_s30, %s1695_s14 }
  0x37   : > { %s211_s29 = sshll.u32 %s202_s25, 4  ;;  %s74_s7 = ssub.s32 %s2029_s21, %s2758_s9  ;;  %s2204_s29 = int_to_ptr.vmem [resolvable:$true] %s211_s29 }
  0x38   : > { %s2711_s24 = sshll.u32 %s2191_s15, 7  ;;  %s76_s0 = sor.u32 %s75_s12, %s74_s7 }
  0x39   : > { %p77_p8 = scmp.eq.s32.totalorder %s76_s0, 0  ;;  %s2730_s14 = sadd.s32 1, %s2013_s17 }
  0x3a   : > { %s2202_s20 = scalar_lea.hbm %s2729_s2, %s2711_s24  ;;  %s2211_s25 = scalar_lea.sflag [#allocation3], %s198_s10 }
  0x3b   : > { %s2209_s30 = scalar_select %p77_p8, %s2013_s17, %s2730_s14  }
  0x3c   : > { %s1871_s9 = scalar_lea.hbm %s2202_s20, 7168  ;;  %p2731_p0 = scmp.ne.s32.totalorder %s2725_s6, 0 }
  0x3d   : > { %p1872_p10 = scmp.ne.s32.totalorder %s2202_s20, %s1871_s9  ;;  %s1876_s7 = scalar_lea.hbm %s2729_s2, 43008 }
  0x3e   : > { %p2713_p1 = pneg %p2731_p0  ;;  %p1877_p4 = scmp.lt.u32.totalorder %s2202_s20, %s2729_s2 }
  0x3f   : > { %p1878_p9 = scmp.lt.u32.totalorder %s1876_s7, %s1871_s9  ;;  %p1880_p12 = scmp.lt.u32.totalorder %s1871_s9, %s2202_s20 }
  0x40   : > { %p1874_p5 = pnand %p2713_p1, %p1872_p10 }
  0x41   : > { %p1879_p11 = por %p1878_p9, %p1877_p4 }
  0x42   : > { %p1875_p7 = pneg %p1874_p5 }
  0x43   : > { %p1881_p3 = por %p1880_p12, %p1879_p11 }
  0x45   : > { %p1882_p6 = pnand %p1881_p3, %p1875_p7 }
  0x47   : > { %1885 = shalt.err (!%p1882_p6)
}
  0x48   : > { %s1886_s10 = scalar_lea.vmem %s2204_s29, 7168  ;;  %s2038_s14 = smov [#allocation6]  }
  0x49   : > { %p1887_p8 = scmp.ne.s32.totalorder %s2204_s29, %s1886_s10  ;;  %s1891_s8 = sshll.u32 %s2038_s14, 4  ;;  %s1892_s8 = int_to_ptr.vmem [resolvable:$false] %s1891_s8 }
  0x4a   : > { %s1893_s12 = scalar_lea.vmem %s1892_s8, 14336  ;;  %p1894_p2 = scmp.lt.s32.totalorder %s2204_s29, %s1892_s8 }
  0x4b   : > { %p1889_p10 = pnand %p1887_p8, %p2713_p1  ;;  %p1895_p4 = scmp.lt.s32.totalorder %s1893_s12, %s1886_s10 }
  0x4d   : > { %p1890_p5 = pneg %p1889_p10  ;;  %p1896_p9 = por %p1895_p4, %p1894_p2 }
  0x4f   : > { %p1897_p11 = pnand %p1896_p9, %p1890_p5 }
  0x51   : > { %1900 = shalt.err (!%p1897_p11)
}
  0x52   : > { %s2715_s9 = smov 256   ;;  %s2040_s7 = smov 16  }
  0x53   : > { %1726 = dma.hbm_to_vmem [thread:$0]  (!%p2731_p0), %s2202_s20, 7168, %s2204_s29, %s2211_s25, %s2715_s9, %s2715_s9, %s2040_s7  }
  0x54   : > { %s2041_s0 = smov [#allocation4]   ;;  %s1901_s8 = scalar_lea.hbm %s2699_s1, 1792 }
  0x55   : > { %s184_s11 = sshll.u32 %s2041_s0, 4  ;;  %p1902_p2 = scmp.ne.s32.totalorder %s2699_s1, %s1901_s8  ;;  %s185_s11 = int_to_ptr.vmem [resolvable:$true] %s184_s11 }
  0x56   : > { %p2732_p7 = pneg %p2144_p13  ;;  %p1908_p6 = scmp.lt.u32.totalorder %s1901_s8, %s2699_s1 }
  0x58   : > { %p1904_p12 = pnand %p1902_p2, %p2732_p7 }
  0x5a   : > { %p1905_p3 = pneg %p1904_p12 }
  0x5c   : > { %p1910_p8 = pnand %p1908_p6, %p1905_p3 }
  0x5e   : > { %1913 = shalt.err (!%p1910_p8)
}
  0x5f   : > { %s1914_s20 = scalar_lea.vmem %s185_s11, 1792  ;;  %p2733_p5 = pmov %p2732_p7 }
  0x60   : > { %p1915_p10 = scmp.ne.s32.totalorder %s185_s11, %s1914_s20  ;;  %p1922_p11 = scmp.lt.s32.totalorder %s185_s11, %s185_s11 }
  0x61   : > { %p1923_p1 = scmp.lt.s32.totalorder %s1914_s20, %s1914_s20 }
  0x62   : > { %p1917_p4 = pnand %p1915_p10, %p2733_p5 }
  0x63   : > { %p1924_p0 = por %p1923_p1, %p1922_p11 }
  0x64   : > { %p1918_p9 = pneg %p1917_p4 }
  0x66   : > { %p1925_p2 = pnand %p1924_p0, %p1918_p9 }
  0x68   : > { %1928 = shalt.err (!%p1925_p2)
}
  0x69   : > { %s2042_s24 = smov 64   ;;  %s2043_s2 = smov 4  }
  0x6a   : > { %1722 = dma.hbm_to_vmem [thread:$0]  (!%p2144_p13), %s2699_s1, 1792, %s185_s11, [#allocation5], %s2042_s24, %s2042_s24, %s2043_s2  }
  0x6b   : > { %s2734_s0 = sshll.u32 %s2191_s15, 7  ;;  %s225_s12 = scalar_lea.vmem [#allocation7], %s2185_s13 }
  0x6c   : > { %s2267_s8 = scalar_lea.hbm %s2701_s3, %s2734_s0  ;;  %s234_s20 = sshll.u32 %s225_s12, 4  ;;  %s2270_s20 = int_to_ptr.vmem [resolvable:$true] %s234_s20 }
  0x6d   : > { %s1929_s9 = scalar_lea.hbm %s2267_s8, 7168  ;;  %p2735_p1 = scmp.ne.s32.totalorder %s2725_s6, 0 }
  0x6e   : > { %p1930_p0 = scmp.ne.s32.totalorder %s2267_s8, %s1929_s9  ;;  %s1934_s11 = scalar_lea.hbm %s2701_s3, 43008 }
  0x6f   : > { %p2736_p7 = pneg %p2735_p1  ;;  %p1935_p3 = scmp.lt.u32.totalorder %s2267_s8, %s2701_s3 }
  0x70   : > { %p1936_p6 = scmp.lt.u32.totalorder %s1934_s11, %s1929_s9  ;;  %p1938_p10 = scmp.lt.u32.totalorder %s1929_s9, %s2267_s8 }
  0x71   : > { %p1932_p12 = pnand %p1930_p0, %p2736_p7 }
  0x72   : > { %p1937_p8 = por %p1936_p6, %p1935_p3 }
  0x73   : > { %p1933_p13 = pneg %p1932_p12 }
  0x74   : > { %p1939_p5 = por %p1938_p10, %p1937_p8 }
  0x76   : > { %p1940_p4 = pnand %p1939_p5, %p1933_p13 }
  0x78   : > { %1943 = shalt.err (!%p1940_p4)
}
  0x79   : > { %s1944_s13 = scalar_lea.vmem %s2270_s20, 7168  ;;  %p2737_p11 = pmov %p2736_p7 }
  0x7a   : > { %p1945_p9 = scmp.ne.s32.totalorder %s2270_s20, %s1944_s13  ;;  %s2044_s21 = smov [#allocation7]  }
  0x7b   : > { %s1949_s29 = sshll.u32 %s2044_s21, 4  ;;  %s1950_s29 = int_to_ptr.vmem [resolvable:$false] %s1949_s29 }
  0x7c   : > { %p1947_p2 = pnand %p1945_p9, %p2737_p11  ;;  %s1951_s0 = scalar_lea.vmem %s1950_s29, 14336 }
  0x7d   : > { %p1952_p7 = scmp.lt.s32.totalorder %s2270_s20, %s1950_s29  ;;  %p1953_p12 = scmp.lt.s32.totalorder %s1951_s0, %s1944_s13 }
  0x7e   : > { %p1948_p0 = pneg %p1947_p2 }
  0x7f   : > { %p1954_p3 = por %p1953_p12, %p1952_p7 }
  0x81   : > { %p1955_p6 = pnand %p1954_p3, %p1948_p0 }
  0x83   : > { %1958 = shalt.err (!%p1955_p6)
}
  0x84   : > { %s2738_s9 = smov 256   ;;  %p2739_p13 = scmp.ne.s32.totalorder %s2723_s28, 0 }
  0x85   : > { %1729 = dma.hbm_to_vmem [thread:$0]  (!%p2735_p1), %s2267_s8, 7168, %s2270_s20, %s2211_s25, %s2738_s9, %s2738_s9, %s2040_s7  }
  0x86   : > { %246 = sbr.rel (%p2739_p13) target bundleno = 756 (0x2f4), region = 36  ;;  %p2740_p8 = scmp.eq.s32.totalorder (!%p2739_p13), %s2110_s23, 0 }
  0x8d   : > { %1992 = dma.done.wait (%p2740_p8), [#allocation3], 1792   ;;  %p2741_p10 = pmov %p2740_p8 }
  0x8e   : > { %p2742_p5 = pmov %p2740_p8 }
  0x8f   : > { %1994 = vsyncadd (%p2741_p10), [#allocation3], 4294965504 }
  0x90   : > { %1996 = dma.done.wait (%p2742_p5), [#allocation5], 1792   ;;  %p2743_p4 = pmov %p2742_p5 }
  0x91   : > { %s256_s6 = sand.u32 1, %s2110_s23   ;;  %s258_s25 = sand.u32 1, %s2009_s16  }
  0x92   : > { %1998 = vsyncadd (%p2743_p4), [#allocation5], 4294965504  ;;  %s2313_s28 = smul.u32 448, %s258_s25  ;;  %s257_s7 = scalar_lea.sflag [#allocation3], %s256_s6 }
  0x93   : > { %p2744_p1 = scmp.ne.s32.totalorder %s2721_s26, 0 }
  0x94   : > { %s2316_s14 = scalar_lea.vmem [#allocation6], %s2313_s28 }
  0x95   : > { %2000 = dma.done.wait (%p2744_p1), %s257_s7, 14336  }
  0x96   : > { %2002 = vsyncadd (%p2744_p1), %s257_s7, 4294952960  ;;  %v342_v0 = vld [vmem:[%s2316_s14 + $0x8] sm:$0xff]  ;;  %v344_v1 = vld [vmem:[%s2316_s14 + $0x18] sm:$0xff]  ;;  %vm488_vm0 = vcmask 785408   ;;  %v2045_v63 = vmov 0   ;;  %s2386_s23 = scalar_lea.vmem [#allocation7], %s2313_s28 }
  0x97   : > { %v341_v2 = vld [vmem:[%s2316_s14] sm:$0xff]  ;;  %v398_v3 = vpack.c.bf16 %v344_v1, %v342_v0  ;;  %v343_v4 = vld [vmem:[%s2316_s14 + $0x10] sm:$0xff]  ;;  %v346_v5 = vld [vmem:[%s2316_s14 + $0x28] sm:$0xff]  ;;  %732 = vmatprep.subr.bf16.mxu1 %v2045_v63  ;;  %s1701_s26 = smul.u32 112, %s258_s25  ;;  %vm877_vm1 = vcmask 912384   ;;  %p2745_p9 = scmp.ne.s32.totalorder %s2722_s27, 0 }
  0x98   : > { %v348_v6 = vld [vmem:[%s2316_s14 + $0x38] sm:$0xff]  ;;  %v397_v7 = vpack.c.bf16 %v343_v4, %v341_v2  ;;  %v345_v9 = vld [vmem:[%s2316_s14 + $0x20] sm:$0xff]  ;;  %v347_v10 = vld [vmem:[%s2316_s14 + $0x30] sm:$0xff]  ;;  %s1702_s8 = smul.u32 (%p2745_p9), 14, %s2017_s18 }
  0x99   : > { %v400_v8 = vpack.c.bf16 %v348_v6, %v346_v5  ;;  %v350_v11 = vld [vmem:[%s2316_s14 + $0x48] sm:$0xff]  ;;  %510 = vmatprep.subr.bf16.mxu0 %v398_v3  ;;  %v352_v12 = vld [vmem:[%s2316_s14 + $0x58] sm:$0xff]  ;;  %v399_v13 = vpack.c.bf16 %v347_v10, %v345_v9  ;;  %v349_v15 = vld [vmem:[%s2316_s14 + $0x40] sm:$0xff]  ;;  %s2595_s10 = scalar_lea.vmem [#allocation8], %s1701_s26  ;;  %s1703_s12 = smul.u32 (%p2745_p9), 42, %s2021_s19 }
  0x9a   : > { %511 = vmatpush1.bf16.msra.mxu0 %v397_v7  ;;  %v402_v14 = vpack.c.bf16 %v352_v12, %v350_v11  ;;  %v351_v16 = vld [vmem:[%s2316_s14 + $0x50] sm:$0xff]  ;;  %v354_v17 = vld [vmem:[%s2316_s14 + $0x68] sm:$0xff]  ;;  %v356_v18 = vld [vmem:[%s2316_s14 + $0x78] sm:$0xff] }
  0x9b   : > { %512 = vmatprep.subr.bf16.mxu0 %v400_v8  ;;  %v401_v19 = vpack.c.bf16 %v351_v16, %v349_v15  ;;  %v404_v20 = vpack.c.bf16 %v356_v18, %v354_v17  ;;  %v353_v21 = vld [vmem:[%s2316_s14 + $0x60] sm:$0xff]  ;;  %v355_v22 = vld [vmem:[%s2316_s14 + $0x70] sm:$0xff]  ;;  %v358_v23 = vld [vmem:[%s2316_s14 + $0x88] sm:$0xff]  ;;  %s1283_s27 = sadd.s32 (%p2745_p9), %s1703_s12, %s1702_s8 }
  0x9c   : > { %v360_v24 = vld [vmem:[%s2316_s14 + $0x98] sm:$0xff]  ;;  %v403_v25 = vpack.c.bf16 %v355_v22, %v353_v21  ;;  %v357_v27 = vld [vmem:[%s2316_s14 + $0x80] sm:$0xff]  ;;  %v359_v28 = vld [vmem:[%s2316_s14 + $0x90] sm:$0xff]  ;;  %s1663_s20 = sshll.u32 (%p2745_p9), %s1283_s27, 2 }
  0x9d   : > { %v406_v26 = vpack.c.bf16 %v360_v24, %v358_v23  ;;  %v362_v29 = vld [vmem:[%s2316_s14 + $0xa8] sm:$0xff]  ;;  %v364_v30 = vld [vmem:[%s2316_s14 + $0xb8] sm:$0xff]  ;;  %v405_v31 = vpack.c.bf16 %v359_v28, %v357_v27  ;;  %v361_v33 = vld [vmem:[%s2316_s14 + $0xa0] sm:$0xff]  ;;  %s1285_s19 = scalar_lea.vmem (%p2745_p9), %s2702_s4, %s1663_s20 }
  0x9e   : > { %513 = vmatpush1.bf16.msra.mxu0 %v399_v13  ;;  %v408_v32 = vpack.c.bf16 %v364_v30, %v362_v29  ;;  %v363_v34 = vld [vmem:[%s2316_s14 + $0xb0] sm:$0xff]  ;;  %v366_v35 = vld [vmem:[%s2316_s14 + $0xc8] sm:$0xff]  ;;  %v368_v36 = vld [vmem:[%s2316_s14 + $0xd8] sm:$0xff] }
  0x9f   : > { %514 = vmatprep.subr.bf16.mxu0 %v402_v14  ;;  %v2348_v37 = vld [vmem:[#allocation2 + $0x4] ss:$8 sps:$4 sm:$0xff]   ;;  %v407_v38 = vpack.c.bf16 %v363_v34, %v361_v33  ;;  %v410_v39 = vpack.c.bf16 %v368_v36, %v366_v35  ;;  %v367_v41 = vld [vmem:[%s2316_s14 + $0xd0] sm:$0xff]  ;;  %v372_v43 = vld [vmem:[%s2316_s14 + $0xf8] sm:$0xff] }
  0xa0   : > { %v365_v40 = vld [vmem:[%s2316_s14 + $0xc0] sm:$0xff]  ;;  %1579 = vmatprep.mubr.msk.bf16.mxu0 %vm488_vm0, %v2348_v37  ;;  %v370_v42 = vld [vmem:[%s2316_s14 + $0xe8] sm:$0xff]  ;;  %v371_v47 = vld [vmem:[%s2316_s14 + $0xf0] sm:$0xff] }
  0xa1   : > { %v409_v44 = vpack.c.bf16 %v367_v41, %v365_v40  ;;  %v412_v45 = vpack.c.bf16 %v372_v43, %v370_v42  ;;  %v369_v46 = vld [vmem:[%s2316_s14 + $0xe0] sm:$0xff]  ;;  %v374_v48 = vld [vmem:[%s2316_s14 + $0x108] sm:$0xff]  ;;  %v376_v49 = vld [vmem:[%s2316_s14 + $0x118] sm:$0xff] }
  0xa2   : > { %515 = vmatpush1.bf16.msra.mxu0 %v401_v19  ;;  %v411_v50 = vpack.c.bf16 %v371_v47, %v369_v46  ;;  %v414_v51 = vpack.c.bf16 %v376_v49, %v374_v48  ;;  %v373_v52 = vld [vmem:[%s2316_s14 + $0x100] sm:$0xff]  ;;  %v375_v53 = vld [vmem:[%s2316_s14 + $0x110] sm:$0xff]  ;;  %v378_v54 = vld [vmem:[%s2316_s14 + $0x128] sm:$0xff] }
  0xa3   : > { %516 = vmatprep.subr.bf16.mxu0 %v404_v20  ;;  %v380_v55 = vld [vmem:[%s2316_s14 + $0x138] sm:$0xff]  ;;  %v413_v56 = vpack.c.bf16 %v375_v53, %v373_v52  ;;  %v377_v58 = vld [vmem:[%s2316_s14 + $0x120] sm:$0xff]  ;;  %v379_v59 = vld [vmem:[%s2316_s14 + $0x130] sm:$0xff] }
  0xa4   : > { %v416_v57 = vpack.c.bf16 %v380_v55, %v378_v54  ;;  %v382_v60 = vld [vmem:[%s2316_s14 + $0x148] sm:$0xff]  ;;  %v384_v61 = vld [vmem:[%s2316_s14 + $0x158] sm:$0xff]  ;;  %v415_v62 = vpack.c.bf16 %v379_v59, %v377_v58  ;;  %v381_v1 = vld [vmem:[%s2316_s14 + $0x140] sm:$0xff] }
  0xa5   : > { %v418_v0 = vpack.c.bf16 %v384_v61, %v382_v60  ;;  %v383_v2 = vld [vmem:[%s2316_s14 + $0x150] sm:$0xff]  ;;  %v386_v3 = vld [vmem:[%s2316_s14 + $0x168] sm:$0xff]  ;;  %v388_v4 = vld [vmem:[%s2316_s14 + $0x178] sm:$0xff] }
  0xa6   : > { %517 = vmatpush1.bf16.msra.mxu0 %v403_v25  ;;  %v417_v5 = vpack.c.bf16 %v383_v2, %v381_v1  ;;  %v420_v6 = vpack.c.bf16 %v388_v4, %v386_v3  ;;  %v385_v7 = vld [vmem:[%s2316_s14 + $0x160] sm:$0xff]  ;;  %v387_v8 = vld [vmem:[%s2316_s14 + $0x170] sm:$0xff]  ;;  %v390_v9 = vld [vmem:[%s2316_s14 + $0x188] sm:$0xff] }
  0xa7   : > { %518 = vmatprep.subr.bf16.mxu0 %v406_v26  ;;  %v392_v10 = vld [vmem:[%s2316_s14 + $0x198] sm:$0xff]  ;;  %v419_v11 = vpack.c.bf16 %v387_v8, %v385_v7  ;;  %v389_v13 = vld [vmem:[%s2316_s14 + $0x180] sm:$0xff]  ;;  %v391_v14 = vld [vmem:[%s2316_s14 + $0x190] sm:$0xff] }
  0xa8   : > { %v422_v12 = vpack.c.bf16 %v392_v10, %v390_v9  ;;  %v394_v15 = vld [vmem:[%s2316_s14 + $0x1a8] sm:$0xff]  ;;  %v396_v16 = vld [vmem:[%s2316_s14 + $0x1b8] sm:$0xff]  ;;  %v393_v17 = vld [vmem:[%s2316_s14 + $0x1a0] sm:$0xff]  ;;  %v421_v20 = vpack.c.bf16 %v391_v14, %v389_v13 }
  0xa9   : > { %v395_v18 = vld [vmem:[%s2316_s14 + $0x1b0] sm:$0xff]  ;;  %v893_v21 = vld [vmem:[%s2386_s23 + $0x8] sm:$0xff]  ;;  %v424_v22 = vpack.c.bf16 %v396_v16, %v394_v15  ;;  %v2390_v23 = vld [vmem:[#allocation4 + $0x8] sm:$0xff]  }
  0xaa   : > { %519 = vmatpush1.bf16.msra.mxu0 %v405_v31  ;;  %v2383_v19 = vld [vmem:[#allocation4] sm:$0xff]   ;;  %v895_v24 = vld [vmem:[%s2386_s23 + $0x18] sm:$0xff]  ;;  %v892_v25 = vld [vmem:[%s2386_s23] sm:$0xff]  ;;  %v423_v27 = vpack.c.bf16 %v395_v18, %v393_v17 }
  0xab   : > { %520 = vmatprep.subr.bf16.mxu0 %v408_v32  ;;  %733 = vmatpush1.bf16.msra.mxu1 %v2383_v19  ;;  %v894_v26 = vld [vmem:[%s2386_s23 + $0x10] sm:$0xff]  ;;  %v897_v28 = vld [vmem:[%s2386_s23 + $0x28] sm:$0xff]  ;;  %v949_v30 = vpack.c.bf16 %v895_v24, %v893_v21  ;;  %v2400_v31 = vld [vmem:[#allocation4 + $0x10] sm:$0xff]  }
  0xac   : > { %734 = vmatprep.subr.bf16.mxu1 %v2045_v63  ;;  %v2397_v29 = vld [vmem:[#allocation2] ss:$8 sps:$4 sm:$0xff]   ;;  %v899_v32 = vld [vmem:[%s2386_s23 + $0x38] sm:$0xff]  ;;  %v898_v34 = vld [vmem:[%s2386_s23 + $0x30] sm:$0xff]  ;;  %v948_v36 = vpack.c.bf16 %v894_v26, %v892_v25 }
  0xad   : > { %v896_v33 = vld [vmem:[%s2386_s23 + $0x20] sm:$0xff]  ;;  %v2406_v35 = vld [vmem:[#allocation2 + $0x14] ss:$8 sps:$4 sm:$0xff]   ;;  %v2410_v40 = vld [vmem:[#allocation4 + $0x18] sm:$0xff]  }
  0xae   : > { %521 = vmatpush1.bf16.msra.mxu0 %v407_v38  ;;  %v901_v38 = vld [vmem:[%s2386_s23 + $0x48] sm:$0xff]  ;;  %v903_v41 = vld [vmem:[%s2386_s23 + $0x58] sm:$0xff]  ;;  %v950_v42 = vpack.c.bf16 %v898_v34, %v896_v33  ;;  %v2420_v46 = vld [vmem:[#allocation4 + $0x20] sm:$0xff]  }
  0xaf   : > { %522 = vmatprep.subr.bf16.mxu0 %v410_v39  ;;  %735 = vmatpush1.bf16.msra.mxu1 %v2390_v23  ;;  %v951_v39 = vpack.c.bf16 %v899_v32, %v897_v28  ;;  %v953_v43 = vpack.c.bf16 %v903_v41, %v901_v38  ;;  %v905_v47 = vld [vmem:[%s2386_s23 + $0x68] sm:$0xff]  ;;  %v907_v48 = vld [vmem:[%s2386_s23 + $0x78] sm:$0xff]  ;;  %v904_v53 = vld [vmem:[%s2386_s23 + $0x60] sm:$0xff] }
  0xb0   : > { %736 = vmatprep.subr.bf16.mxu1 %v2045_v63  ;;  %v2425_v49 = vld [vmem:[#allocation2 + $0x10] ss:$8 sps:$4 sm:$0xff]   ;;  %v955_v52 = vpack.c.bf16 %v907_v48, %v905_v47  ;;  %v908_v60 = vld [vmem:[%s2386_s23 + $0x80] sm:$0xff]  ;;  %v2450_v4 = vld [vmem:[#allocation2 + $0x34] ss:$8 sps:$4 sm:$0xff]  }
  0xb1   : > { %v906_v54 = vld [vmem:[%s2386_s23 + $0x70] sm:$0xff]  ;;  %v2432_v55 = vld [vmem:[#allocation4 + $0x28] sm:$0xff]   ;;  %v2448_v2 = vld [vmem:[#allocation2 + $0x20] ss:$8 sps:$4 sm:$0xff]  }
  0xb2   : > { %523 = vmatpush1.bf16.msra.mxu0 %v409_v44  ;;  %v900_v44 = vld [vmem:[%s2386_s23 + $0x40] sm:$0xff]  ;;  %v954_v58 = vpack.c.bf16 %v906_v54, %v904_v53  ;;  %v910_v61 = vld [vmem:[%s2386_s23 + $0x90] sm:$0xff]  ;;  %v915_v1 = vld [vmem:[%s2386_s23 + $0xb8] sm:$0xff] }
  0xb3   : > { %524 = vmatprep.subr.bf16.mxu0 %v412_v45  ;;  %737 = vmatpush1.bf16.msra.mxu1 %v2400_v31  ;;  %v902_v45 = vld [vmem:[%s2386_s23 + $0x50] sm:$0xff]  ;;  %v956_v3 = vpack.c.bf16 %v910_v61, %v908_v60  ;;  %v2455_v8 = vld [vmem:[#allocation4 + $0x38] sm:$0xff]   ;;  %v919_v10 = vld [vmem:[%s2386_s23 + $0xd8] sm:$0xff] }
  0xb4   : > { %738 = vmatprep.subr.bf16.mxu1 %v2045_v63  ;;  %v914_v7 = vld [vmem:[%s2386_s23 + $0xb0] sm:$0xff]  ;;  %v917_v9 = vld [vmem:[%s2386_s23 + $0xc8] sm:$0xff]  ;;  %v916_v13 = vld [vmem:[%s2386_s23 + $0xc0] sm:$0xff] }
  0xb5   : > { %v918_v14 = vld [vmem:[%s2386_s23 + $0xd0] sm:$0xff]  ;;  %v921_v16 = vld [vmem:[%s2386_s23 + $0xe8] sm:$0xff]  ;;  %v923_v17 = vld [vmem:[%s2386_s23 + $0xf8] sm:$0xff] }
  0xb6   : > { %525 = vmatpush1.bf16.msra.mxu0 %v411_v50  ;;  %v952_v50 = vpack.c.bf16 %v902_v45, %v900_v44  ;;  %v2466_v15 = vld [vmem:[#allocation4 + $0x40] sm:$0xff]   ;;  %v2473_v21 = vld [vmem:[#allocation2 + $0x44] ss:$8 sps:$4 sm:$0xff]   ;;  %v2478_v26 = vld [vmem:[#allocation4 + $0x48] sm:$0xff]  }
  0xb7   : > { %526 = vmatprep.subr.bf16.mxu0 %v414_v51  ;;  %739 = vmatpush1.bf16.msra.mxu1 %v2410_v40  ;;  %v2427_v51 = vld [vmem:[#allocation2 + $0x24] ss:$8 sps:$4 sm:$0xff]   ;;  %v2471_v18 = vld [vmem:[#allocation2 + $0x30] ss:$8 sps:$4 sm:$0xff]   ;;  %v2494_v41 = vld [vmem:[#allocation2 + $0x40] ss:$8 sps:$4 sm:$0xff]  }
  0xb8   : > { %740 = vmatprep.subr.bf16.mxu1 %v2045_v63  ;;  %v920_v24 = vld [vmem:[%s2386_s23 + $0xe0] sm:$0xff]  ;;  %v922_v25 = vld [vmem:[%s2386_s23 + $0xf0] sm:$0xff]  ;;  %v927_v28 = vld [vmem:[%s2386_s23 + $0x118] sm:$0xff] }
  0xb9   : > { %v924_v33 = vld [vmem:[%s2386_s23 + $0x100] sm:$0xff]  ;;  %v926_v34 = vld [vmem:[%s2386_s23 + $0x110] sm:$0xff]  ;;  %v929_v38 = vld [vmem:[%s2386_s23 + $0x128] sm:$0xff] }
  0xba   : > { %527 = vmatpush1.bf16.msra.mxu0 %v413_v56  ;;  %v909_v56 = vld [vmem:[%s2386_s23 + $0x88] sm:$0xff]  ;;  %v928_v45 = vld [vmem:[%s2386_s23 + $0x120] sm:$0xff]  ;;  %v930_v47 = vld [vmem:[%s2386_s23 + $0x130] sm:$0xff] }
  0xbb   : > { %528 = vmatprep.subr.bf16.mxu0 %v416_v57  ;;  %741 = vmatpush1.bf16.msra.mxu1 %v2420_v46  ;;  %v911_v57 = vld [vmem:[%s2386_s23 + $0x98] sm:$0xff]  ;;  %v2501_v48 = vld [vmem:[#allocation4 + $0x58] sm:$0xff]   ;;  %v966_v53 = vpack.c.bf16 %v930_v47, %v928_v45 }
  0xbc   : > { %742 = vmatprep.subr.bf16.mxu1 %v2045_v63  ;;  %v957_v59 = vpack.c.bf16 %v911_v57, %v909_v56  ;;  %v932_v56 = vld [vmem:[%s2386_s23 + $0x140] sm:$0xff]  ;;  %v934_v57 = vld [vmem:[%s2386_s23 + $0x150] sm:$0xff] }
  0xbd   : > { %v1825_v60 = vld [vmem:[#allocation2 + $0x50] ss:$8 sps:$4 sm:$0xff]   ;;  %v968_v61 = vpack.c.bf16 %v934_v57, %v932_v56 }
  0xbe   : > { %529 = vmatpush1.bf16.msra.mxu0 %v415_v62  ;;  %v2443_v62 = vld [vmem:[#allocation4 + $0x30] sm:$0xff]  }
  0xbf   : > { %530 = vmatprep.subr.bf16.mxu0 %v418_v0  ;;  %743 = vmatpush1.bf16.msra.mxu1 %v2432_v55  ;;  %v913_v0 = vld [vmem:[%s2386_s23 + $0xa8] sm:$0xff] }
  0xc0   : > { %744 = vmatprep.subr.bf16.mxu1 %v2045_v63 }
  0xc2   : > { %531 = vmatpush1.bf16.msra.mxu0 %v417_v5  ;;  %v959_v5 = vpack.c.bf16 %v915_v1, %v913_v0  ;;  %v1826_v0 = vld [vmem:[#allocation2 + $0x64] ss:$8 sps:$4 sm:$0xff]  }
  0xc3   : > { %532 = vmatprep.subr.bf16.mxu0 %v420_v6  ;;  %v912_v6 = vld [vmem:[%s2386_s23 + $0xa0] sm:$0xff]  ;;  %745 = vmatpush1.bf16.msra.mxu1 %v2443_v62 }
  0xc4   : > { %746 = vmatprep.subr.bf16.mxu1 %v2045_v63 }
  0xc6   : > { %533 = vmatpush1.bf16.msra.mxu0 %v419_v11  ;;  %v958_v11 = vpack.c.bf16 %v914_v7, %v912_v6  ;;  %v941_v6 = vld [vmem:[%s2386_s23 + $0x188] sm:$0xff]  ;;  %v943_v7 = vld [vmem:[%s2386_s23 + $0x198] sm:$0xff] }
  0xc7   : > { %534 = vmatprep.subr.bf16.mxu0 %v422_v12  ;;  %v961_v12 = vpack.c.bf16 %v919_v10, %v917_v9  ;;  %747 = vmatpush1.bf16.msra.mxu1 %v2455_v8  ;;  %v973_v10 = vpack.c.bf16 %v943_v7, %v941_v6 }
  0xc8   : > { %748 = vmatprep.subr.bf16.mxu1 %v2045_v63 }
  0xca   : > { %535 = vmatpush1.bf16.msra.mxu0 %v421_v20  ;;  %v960_v20 = vpack.c.bf16 %v918_v14, %v916_v13  ;;  %v945_v13 = vld [vmem:[%s2386_s23 + $0x1a8] sm:$0xff]  ;;  %v947_v14 = vld [vmem:[%s2386_s23 + $0x1b8] sm:$0xff] }
  0xcb   : > { %536 = vmatprep.subr.bf16.mxu0 %v424_v22  ;;  %v963_v22 = vpack.c.bf16 %v923_v17, %v921_v16  ;;  %749 = vmatpush1.bf16.msra.mxu1 %v2466_v15  ;;  %v1828_v16 = vld [vmem:[#allocation2 + $0x60] ss:$8 sps:$4 sm:$0xff]  }
  0xcc   : > { %750 = vmatprep.subr.bf16.mxu1 %v2045_v63 }
  0xce   : > { %537 = vmatpush1.bf16.msra.mxu0 %v423_v27  ;;  %v925_v27 = vld [vmem:[%s2386_s23 + $0x108] sm:$0xff] }
  0xcf   : > { %976 = vmatprep.subr.bf16.mxu0 %v949_v30  ;;  %v962_v30 = vpack.c.bf16 %v922_v25, %v920_v24  ;;  %v965_v32 = vpack.c.bf16 %v927_v28, %v925_v27  ;;  %751 = vmatpush1.bf16.msra.mxu1 %v2478_v26  ;;  %v946_v24 = vld [vmem:[%s2386_s23 + $0x1b0] sm:$0xff] }
  0xd0   : > { %752 = vmatprep.subr.bf16.mxu1 %v2045_v63 }
  0xd1   : > { %543 = vmatmul.mubr.bf16.vlgmr.msra.gmra.mrb[0].mxu0 %v2397_v29 }
  0xd2   : > { %977 = vmatpush1.bf16.msra.mxu0 %v948_v36  ;;  %1580 = vmatprep.mubr.msk.bf16.mxu0 %vm488_vm0, %v2406_v35  ;;  %v2489_v36 = vld [vmem:[#allocation4 + $0x50] sm:$0xff]  }
  0xd3   : > { %978 = vmatprep.subr.bf16.mxu0 %v951_v39  ;;  %v931_v39 = vld [vmem:[%s2386_s23 + $0x138] sm:$0xff]  ;;  %753 = vmatpush1.bf16.msra.mxu1 %v2489_v36 }
  0xd4   : > { %v967_v44 = vpack.c.bf16 %v931_v39, %v929_v38  ;;  %754 = vmatprep.subr.bf16.mxu1 %v2045_v63 }
  0xd6   : > { %979 = vmatpush1.bf16.msra.mxu0 %v950_v42  ;;  %v964_v42 = vpack.c.bf16 %v926_v34, %v924_v33 }
  0xd7   : > { %980 = vmatprep.subr.bf16.mxu0 %v953_v43  ;;  %v2496_v43 = vld [vmem:[#allocation2 + $0x54] ss:$8 sps:$4 sm:$0xff]   ;;  %755 = vmatpush1.bf16.msra.mxu1 %v2501_v48 }
  0xd8   : > { %756 = vmatprep.subr.bf16.mxu1 %v2045_v63 }
  0xd9   : > { %553 = vmatmul.mubr.bf16.gmra.mrb[4].mxu0 %v2425_v49 }
  0xda   : > { %981 = vmatpush1.bf16.msra.mxu0 %v952_v50  ;;  %1581 = vmatprep.mubr.msk.bf16.mxu0 %vm488_vm0, %v2427_v51  ;;  %v933_v50 = vld [vmem:[%s2386_s23 + $0x148] sm:$0xff] }
  0xdb   : > { %982 = vmatprep.subr.bf16.mxu0 %v955_v52  ;;  %v935_v52 = vld [vmem:[%s2386_s23 + $0x158] sm:$0xff] }
  0xdc   : > { %v969_v54 = vpack.c.bf16 %v935_v52, %v933_v50 }
  0xde   : > { %983 = vmatpush1.bf16.msra.mxu0 %v954_v58  ;;  %v937_v58 = vld [vmem:[%s2386_s23 + $0x168] sm:$0xff] }
  0xdf   : > { %984 = vmatprep.subr.bf16.mxu0 %v957_v59  ;;  %v939_v59 = vld [vmem:[%s2386_s23 + $0x178] sm:$0xff] }
  0xe0   : > { %v971_v1 = vpack.c.bf16 %v939_v59, %v937_v58 }
  0xe1   : > { %563 = vmatmul.mubr.bf16.gmra.mrb[8].mxu0 %v2448_v2 }
  0xe2   : > { %985 = vmatpush1.bf16.msra.mxu0 %v956_v3  ;;  %1582 = vmatprep.mubr.msk.bf16.mxu0 %vm488_vm0, %v2450_v4  ;;  %v936_v3 = vld [vmem:[%s2386_s23 + $0x160] sm:$0xff] }
  0xe3   : > { %986 = vmatprep.subr.bf16.mxu0 %v959_v5  ;;  %v938_v5 = vld [vmem:[%s2386_s23 + $0x170] sm:$0xff] }
  0xe4   : > { %v970_v9 = vpack.c.bf16 %v938_v5, %v936_v3 }
  0xe6   : > { %987 = vmatpush1.bf16.msra.mxu0 %v958_v11  ;;  %v940_v11 = vld [vmem:[%s2386_s23 + $0x180] sm:$0xff] }
  0xe7   : > { %988 = vmatprep.subr.bf16.mxu0 %v961_v12  ;;  %v942_v12 = vld [vmem:[%s2386_s23 + $0x190] sm:$0xff] }
  0xe8   : > { %v972_v17 = vpack.c.bf16 %v942_v12, %v940_v11 }
  0xe9   : > { %573 = vmatmul.mubr.bf16.gmra.mrb[12].mxu0 %v2471_v18 }
  0xea   : > { %989 = vmatpush1.bf16.msra.mxu0 %v960_v20  ;;  %1583 = vmatprep.mubr.msk.bf16.mxu0 %vm488_vm0, %v2473_v21  ;;  %v975_v20 = vpack.c.bf16 %v947_v14, %v945_v13 }
  0xeb   : > { %990 = vmatprep.subr.bf16.mxu0 %v963_v22  ;;  %v944_v22 = vld [vmem:[%s2386_s23 + $0x1a0] sm:$0xff] }
  0xec   : > { %v974_v25 = vpack.c.bf16 %v946_v24, %v944_v22 }
  0xee   : > { %991 = vmatpush1.bf16.msra.mxu0 %v962_v30 }
  0xef   : > { %992 = vmatprep.subr.bf16.mxu0 %v965_v32 }
  0xf1   : > { %583 = vmatmul.mubr.bf16.gmra.mrb[16].mxu0 %v2494_v41 }
  0xf2   : > { %993 = vmatpush1.bf16.msra.mxu0 %v964_v42  ;;  %1584 = vmatprep.mubr.msk.bf16.mxu0 %vm488_vm0, %v2496_v43 }
  0xf3   : > { %994 = vmatprep.subr.bf16.mxu0 %v967_v44 }
  0xf6   : > { %995 = vmatpush1.bf16.msra.mxu0 %v966_v53 }
  0xf7   : > { %996 = vmatprep.subr.bf16.mxu0 %v969_v54 }
  0xf9   : > { %593 = vmatmul.mubr.bf16.gmra.mrb[20].mxu0 %v1825_v60 }
  0xfa   : > { %997 = vmatpush1.bf16.msra.mxu0 %v968_v61  ;;  %1585 = vmatprep.mubr.msk.bf16.mxu0 %vm488_vm0, %v1826_v0 }
  0xfb   : > { %998 = vmatprep.subr.bf16.mxu0 %v971_v1 }
  0xfe   : > { %999 = vmatpush1.bf16.msra.mxu0 %v970_v9 }
  0xff   : > { %1000 = vmatprep.subr.bf16.mxu0 %v973_v10 }
 0x101   : > { %603 = vmatmul.mubr.bf16.gmra.mrb[24].mxu0 %v1828_v16 }
 0x102   : > { %1001 = vmatpush1.bf16.msra.mxu0 %v972_v17  ;;  %1621 = vmatprep.mubr.msk.bf16.mxu0 %vm488_vm0, %v2348_v37  ;;  %v2540_v37 = vld [vmem:[#allocation4 + $0x60] sm:$0xff]  }
 0x103   : > { %1002 = vmatprep.subr.bf16.mxu0 %v975_v20  ;;  %757 = vmatpush1.bf16.msra.mxu1 %v2540_v37 }
 0x104   : > { %758 = vmatprep.subr.bf16.mxu1 %v2045_v63 }
 0x106   : > { %1003 = vmatpush1.bf16.msra.mxu0 %v974_v25 }
 0x109   : > { %1009 = vmatmul.mubr.bf16.vlgmr.msra.gmra.mrb[28].mxu0 %v2397_v29  ;;  %v2544_v29 = vld [vmem:[#allocation4 + $0x68] sm:$0xff]  }
 0x10a   : > { %1622 = vmatprep.mubr.msk.bf16.mxu0 %vm488_vm0, %v2406_v35  ;;  %759 = vmatpush1.bf16.msra.mxu1 %v2544_v29 }
 0x10b   : > { %1114 = vmatprep.subr.bf16.mxu1 %v2045_v63 }
 0x111   : > { %1019 = vmatmul.mubr.bf16.gmra.mrb[32].mxu0 %v2425_v49 }
 0x112   : > { %1623 = vmatprep.mubr.msk.bf16.mxu0 %vm488_vm0, %v2427_v51 }
 0x119   : > { %1029 = vmatmul.mubr.bf16.gmra.mrb[36].mxu0 %v2448_v2 }
 0x11a   : > { %1624 = vmatprep.mubr.msk.bf16.mxu0 %vm488_vm0, %v2450_v4 }
 0x121   : > { %1039 = vmatmul.mubr.bf16.gmra.mrb[40].mxu0 %v2471_v18 }
 0x122   : > { %1625 = vmatprep.mubr.msk.bf16.mxu0 %vm488_vm0, %v2473_v21 }
 0x129   : > { %1049 = vmatmul.mubr.bf16.gmra.mrb[44].mxu0 %v2494_v41 }
 0x12a   : > { %1626 = vmatprep.mubr.msk.bf16.mxu0 %vm488_vm0, %v2496_v43 }
 0x131   : > { %1059 = vmatmul.mubr.bf16.gmra.mrb[48].mxu0 %v1825_v60 }
 0x132   : > { %1627 = vmatprep.mubr.msk.bf16.mxu0 %vm488_vm0, %v1826_v0 }
 0x139   : > { %1069 = vmatmul.mubr.bf16.gmra.mrb[52].mxu0 %v1828_v16 }
 0x1a4   : > { %v544_v35 = vpop.f32.mrb[0].mxu0 }
 0x1a5   : > { %v546_v49 = vpop.f32.mrb[1].mxu0 }
 0x1a6   : > { %v548_v51 = vpop.f32.mrb[2].mxu0 }
 0x1a7   : > { %v613_v2 = vpack.c.bf16 %v548_v51, %v544_v35  ;;  %v550_v4 = vpop.f32.mrb[3].mxu0 }
 0x1a8   : > { %v614_v18 = vpack.c.bf16 %v550_v4, %v546_v49 }
 0x1aa   : > { %1600 = vmatprep.mubr.msk.bf16.mxu1 %vm488_vm0, %v614_v18 }
 0x1ab   : > { %765 = vmatmul.mubr.bf16.vlgmr.msra.gmra.mrb[0].mxu1 %v613_v2 }
 0x1ac   : > { %v554_v21 = vpop.f32.mrb[4].mxu0  ;;  %1115 = vmatpush1.bf16.msra.mxu1 %v2383_v19 }
 0x1ad   : > { %v556_v27 = vpop.f32.mrb[5].mxu0  ;;  %1116 = vmatprep.subr.bf16.mxu1 %v2045_v63 }
 0x1ae   : > { %v558_v28 = vpop.f32.mrb[6].mxu0 }
 0x1af   : > { %v615_v30 = vpack.c.bf16 %v558_v28, %v554_v21  ;;  %v560_v32 = vpop.f32.mrb[7].mxu0 }
 0x1b0   : > { %v616_v33 = vpack.c.bf16 %v560_v32, %v556_v27  ;;  %1117 = vmatpush1.bf16.msra.mxu1 %v2390_v23 }
 0x1b1   : > { %1118 = vmatprep.subr.bf16.mxu1 %v2045_v63 }
 0x1b2   : > { %1601 = vmatprep.mubr.msk.bf16.mxu1 %vm488_vm0, %v616_v33 }
 0x1b3   : > { %773 = vmatmul.mubr.bf16.gmra.mrb[4].mxu1 %v615_v30 }
 0x1b4   : > { %v564_v34 = vpop.f32.mrb[8].mxu0  ;;  %1119 = vmatpush1.bf16.msra.mxu1 %v2400_v31 }
 0x1b5   : > { %v566_v38 = vpop.f32.mrb[9].mxu0  ;;  %1120 = vmatprep.subr.bf16.mxu1 %v2045_v63 }
 0x1b6   : > { %v568_v19 = vpop.f32.mrb[10].mxu0 }
 0x1b7   : > { %v617_v39 = vpack.c.bf16 %v568_v19, %v564_v34  ;;  %v570_v41 = vpop.f32.mrb[11].mxu0 }
 0x1b8   : > { %v618_v42 = vpack.c.bf16 %v570_v41, %v566_v38  ;;  %1121 = vmatpush1.bf16.msra.mxu1 %v2410_v40 }
 0x1b9   : > { %1122 = vmatprep.subr.bf16.mxu1 %v2045_v63 }
 0x1ba   : > { %1602 = vmatprep.mubr.msk.bf16.mxu1 %vm488_vm0, %v618_v42 }
 0x1bb   : > { %781 = vmatmul.mubr.bf16.gmra.mrb[8].mxu1 %v617_v39 }
 0x1bc   : > { %v574_v23 = vpop.f32.mrb[12].mxu0  ;;  %1123 = vmatpush1.bf16.msra.mxu1 %v2420_v46 }
 0x1bd   : > { %v576_v43 = vpop.f32.mrb[13].mxu0  ;;  %1124 = vmatprep.subr.bf16.mxu1 %v2045_v63 }
 0x1be   : > { %v578_v31 = vpop.f32.mrb[14].mxu0 }
 0x1bf   : > { %v619_v44 = vpack.c.bf16 %v578_v31, %v574_v23  ;;  %v580_v45 = vpop.f32.mrb[15].mxu0 }
 0x1c0   : > { %v620_v47 = vpack.c.bf16 %v580_v45, %v576_v43  ;;  %1125 = vmatpush1.bf16.msra.mxu1 %v2432_v55 }
 0x1c1   : > { %1126 = vmatprep.subr.bf16.mxu1 %v2045_v63 }
 0x1c2   : > { %1603 = vmatprep.mubr.msk.bf16.mxu1 %vm488_vm0, %v620_v47 }
 0x1c3   : > { %789 = vmatmul.mubr.bf16.gmra.mrb[12].mxu1 %v619_v44 }
 0x1c4   : > { %v584_v40 = vpop.f32.mrb[16].mxu0  ;;  %1127 = vmatpush1.bf16.msra.mxu1 %v2443_v62 }
 0x1c5   : > { %v586_v50 = vpop.f32.mrb[17].mxu0  ;;  %1128 = vmatprep.subr.bf16.mxu1 %v2045_v63 }
 0x1c6   : > { %v588_v46 = vpop.f32.mrb[18].mxu0 }
 0x1c7   : > { %v621_v52 = vpack.c.bf16 %v588_v46, %v584_v40  ;;  %v590_v53 = vpop.f32.mrb[19].mxu0 }
 0x1c8   : > { %v622_v54 = vpack.c.bf16 %v590_v53, %v586_v50  ;;  %1129 = vmatpush1.bf16.msra.mxu1 %v2455_v8 }
 0x1c9   : > { %1130 = vmatprep.subr.bf16.mxu1 %v2045_v63 }
 0x1ca   : > { %1604 = vmatprep.mubr.msk.bf16.mxu1 %vm488_vm0, %v622_v54 }
 0x1cb   : > { %797 = vmatmul.mubr.bf16.gmra.mrb[16].mxu1 %v621_v52 }
 0x1cc   : > { %v594_v55 = vpop.f32.mrb[20].mxu0  ;;  %1131 = vmatpush1.bf16.msra.mxu1 %v2466_v15 }
 0x1cd   : > { %v596_v56 = vpop.f32.mrb[21].mxu0  ;;  %1132 = vmatprep.subr.bf16.mxu1 %v2045_v63 }
 0x1ce   : > { %v598_v62 = vpop.f32.mrb[22].mxu0 }
 0x1cf   : > { %v623_v57 = vpack.c.bf16 %v598_v62, %v594_v55  ;;  %v600_v58 = vpop.f32.mrb[23].mxu0 }
 0x1d0   : > { %v624_v59 = vpack.c.bf16 %v600_v58, %v596_v56  ;;  %1133 = vmatpush1.bf16.msra.mxu1 %v2478_v26 }
 0x1d1   : > { %1134 = vmatprep.subr.bf16.mxu1 %v2045_v63 }
 0x1d2   : > { %1605 = vmatprep.mubr.msk.bf16.mxu1 %vm488_vm0, %v624_v59 }
 0x1d3   : > { %805 = vmatmul.mubr.bf16.gmra.mrb[20].mxu1 %v623_v57 }
 0x1d4   : > { %v604_v8 = vpop.f32.mrb[24].mxu0  ;;  %1135 = vmatpush1.bf16.msra.mxu1 %v2489_v36 }
 0x1d5   : > { %v606_v60 = vpop.f32.mrb[25].mxu0  ;;  %1136 = vmatprep.subr.bf16.mxu1 %v2045_v63 }
 0x1d6   : > { %v608_v15 = vpop.f32.mrb[26].mxu0 }
 0x1d7   : > { %v625_v61 = vpack.c.bf16 %v608_v15, %v604_v8  ;;  %v610_v0 = vpop.f32.mrb[27].mxu0 }
 0x1d8   : > { %v626_v1 = vpack.c.bf16 %v610_v0, %v606_v60  ;;  %1137 = vmatpush1.bf16.msra.mxu1 %v2501_v48 }
 0x1d9   : > { %1138 = vmatprep.subr.bf16.mxu1 %v2045_v63 }
 0x1da   : > { %1606 = vmatprep.mubr.msk.bf16.mxu1 %vm488_vm0, %v626_v1 }
 0x1db   : > { %813 = vmatmul.mubr.bf16.gmra.mrb[24].mxu1 %v625_v61 }
 0x1dc   : > { %v1010_v26 = vpop.f32.mrb[28].mxu0  ;;  %1139 = vmatpush1.bf16.msra.mxu1 %v2540_v37 }
 0x1dd   : > { %v1012_v3 = vpop.f32.mrb[29].mxu0  ;;  %1140 = vmatprep.subr.bf16.mxu1 %v2045_v63 }
 0x1de   : > { %v1014_v36 = vpop.f32.mrb[30].mxu0 }
 0x1df   : > { %v1079_v5 = vpack.c.bf16 %v1014_v36, %v1010_v26  ;;  %v1016_v6 = vpop.f32.mrb[31].mxu0 }
 0x1e0   : > { %v1080_v7 = vpack.c.bf16 %v1016_v6, %v1012_v3  ;;  %1141 = vmatpush1.bf16.msra.mxu1 %v2544_v29 }
 0x1e2   : > { %1628 = vmatprep.mubr.msk.bf16.mxu1 %vm488_vm0, %v1080_v7 }
 0x1e3   : > { %1147 = vmatmul.mubr.bf16.vlgmr.msra.gmra.mrb[28].mxu1 %v1079_v5 }
 0x1e4   : > { %v1020_v48 = vpop.f32.mrb[32].mxu0 }
 0x1e5   : > { %v1022_v9 = vpop.f32.mrb[33].mxu0 }
 0x1e6   : > { %v1024_v10 = vpop.f32.mrb[34].mxu0 }
 0x1e7   : > { %v1081_v11 = vpack.c.bf16 %v1024_v10, %v1020_v48  ;;  %v1026_v12 = vpop.f32.mrb[35].mxu0 }
 0x1e8   : > { %v1082_v13 = vpack.c.bf16 %v1026_v12, %v1022_v9 }
 0x1ea   : > { %1629 = vmatprep.mubr.msk.bf16.mxu1 %vm488_vm0, %v1082_v13 }
 0x1eb   : > { %1155 = vmatmul.mubr.bf16.gmra.mrb[32].mxu1 %v1081_v11 }
 0x1ec   : > { %v1030_v14 = vpop.f32.mrb[36].mxu0 }
 0x1ed   : > { %v1032_v63 = vpop.f32.mrb[37].mxu0 }
 0x1ee   : > { %v1034_v16 = vpop.f32.mrb[38].mxu0 }
 0x1ef   : > { %v1083_v17 = vpack.c.bf16 %v1034_v16, %v1030_v14  ;;  %v1036_v20 = vpop.f32.mrb[39].mxu0 }
 0x1f0   : > { %v1084_v22 = vpack.c.bf16 %v1036_v20, %v1032_v63 }
 0x1f2   : > { %1630 = vmatprep.mubr.msk.bf16.mxu1 %vm488_vm0, %v1084_v22 }
 0x1f3   : > { %1163 = vmatmul.mubr.bf16.gmra.mrb[36].mxu1 %v1083_v17 }
 0x1f4   : > { %v1040_v24 = vpop.f32.mrb[40].mxu0 }
 0x1f5   : > { %v1042_v25 = vpop.f32.mrb[41].mxu0 }
 0x1f6   : > { %v1044_v37 = vpop.f32.mrb[42].mxu0 }
 0x1f7   : > { %v1085_v29 = vpack.c.bf16 %v1044_v37, %v1040_v24  ;;  %v1046_v35 = vpop.f32.mrb[43].mxu0 }
 0x1f8   : > { %v1086_v49 = vpack.c.bf16 %v1046_v35, %v1042_v25 }
 0x1fa   : > { %1631 = vmatprep.mubr.msk.bf16.mxu1 %vm488_vm0, %v1086_v49 }
 0x1fb   : > { %1171 = vmatmul.mubr.bf16.gmra.mrb[40].mxu1 %v1085_v29 }
 0x1fc   : > { %v1050_v51 = vpop.f32.mrb[44].mxu0 }
 0x1fd   : > { %v1052_v2 = vpop.f32.mrb[45].mxu0 }
 0x1fe   : > { %v1054_v4 = vpop.f32.mrb[46].mxu0 }
 0x1ff   : > { %v1087_v18 = vpack.c.bf16 %v1054_v4, %v1050_v51  ;;  %v1056_v21 = vpop.f32.mrb[47].mxu0 }
 0x200   : > { %v1088_v27 = vpack.c.bf16 %v1056_v21, %v1052_v2 }
 0x202   : > { %1632 = vmatprep.mubr.msk.bf16.mxu1 %vm488_vm0, %v1088_v27 }
 0x203   : > { %1179 = vmatmul.mubr.bf16.gmra.mrb[44].mxu1 %v1087_v18 }
 0x204   : > { %v1060_v28 = vpop.f32.mrb[48].mxu0 }
 0x205   : > { %v1062_v30 = vpop.f32.mrb[49].mxu0 }
 0x206   : > { %v1064_v32 = vpop.f32.mrb[50].mxu0 }
 0x207   : > { %v1089_v33 = vpack.c.bf16 %v1064_v32, %v1060_v28  ;;  %v1066_v34 = vpop.f32.mrb[51].mxu0 }
 0x208   : > { %v1090_v38 = vpack.c.bf16 %v1066_v34, %v1062_v30 }
 0x20a   : > { %1633 = vmatprep.mubr.msk.bf16.mxu1 %vm488_vm0, %v1090_v38 }
 0x20b   : > { %1187 = vmatmul.mubr.bf16.gmra.mrb[48].mxu1 %v1089_v33 }
 0x20c   : > { %v1070_v19 = vpop.f32.mrb[52].mxu0 }
 0x20d   : > { %v1072_v39 = vpop.f32.mrb[53].mxu0 }
 0x20e   : > { %v1074_v41 = vpop.f32.mrb[54].mxu0 }
 0x20f   : > { %v1091_v42 = vpack.c.bf16 %v1074_v41, %v1070_v19  ;;  %v1076_v23 = vpop.f32.mrb[55].mxu0 }
 0x210   : > { %v1092_v43 = vpack.c.bf16 %v1076_v23, %v1072_v39 }
 0x212   : > { %1634 = vmatprep.mubr.msk.bf16.mxu1 %vm488_vm0, %v1092_v43 }
 0x213   : > { %1195 = vmatmul.mubr.bf16.gmra.mrb[52].mxu1 %v1091_v42 }
 0x27e   : > { %v766_v31 = vpop.f32.mrb[0].mxu1 }
 0x27f   : > { %v1666_v44 = vpack.c.bf16 %v766_v31, %v766_v31  ;;  %v768_v45 = vpop.f32.mrb[1].mxu1 }
 0x280   : > { %v769_v47 = vpop.f32.mrb[2].mxu1 }
 0x281   : > { %878 = vst.msk [vmem:[%s2595_s10] sm:$0xf] %vm877_vm1, %v1666_v44  ;;  %v1667_v40 = vpack.c.bf16 %v769_v47, %v769_v47  ;;  %v771_v50 = vpop.f32.mrb[3].mxu1 }
 0x283   : > { %879 = vst.msk [vmem:[%s2595_s10 + $0x4] sm:$0xf] %vm877_vm1, %v1667_v40 }
 0x286   : > { %v774_v46 = vpop.f32.mrb[4].mxu1 }
 0x287   : > { %v1668_v52 = vpack.c.bf16 %v774_v46, %v774_v46  ;;  %v776_v53 = vpop.f32.mrb[5].mxu1 }
 0x288   : > { %v777_v54 = vpop.f32.mrb[6].mxu1 }
 0x289   : > { %880 = vst.msk [vmem:[%s2595_s10 + $0x8] sm:$0xf] %vm877_vm1, %v1668_v52  ;;  %v1669_v55 = vpack.c.bf16 %v777_v54, %v777_v54  ;;  %v779_v56 = vpop.f32.mrb[7].mxu1 }
 0x28b   : > { %881 = vst.msk [vmem:[%s2595_s10 + $0xc] sm:$0xf] %vm877_vm1, %v1669_v55 }
 0x28e   : > { %v782_v62 = vpop.f32.mrb[8].mxu1 }
 0x28f   : > { %v1670_v57 = vpack.c.bf16 %v782_v62, %v782_v62  ;;  %v784_v58 = vpop.f32.mrb[9].mxu1 }
 0x290   : > { %v785_v59 = vpop.f32.mrb[10].mxu1 }
 0x291   : > { %882 = vst.msk [vmem:[%s2595_s10 + $0x10] sm:$0xf] %vm877_vm1, %v1670_v57  ;;  %v1671_v8 = vpack.c.bf16 %v785_v59, %v785_v59  ;;  %v787_v60 = vpop.f32.mrb[11].mxu1 }
 0x293   : > { %883 = vst.msk [vmem:[%s2595_s10 + $0x14] sm:$0xf] %vm877_vm1, %v1671_v8 }
 0x296   : > { %v790_v15 = vpop.f32.mrb[12].mxu1 }
 0x297   : > { %v1672_v61 = vpack.c.bf16 %v790_v15, %v790_v15  ;;  %v792_v0 = vpop.f32.mrb[13].mxu1 }
 0x298   : > { %v793_v1 = vpop.f32.mrb[14].mxu1  ;;  %v1301_v0 = vld [vmem:[%s2595_s10] sm:$0xff] (%p2745_p9)  }
 0x299   : > { %884 = vst.msk [vmem:[%s2595_s10 + $0x18] sm:$0xf] %vm877_vm1, %v1672_v61  ;;  %v1673_v26 = vpack.c.bf16 %v793_v1, %v793_v1  ;;  %v795_v3 = vpop.f32.mrb[15].mxu1  ;;  %v1305_v1 = vld [vmem:[%s2595_s10 + $0x8] sm:$0xff] (%p2745_p9)   ;;  %1302 = vst [vmem:[%s1285_s19] sm:$0xff] (%p2745_p9), %v1301_v0  }
 0x29a   : > { %1306 = vst [vmem:[%s1285_s19 + $0x8] sm:$0xff] (%p2745_p9), %v1305_v1  }
 0x29b   : > { %885 = vst.msk [vmem:[%s2595_s10 + $0x1c] sm:$0xf] %vm877_vm1, %v1673_v26  ;;  %v1309_v26 = vld [vmem:[%s2595_s10 + $0x10] sm:$0xff] (%p2745_p9)  }
 0x29c   : > { %1310 = vst [vmem:[%s1285_s19 + $0x10] sm:$0xff] (%p2745_p9), %v1309_v26  }
 0x29e   : > { %v798_v36 = vpop.f32.mrb[16].mxu1 }
 0x29f   : > { %v1674_v5 = vpack.c.bf16 %v798_v36, %v798_v36  ;;  %v800_v6 = vpop.f32.mrb[17].mxu1 }
 0x2a0   : > { %v801_v7 = vpop.f32.mrb[18].mxu1 }
 0x2a1   : > { %886 = vst.msk [vmem:[%s2595_s10 + $0x20] sm:$0xf] %vm877_vm1, %v1674_v5  ;;  %v1675_v48 = vpack.c.bf16 %v801_v7, %v801_v7  ;;  %v803_v9 = vpop.f32.mrb[19].mxu1 }
 0x2a2   : > { %v1313_v3 = vld [vmem:[%s2595_s10 + $0x18] sm:$0xff] (%p2745_p9)  }
 0x2a3   : > { %887 = vst.msk [vmem:[%s2595_s10 + $0x24] sm:$0xf] %vm877_vm1, %v1675_v48  ;;  %1314 = vst [vmem:[%s1285_s19 + $0x18] sm:$0xff] (%p2745_p9), %v1313_v3  }
 0x2a6   : > { %v806_v10 = vpop.f32.mrb[20].mxu1 }
 0x2a7   : > { %v1676_v11 = vpack.c.bf16 %v806_v10, %v806_v10  ;;  %v808_v12 = vpop.f32.mrb[21].mxu1 }
 0x2a8   : > { %v809_v13 = vpop.f32.mrb[22].mxu1 }
 0x2a9   : > { %888 = vst.msk [vmem:[%s2595_s10 + $0x28] sm:$0xf] %vm877_vm1, %v1676_v11  ;;  %v1677_v14 = vpack.c.bf16 %v809_v13, %v809_v13  ;;  %v811_v63 = vpop.f32.mrb[23].mxu1 }
 0x2aa   : > { %v1317_v36 = vld [vmem:[%s2595_s10 + $0x20] sm:$0xff] (%p2745_p9)  }
 0x2ab   : > { %889 = vst.msk [vmem:[%s2595_s10 + $0x2c] sm:$0xf] %vm877_vm1, %v1677_v14  ;;  %1318 = vst [vmem:[%s1285_s19 + $0x20] sm:$0xff] (%p2745_p9), %v1317_v36  }
 0x2ae   : > { %v814_v16 = vpop.f32.mrb[24].mxu1 }
 0x2af   : > { %v1678_v17 = vpack.c.bf16 %v814_v16, %v814_v16  ;;  %v816_v20 = vpop.f32.mrb[25].mxu1 }
 0x2b0   : > { %v817_v22 = vpop.f32.mrb[26].mxu1 }
 0x2b1   : > { %890 = vst.msk [vmem:[%s2595_s10 + $0x30] sm:$0xf] %vm877_vm1, %v1678_v17  ;;  %v1679_v24 = vpack.c.bf16 %v817_v22, %v817_v22  ;;  %v819_v25 = vpop.f32.mrb[27].mxu1 }
 0x2b2   : > { %v1321_v5 = vld [vmem:[%s2595_s10 + $0x28] sm:$0xff] (%p2745_p9)  }
 0x2b3   : > { %891 = vst.msk [vmem:[%s2595_s10 + $0x34] sm:$0xf] %vm877_vm1, %v1679_v24  ;;  %1322 = vst [vmem:[%s1285_s19 + $0x28] sm:$0xff] (%p2745_p9), %v1321_v5  }
 0x2b6   : > { %v1148_v37 = vpop.f32.mrb[28].mxu1 }
 0x2b7   : > { %v1680_v29 = vpack.c.bf16 %v1148_v37, %v1148_v37  ;;  %v1150_v35 = vpop.f32.mrb[29].mxu1 }
 0x2b8   : > { %v1151_v49 = vpop.f32.mrb[30].mxu1 }
 0x2b9   : > { %1649 = vst.msk [vmem:[%s2595_s10 + $0x38] sm:$0xf] %vm877_vm1, %v1680_v29  ;;  %v1681_v51 = vpack.c.bf16 %v1151_v49, %v1151_v49  ;;  %v1153_v2 = vpop.f32.mrb[31].mxu1 }
 0x2ba   : > { %v1325_v6 = vld [vmem:[%s2595_s10 + $0x30] sm:$0xff] (%p2745_p9)  }
 0x2bb   : > { %1650 = vst.msk [vmem:[%s2595_s10 + $0x3c] sm:$0xf] %vm877_vm1, %v1681_v51  ;;  %1326 = vst [vmem:[%s1285_s19 + $0x30] sm:$0xff] (%p2745_p9), %v1325_v6  }
 0x2be   : > { %v1156_v4 = vpop.f32.mrb[32].mxu1 }
 0x2bf   : > { %v1682_v18 = vpack.c.bf16 %v1156_v4, %v1156_v4  ;;  %v1158_v21 = vpop.f32.mrb[33].mxu1 }
 0x2c0   : > { %v1159_v27 = vpop.f32.mrb[34].mxu1 }
 0x2c1   : > { %1651 = vst.msk [vmem:[%s2595_s10 + $0x40] sm:$0xf] %vm877_vm1, %v1682_v18  ;;  %v1683_v28 = vpack.c.bf16 %v1159_v27, %v1159_v27  ;;  %v1161_v30 = vpop.f32.mrb[35].mxu1 }
 0x2c2   : > { %v1329_v7 = vld [vmem:[%s2595_s10 + $0x38] sm:$0xff] (%p2745_p9)  }
 0x2c3   : > { %1652 = vst.msk [vmem:[%s2595_s10 + $0x44] sm:$0xf] %vm877_vm1, %v1683_v28  ;;  %1330 = vst [vmem:[%s1285_s19 + $0x150] sm:$0xff] (%p2745_p9), %v1329_v7  }
 0x2c6   : > { %v1164_v32 = vpop.f32.mrb[36].mxu1 }
 0x2c7   : > { %v1684_v33 = vpack.c.bf16 %v1164_v32, %v1164_v32  ;;  %v1166_v34 = vpop.f32.mrb[37].mxu1 }
 0x2c8   : > { %v1167_v38 = vpop.f32.mrb[38].mxu1 }
 0x2c9   : > { %1653 = vst.msk [vmem:[%s2595_s10 + $0x48] sm:$0xf] %vm877_vm1, %v1684_v33  ;;  %v1685_v19 = vpack.c.bf16 %v1167_v38, %v1167_v38  ;;  %v1169_v39 = vpop.f32.mrb[39].mxu1 }
 0x2ca   : > { %v1333_v48 = vld [vmem:[%s2595_s10 + $0x40] sm:$0xff] (%p2745_p9)  }
 0x2cb   : > { %1654 = vst.msk [vmem:[%s2595_s10 + $0x4c] sm:$0xf] %vm877_vm1, %v1685_v19  ;;  %1334 = vst [vmem:[%s1285_s19 + $0x158] sm:$0xff] (%p2745_p9), %v1333_v48  }
 0x2ce   : > { %v1172_v41 = vpop.f32.mrb[40].mxu1 }
 0x2cf   : > { %v1686_v42 = vpack.c.bf16 %v1172_v41, %v1172_v41  ;;  %v1174_v23 = vpop.f32.mrb[41].mxu1 }
 0x2d0   : > { %v1175_v43 = vpop.f32.mrb[42].mxu1 }
 0x2d1   : > { %1655 = vst.msk [vmem:[%s2595_s10 + $0x50] sm:$0xf] %vm877_vm1, %v1686_v42  ;;  %v1687_v31 = vpack.c.bf16 %v1175_v43, %v1175_v43  ;;  %v1177_v44 = vpop.f32.mrb[43].mxu1 }
 0x2d2   : > { %v1337_v9 = vld [vmem:[%s2595_s10 + $0x48] sm:$0xff] (%p2745_p9)  }
 0x2d3   : > { %1656 = vst.msk [vmem:[%s2595_s10 + $0x54] sm:$0xf] %vm877_vm1, %v1687_v31  ;;  %1338 = vst [vmem:[%s1285_s19 + $0x160] sm:$0xff] (%p2745_p9), %v1337_v9  }
 0x2d6   : > { %v1180_v45 = vpop.f32.mrb[44].mxu1 }
 0x2d7   : > { %v1688_v47 = vpack.c.bf16 %v1180_v45, %v1180_v45  ;;  %v1182_v40 = vpop.f32.mrb[45].mxu1 }
 0x2d8   : > { %v1183_v50 = vpop.f32.mrb[46].mxu1 }
 0x2d9   : > { %1657 = vst.msk [vmem:[%s2595_s10 + $0x58] sm:$0xf] %vm877_vm1, %v1688_v47  ;;  %v1689_v46 = vpack.c.bf16 %v1183_v50, %v1183_v50  ;;  %v1185_v52 = vpop.f32.mrb[47].mxu1 }
 0x2da   : > { %v1341_v10 = vld [vmem:[%s2595_s10 + $0x50] sm:$0xff] (%p2745_p9)  }
 0x2db   : > { %1658 = vst.msk [vmem:[%s2595_s10 + $0x5c] sm:$0xf] %vm877_vm1, %v1689_v46  ;;  %1342 = vst [vmem:[%s1285_s19 + $0x168] sm:$0xff] (%p2745_p9), %v1341_v10  }
 0x2de   : > { %v1188_v53 = vpop.f32.mrb[48].mxu1 }
 0x2df   : > { %v1690_v54 = vpack.c.bf16 %v1188_v53, %v1188_v53  ;;  %v1190_v55 = vpop.f32.mrb[49].mxu1 }
 0x2e0   : > { %v1191_v56 = vpop.f32.mrb[50].mxu1 }
 0x2e1   : > { %1659 = vst.msk [vmem:[%s2595_s10 + $0x60] sm:$0xf] %vm877_vm1, %v1690_v54  ;;  %v1691_v62 = vpack.c.bf16 %v1191_v56, %v1191_v56  ;;  %v1193_v57 = vpop.f32.mrb[51].mxu1 }
 0x2e2   : > { %v1345_v11 = vld [vmem:[%s2595_s10 + $0x58] sm:$0xff] (%p2745_p9)  }
 0x2e3   : > { %1660 = vst.msk [vmem:[%s2595_s10 + $0x64] sm:$0xf] %vm877_vm1, %v1691_v62  ;;  %1346 = vst [vmem:[%s1285_s19 + $0x170] sm:$0xff] (%p2745_p9), %v1345_v11  }
 0x2e5   : > { %1280 = sbr.rel (!%p2745_p9) target bundleno = 756 (0x2f4), region = 56 }
 0x2e6   : > { %v1196_v58 = vpop.f32.mrb[52].mxu1 }
 0x2e7   : > { %v1692_v59 = vpack.c.bf16 %v1196_v58, %v1196_v58  ;;  %v1198_v8 = vpop.f32.mrb[53].mxu1 }
 0x2e8   : > { %v1199_v60 = vpop.f32.mrb[54].mxu1 }
 0x2e9   : > { %1661 = vst.msk [vmem:[%s2595_s10 + $0x68] sm:$0xf] %vm877_vm1, %v1692_v59  ;;  %v1693_v15 = vpack.c.bf16 %v1199_v60, %v1199_v60  ;;  %v1201_v61 = vpop.f32.mrb[55].mxu1 }
 0x2ea   : > { %v1349_v12 = vld [vmem:[%s2595_s10 + $0x60] sm:$0xff] (%p2745_p9)  }
 0x2eb   : > { %1662 = vst.msk [vmem:[%s2595_s10 + $0x6c] sm:$0xf] %vm877_vm1, %v1693_v15  ;;  %1350 = vst [vmem:[%s1285_s19 + $0x178] sm:$0xff] (%p2745_p9), %v1349_v12  }
 0x2f2   : > { %v1353_v13 = vld [vmem:[%s2595_s10 + $0x68] sm:$0xff]  }
 0x2f3   : > { %1354 = vst [vmem:[%s1285_s19 + $0x180] sm:$0xff] %v1353_v13  }
 0x2f4 PF: > { %s16_s22 = sadd.s32 1, %s2033_s22   ;;  %s2746_s18 = sld [smem:[#allocation12_spill]] }
 0x2f5   : > { %p13_p11 = scmp.ge.s32.totalorder %s16_s22, 8   ;;  %s2747_s19 = sld [smem:[#allocation13_spill]] }
 0x2f6   : > { %s2748_s20 = sld [smem:[#allocation14_spill]]  ;;  %s2749_s21 = sld [smem:[#allocation15_spill]] }
 0x2f7   : > { %s2750_s15 = smov %s2009_s16  ;;  %s2751_s16 = smov %s2013_s17 }
 0x2f8   : > { %s2752_s17 = smov %s2209_s30  ;;  %15 = sbr.rel (!%p13_p11) target bundleno = 8 (0x8), region = 136 }
 0x2ff   :  { %1445 = vsyncpa [#allocation3], 1 }
 0x300   :  { %1447 = vsyncpa [#allocation3 + $0x1], 1 }
 0x301   :  { %1448 = vsyncpa [#allocation5], 1 }

// kernel: id_loss_forward.3
= control target key start
LH: loop header
LB: loop body
LE: loop exit
PB: predicated region body
PF: predicated region fallthrough
CT: control target
= control target key end

     0   :  { %8 = vsyncpa [#allocation4], 0  ;;  %s2486_s0 = inlined_call_operand.vmem [shape: bf16[4,37632], index: 0, kind: input, shape index: {}]   ;;  %s2487_s1 = inlined_call_operand.hbm [shape: s8[37632,512], index: 1, kind: input, shape index: {}]   ;;  %s2488_s2 = inlined_call_operand.vmem [shape: f32[1,512], index: 2, kind: input, shape index: {}]   ;;  %s2489_s3 = inlined_call_operand.hbm [shape: f32[1,1], index: 3, kind: output, shape index: {}]  }
   0x1   :  { %10 = vsyncpa [#allocation4 + $0x1], 0 }
   0x2   :  { %11 = vsyncpa [#allocation5], 0  ;;  %s2018_s12 = smov 0   ;;  %s2020_s13 = smov 0  }
   0x3   :  { %s2022_s14 = smov 0   ;;  %s2024_s15 = smov 0  }
   0x4 LB: > { %s2037_s16 = sadd.s32 4294967295, %s1986_s15   ;;  %s2040_s17 = sadd.s32 1, %s1986_s15   ;;  %s1986_s15 = sphi %s2024_s15, %s2496_s15   ;;  %s1982_s14 = sphi %s2022_s14, %s2495_s14   ;;  %s1978_s13 = sphi %s2020_s13, %s2494_s13   ;;  %s1974_s12 = sphi %s2018_s12, %s2493_s12  }
   0x5   : > { %s47_s18 = ssub.s32 %s1986_s15, %s2040_s17  ;;  %s50_s19 = sadd.s32 1, %s1982_s14 }
   0x6   : > { %p48_p0 = scmp.eq.s32.totalorder %s47_s18, 0  ;;  %p57_p1 = scmp.ne.s32.totalorder %s1982_s14, %s1978_s13 }
   0x7   : > { %p58_p2 = scmp.eq.s32.totalorder %s1986_s15, 0  ;;  %p63_p3 = scmp.ne.s32.totalorder %s1978_s13, %s1974_s12 }
   0x8   : > { %s2050_s20 = scalar_select %p48_p0, %s1982_s14, %s50_s19  }
   0x9   : > { %p59_p4 = por %p58_p2, %p57_p1  ;;  %p64_p5 = scmp.eq.s32.totalorder %s2037_s16, 0 }
   0xa   : > { %p1835_p6 = scmp.lt.s32.totalorder %s1986_s15, 3  ;;  %s141_s22 = sand.u32 1, %s1982_s14  }
   0xb   : > { %p2054_p7 = por %p64_p5, %p63_p3  ;;  %s1821_s23 = smul.u32 12544, %s141_s22 }
   0xc   : > { %s1772_s24 = smul.u32 200704, %s1986_s15  ;;  %p2060_p8 = pnand %p1835_p6, %p59_p4 }
   0xd   : > { %s145_s29 = scalar_lea.vmem [#allocation3], %s1821_s23  ;;  %s2072_s4 = scalar_lea.sflag [#allocation4], %s141_s22 }
   0xe   : > { %s2067_s28 = scalar_lea.hbm %s2487_s1, %s1772_s24  ;;  %s153_s30 = sshll.u32 %s145_s29, 4  ;;  %s2069_s30 = int_to_ptr.vmem [resolvable:$true] %s153_s30 }
   0xf   : > { %s1888_s5 = scalar_lea.hbm %s2067_s28, 200704  ;;  %p1890_p11 = pneg %p2060_p8 }
  0x10   : > { %p1889_p10 = scmp.ne.s32.totalorder %s2067_s28, %s1888_s5  ;;  %s1893_s8 = scalar_lea.hbm %s2487_s1, 602112 }
  0x11   : > { %p1894_p0 = scmp.lt.u32.totalorder %s2067_s28, %s2487_s1  ;;  %p1895_p1 = scmp.lt.u32.totalorder %s1893_s8, %s1888_s5 }
  0x12   : > { %p1891_p12 = pnand %p1890_p11, %p1889_p10  ;;  %p1897_p3 = scmp.lt.u32.totalorder %s1888_s5, %s2067_s28 }
  0x13   : > { %p1896_p2 = por %p1895_p1, %p1894_p0 }
  0x14   : > { %p1892_p13 = pneg %p1891_p12 }
  0x15   : > { %p1898_p4 = por %p1897_p3, %p1896_p2 }
  0x17   : > { %p1899_p5 = pnand %p1898_p4, %p1892_p13 }
  0x19   : > { %1902 = shalt.err (!%p1899_p5)
}
  0x1a   : > { %s1903_s11 = scalar_lea.vmem %s2069_s30, 200704  ;;  %s1992_s12 = smov [#allocation3]  }
  0x1b   : > { %p1904_p6 = scmp.ne.s32.totalorder %s2069_s30, %s1903_s11  ;;  %s1908_s18 = sshll.u32 %s1992_s12, 4  ;;  %s1909_s18 = int_to_ptr.vmem [resolvable:$false] %s1908_s18 }
  0x1c   : > { %s1910_s19 = scalar_lea.vmem %s1909_s18, 401408  ;;  %p1911_p9 = scmp.lt.s32.totalorder %s2069_s30, %s1909_s18 }
  0x1d   : > { %p1906_p10 = pnand %p1904_p6, %p1890_p11  ;;  %p1912_p0 = scmp.lt.s32.totalorder %s1910_s19, %s1903_s11 }
  0x1f   : > { %p1907_p12 = pneg %p1906_p10  ;;  %p1913_p1 = por %p1912_p0, %p1911_p9 }
  0x21   : > { %p1914_p2 = pnand %p1913_p1, %p1907_p12 }
  0x23   : > { %1917 = shalt.err (!%p1914_p2)
}
  0x24   : > { %s1993_s22 = smov 512   ;;  %s1994_s23 = smov 32  }
  0x25   : > { %1834 = dma.hbm_to_vmem [thread:$0]  (!%p2060_p8), %s2067_s28, 200704, %s2069_s30, %s2072_s4, %s1993_s22, %s1993_s22, %s1994_s23  }
  0x26   : > { %p161_p11 = scmp.lt.s32.totalorder %s1986_s15, 4  ;;  %p2492_p13 = scmp.ge.s32.totalorder %s1986_s15, 1 }
  0x28   : > { %p162_p3 = pnand %p2492_p13, %p161_p11 }
  0x29   : > { %s167_s24 = sand.u32 (!%p162_p3), 1, %s1978_s13  }
  0x2a   : > { %165 = sbr.rel (%p162_p3) target bundleno = 1153 (0x481), region = 32  ;;  %s168_s27 = scalar_lea.sflag (!%p162_p3), [#allocation4], %s167_s24 }
  0x2b   : > { %s2104_s26 = smul.u32 (!%p162_p3), 12544, %s167_s24 }
  0x2d   : > { %s171_s29 = scalar_lea.vmem (!%p162_p3), [#allocation3], %s2104_s26 }
  0x31   : > { %1965 = dma.done.wait (%p2054_p7), %s168_s27, 200704  }
  0x32   : > { %1967 = vsyncadd (%p2054_p7), %s168_s27, 4294766592  ;;  %s194_s25 = smul.u32 98, %s2037_s16  ;;  %p1757_p9 = scmp.ne.s32.totalorder %s2037_s16, 0 }
  0x33   : > { %v1995_v0 = vmov (!%p1757_p9), 0.0  }
  0x34   : > { %p195_p8 = scmp.lt.s32.totalorder %s194_s25, 293  ;;  %204 = sbr.rel (%p1757_p9) target bundleno = 59 (0x3b), region = 40  ;;  %205 = vst [vmem:[#allocation2] sm:$0xff] (!%p1757_p9), %v1995_v0  ;;  %206 = vst [vmem:[#allocation2 + $0x8] sm:$0xff] (!%p1757_p9), %v1995_v0 }
  0x36   : > { %s2498_s25 = smov (!%p195_p8, %s194_s25), 293 }
  0x37   : > { %s1756_s15 = sshll.u32 %s2498_s25, 1 }
  0x38   : > { %s2115_s4 = scalar_lea.vmem %s2486_s0, %s1756_s15 }
  0x3b PF: > { %s2118_s5 = smov 0  }
  0x3c LB: >> { %s213_s21 = smul.u32 1792, %s1990_s5  ;;  %v1996_v19 = vmov 1983009808   ;;  %v909_v21 = vlaneseq  ;;  %s212_s5 = sadd.s32 1, %s1990_s5   ;;  %s1990_s5 = sphi %s2118_s5, %s212_s5  }
  0x3d   : >> { %v907_v20 = vunpack.c.l.s4 %v1996_v19  ;;  %p209_p7 = scmp.ge.s32.totalorder %s212_s5, 7  }
  0x3e   : >> { %s214_s6 = sshra.s32 %s213_s21, 5  ;;  %s891_s9 = sshra.s32 %s213_s21, 7  ;;  %v2136_v27 = vshrl.u32 %v909_v21, 7 }
  0x3f   : >> { %s1771_s7 = sshll.u32 %s214_s6, 5  ;;  %s1760_s10 = sshll.u32 %s891_s9, 1  ;;  %v908_v26 = vunpack.c.0.s8 %v907_v20 }
  0x40   : >> { %s2126_s8 = scalar_lea.vmem %s171_s29, %s1771_s7 [#allocation3]  ;;  %s2141_s11 = scalar_lea.vmem %s2115_s4, %s1760_s10 }
  0x41   : >> { %v220_v1 = vld [vmem:[%s2126_s8 + $0x8] sm:$0xff]  ;;  %v222_v2 = vld [vmem:[%s2126_s8 + $0x18] sm:$0xff]  ;;  %v219_v3 = vld [vmem:[%s2126_s8] sm:$0xff]  ;;  %v2146_v36 = vsub.s32 %v908_v26, %v2136_v27  ;;  %p1762_p4 = scmp.ne.s32.totalorder (%p209_p7), %s2037_s16, 2 }
  0x42   : >> { %v444_v4 = vunpack.c.l.s8.bf16 %v220_v1  ;;  %v448_v5 = vunpack.c.h.s8.bf16 %v220_v1  ;;  %v446_v6 = vunpack.c.l.s8.bf16 %v222_v2  ;;  %v450_v7 = vunpack.c.h.s8.bf16 %v222_v2  ;;  %v221_v8 = vld [vmem:[%s2126_s8 + $0x10] sm:$0xff]  ;;  %v224_v11 = vld [vmem:[%s2126_s8 + $0x28] sm:$0xff]  ;;  %v226_v12 = vld [vmem:[%s2126_s8 + $0x38] sm:$0xff] }
  0x43   : >> { %v443_v9 = vunpack.c.l.s8.bf16 %v219_v3  ;;  %v445_v10 = vunpack.c.l.s8.bf16 %v221_v8  ;;  %v447_v13 = vunpack.c.h.s8.bf16 %v219_v3  ;;  %v449_v14 = vunpack.c.h.s8.bf16 %v221_v8  ;;  %v223_v17 = vld [vmem:[%s2126_s8 + $0x20] sm:$0xff]  ;;  %v225_v18 = vld [vmem:[%s2126_s8 + $0x30] sm:$0xff]  ;;  %v228_v28 = vld [vmem:[%s2126_s8 + $0x48] sm:$0xff] }
  0x44   : >> { %978 = vmatprep.subr.bf16.mxu0 %v444_v4  ;;  %1265 = vmatprep.subr.bf16.mxu1 %v446_v6  ;;  %v452_v15 = vunpack.c.l.s8.bf16 %v224_v11  ;;  %v454_v16 = vunpack.c.l.s8.bf16 %v226_v12  ;;  %v451_v22 = vunpack.c.l.s8.bf16 %v223_v17  ;;  %v453_v23 = vunpack.c.l.s8.bf16 %v225_v18  ;;  %v230_v29 = vld [vmem:[%s2126_s8 + $0x58] sm:$0xff]  ;;  %v227_v34 = vld [vmem:[%s2126_s8 + $0x40] sm:$0xff]  ;;  %v229_v35 = vld [vmem:[%s2126_s8 + $0x50] sm:$0xff] }
  0x45   : >> { %979 = vmatpush1.bf16.msra.mxu0 %v443_v9  ;;  %1266 = vmatpush1.bf16.msra.mxu1 %v445_v10  ;;  %v456_v24 = vunpack.c.h.s8.bf16 %v224_v11  ;;  %v458_v25 = vunpack.c.h.s8.bf16 %v226_v12  ;;  %v455_v30 = vunpack.c.h.s8.bf16 %v223_v17  ;;  %v457_v31 = vunpack.c.h.s8.bf16 %v225_v18  ;;  %v2149_v37 = vld [vmem:[%s2141_s11] sm:$0xff]  ;;  %v232_v43 = vld [vmem:[%s2126_s8 + $0x68] sm:$0xff]  ;;  %v234_v44 = vld [vmem:[%s2126_s8 + $0x78] sm:$0xff] }
  0x46   : >> { %980 = vmatprep.subr.bf16.mxu0 %v448_v5  ;;  %1267 = vmatprep.subr.bf16.mxu1 %v450_v7  ;;  %v460_v32 = vunpack.c.l.s8.bf16 %v228_v28  ;;  %v462_v33 = vunpack.c.l.s8.bf16 %v230_v29  ;;  %v459_v38 = vunpack.c.l.s8.bf16 %v227_v34  ;;  %v461_v39 = vunpack.c.l.s8.bf16 %v229_v35  ;;  %v231_v50 = vld [vmem:[%s2126_s8 + $0x60] sm:$0xff]  ;;  %v233_v51 = vld [vmem:[%s2126_s8 + $0x70] sm:$0xff]  ;;  %v236_v56 = vld [vmem:[%s2126_s8 + $0x88] sm:$0xff] }
  0x47   : >> { %v464_v40 = vunpack.c.h.s8.bf16 %v228_v28  ;;  %v466_v41 = vunpack.c.h.s8.bf16 %v230_v29  ;;  %v2153_v42 = vrot.slane %v2149_v37, %v2146_v36  ;;  %v463_v46 = vunpack.c.h.s8.bf16 %v227_v34  ;;  %v238_v57 = vld [vmem:[%s2126_s8 + $0x98] sm:$0xff]  ;;  %v235_v62 = vld [vmem:[%s2126_s8 + $0x80] sm:$0xff]  ;;  %v237_v63 = vld [vmem:[%s2126_s8 + $0x90] sm:$0xff] }
  0x48   : >> { %v465_v47 = vunpack.c.h.s8.bf16 %v229_v35  ;;  %v468_v48 = vunpack.c.l.s8.bf16 %v232_v43  ;;  %v470_v49 = vunpack.c.l.s8.bf16 %v234_v44  ;;  %v467_v52 = vunpack.c.l.s8.bf16 %v231_v50  ;;  %v240_v4 = vld [vmem:[%s2126_s8 + $0xa8] sm:$0xff]  ;;  %v242_v5 = vld [vmem:[%s2126_s8 + $0xb8] sm:$0xff]  ;;  %v239_v10 = vld [vmem:[%s2126_s8 + $0xa0] sm:$0xff] }
  0x49   : >> { %981 = vmatpush1.bf16.msra.mxu0 %v447_v13  ;;  %1268 = vmatpush1.bf16.msra.mxu1 %v449_v14  ;;  %v920_v45 = vcombine.high %v2153_v42, %v2153_v42  ;;  %v469_v53 = vunpack.c.l.s8.bf16 %v233_v51  ;;  %v472_v54 = vunpack.c.h.s8.bf16 %v232_v43  ;;  %v474_v55 = vunpack.c.h.s8.bf16 %v234_v44  ;;  %v241_v11 = vld [vmem:[%s2126_s8 + $0xb0] sm:$0xff]  ;;  %v246_v17 = vld [vmem:[%s2126_s8 + $0xd8] sm:$0xff]  ;;  %v248_v29 = vld [vmem:[%s2126_s8 + $0xe8] sm:$0xff] }
  0x4a   : >> { %982 = vmatprep.subr.bf16.mxu0 %v452_v15  ;;  %1269 = vmatprep.subr.bf16.mxu1 %v454_v16  ;;  %v471_v58 = vunpack.c.h.s8.bf16 %v231_v50  ;;  %v473_v59 = vunpack.c.h.s8.bf16 %v233_v51  ;;  %v476_v60 = vunpack.c.l.s8.bf16 %v236_v56  ;;  %v478_v61 = vunpack.c.l.s8.bf16 %v238_v57  ;;  %v244_v16 = vld [vmem:[%s2126_s8 + $0xc8] sm:$0xff]  ;;  %v247_v35 = vld [vmem:[%s2126_s8 + $0xe0] sm:$0xff] }
  0x4b   : >> { %1010 = vmatprep.mubr.bf16.mxu0 %v920_v45  ;;  %1297 = vmatprep.mubr.bf16.mxu1 %v920_v45  ;;  %v475_v0 = vunpack.c.l.s8.bf16 %v235_v62  ;;  %v477_v1 = vunpack.c.l.s8.bf16 %v237_v63  ;;  %v480_v2 = vunpack.c.h.s8.bf16 %v236_v56  ;;  %v482_v3 = vunpack.c.h.s8.bf16 %v238_v57  ;;  %v252_v45 = vld [vmem:[%s2126_s8 + $0x108] sm:$0xff]  ;;  %v251_v51 = vld [vmem:[%s2126_s8 + $0x100] sm:$0xff] }
  0x4c   : >> { %v479_v6 = vunpack.c.h.s8.bf16 %v235_v62  ;;  %v481_v7 = vunpack.c.h.s8.bf16 %v237_v63  ;;  %v484_v8 = vunpack.c.l.s8.bf16 %v240_v4  ;;  %v486_v9 = vunpack.c.l.s8.bf16 %v242_v5  ;;  %v256_v57 = vld [vmem:[%s2126_s8 + $0x128] sm:$0xff] }
  0x4d   : >> { %983 = vmatpush1.bf16.msra.mxu0 %v451_v22  ;;  %1270 = vmatpush1.bf16.msra.mxu1 %v453_v23  ;;  %v483_v12 = vunpack.c.l.s8.bf16 %v239_v10  ;;  %v485_v13 = vunpack.c.l.s8.bf16 %v241_v11  ;;  %v488_v14 = vunpack.c.h.s8.bf16 %v240_v4  ;;  %v490_v15 = vunpack.c.h.s8.bf16 %v242_v5  ;;  %v243_v22 = vld [vmem:[%s2126_s8 + $0xc0] sm:$0xff]  ;;  %v245_v23 = vld [vmem:[%s2126_s8 + $0xd0] sm:$0xff]  ;;  %v260_v5 = vld [vmem:[%s2126_s8 + $0x148] sm:$0xff] }
  0x4e   : >> { %984 = vmatprep.subr.bf16.mxu0 %v456_v24  ;;  %1271 = vmatprep.subr.bf16.mxu1 %v458_v25  ;;  %v487_v18 = vunpack.c.h.s8.bf16 %v239_v10  ;;  %v489_v19 = vunpack.c.h.s8.bf16 %v241_v11  ;;  %v492_v20 = vunpack.c.l.s8.bf16 %v244_v16  ;;  %v494_v21 = vunpack.c.l.s8.bf16 %v246_v17  ;;  %v259_v11 = vld [vmem:[%s2126_s8 + $0x140] sm:$0xff] }
  0x4f   : >> { %v491_v24 = vunpack.c.l.s8.bf16 %v243_v22  ;;  %v493_v25 = vunpack.c.l.s8.bf16 %v245_v23  ;;  %v496_v26 = vunpack.c.h.s8.bf16 %v244_v16  ;;  %v498_v28 = vunpack.c.h.s8.bf16 %v246_v17  ;;  %v264_v17 = vld [vmem:[%s2126_s8 + $0x168] sm:$0xff] }
  0x50   : >> { %v905_v44 = vcombine.high %v2149_v37, %v2149_v37  ;;  %v507_v37 = vunpack.c.l.s8.bf16 %v251_v51  ;;  %v516_v62 = vunpack.c.l.s8.bf16 %v256_v57 }
  0x51   : >> { %985 = vmatpush1.bf16.msra.mxu0 %v455_v30  ;;  %1272 = vmatpush1.bf16.msra.mxu1 %v457_v31  ;;  %v250_v30 = vld [vmem:[%s2126_s8 + $0xf8] sm:$0xff]  ;;  %v495_v31 = vunpack.c.h.s8.bf16 %v243_v22 }
  0x52   : >> { %986 = vmatprep.subr.bf16.mxu0 %v460_v32  ;;  %1273 = vmatprep.subr.bf16.mxu1 %v462_v33  ;;  %v497_v32 = vunpack.c.h.s8.bf16 %v245_v23  ;;  %v500_v33 = vunpack.c.l.s8.bf16 %v248_v29  ;;  %v502_v34 = vunpack.c.l.s8.bf16 %v250_v30  ;;  %v506_v43 = vunpack.c.h.s8.bf16 %v250_v30  ;;  %v263_v23 = vld [vmem:[%s2126_s8 + $0x160] sm:$0xff]  ;;  %v268_v30 = vld [vmem:[%s2126_s8 + $0x188] sm:$0xff] }
  0x55   : >> { %987 = vmatpush1.bf16.msra.mxu0 %v459_v38  ;;  %1274 = vmatpush1.bf16.msra.mxu1 %v461_v39  ;;  %v249_v38 = vld [vmem:[%s2126_s8 + $0xf0] sm:$0xff]  ;;  %v499_v39 = vunpack.c.l.s8.bf16 %v247_v35 }
  0x56   : >> { %988 = vmatprep.subr.bf16.mxu0 %v464_v40  ;;  %1275 = vmatprep.subr.bf16.mxu1 %v466_v41  ;;  %v501_v40 = vunpack.c.l.s8.bf16 %v249_v38  ;;  %v504_v41 = vunpack.c.h.s8.bf16 %v248_v29 }
  0x59   : >> { %989 = vmatpush1.bf16.msra.mxu0 %v463_v46  ;;  %1276 = vmatpush1.bf16.msra.mxu1 %v465_v47  ;;  %v254_v46 = vld [vmem:[%s2126_s8 + $0x118] sm:$0xff]  ;;  %v503_v47 = vunpack.c.h.s8.bf16 %v247_v35 }
  0x5a   : >> { %990 = vmatprep.subr.bf16.mxu0 %v468_v48  ;;  %1277 = vmatprep.subr.bf16.mxu1 %v470_v49  ;;  %v505_v48 = vunpack.c.h.s8.bf16 %v249_v38  ;;  %v508_v49 = vunpack.c.l.s8.bf16 %v252_v45  ;;  %v510_v50 = vunpack.c.l.s8.bf16 %v254_v46  ;;  %v514_v56 = vunpack.c.h.s8.bf16 %v254_v46  ;;  %v267_v38 = vld [vmem:[%s2126_s8 + $0x180] sm:$0xff]  ;;  %v274_v46 = vld [vmem:[%s2126_s8 + $0x1b8] sm:$0xff] }
  0x5d   : >> { %991 = vmatpush1.bf16.msra.mxu0 %v467_v52  ;;  %1278 = vmatpush1.bf16.msra.mxu1 %v469_v53  ;;  %v253_v52 = vld [vmem:[%s2126_s8 + $0x110] sm:$0xff]  ;;  %v2184_v53 = vrot.slane %v905_v44, %v2146_v36 }
  0x5e   : >> { %992 = vmatprep.subr.bf16.mxu0 %v472_v54  ;;  %1279 = vmatprep.subr.bf16.mxu1 %v474_v55  ;;  %v509_v54 = vunpack.c.l.s8.bf16 %v253_v52  ;;  %v512_v55 = vunpack.c.h.s8.bf16 %v252_v45  ;;  %v272_v45 = vld [vmem:[%s2126_s8 + $0x1a8] sm:$0xff] }
  0x61   : >> { %993 = vmatpush1.bf16.msra.mxu0 %v471_v58  ;;  %1280 = vmatpush1.bf16.msra.mxu1 %v473_v59  ;;  %v258_v58 = vld [vmem:[%s2126_s8 + $0x138] sm:$0xff]  ;;  %v921_v59 = vcombine.high %v2184_v53, %v2184_v53 }
  0x62   : >> { %994 = vmatprep.subr.bf16.mxu0 %v476_v60  ;;  %1281 = vmatprep.subr.bf16.mxu1 %v478_v61  ;;  %v511_v60 = vunpack.c.h.s8.bf16 %v251_v51  ;;  %v513_v61 = vunpack.c.h.s8.bf16 %v253_v52  ;;  %v518_v63 = vunpack.c.l.s8.bf16 %v258_v58  ;;  %v522_v4 = vunpack.c.h.s8.bf16 %v258_v58  ;;  %v271_v51 = vld [vmem:[%s2126_s8 + $0x1a0] sm:$0xff]  ;;  %v273_v52 = vld [vmem:[%s2126_s8 + $0x1b0] sm:$0xff]  ;;  %v278_v58 = vld [vmem:[%s2126_s8 + $0x1d8] sm:$0xff] }
  0x65   : >> { %995 = vmatpush1.bf16.msra.mxu0 %v475_v0  ;;  %1282 = vmatpush1.bf16.msra.mxu1 %v477_v1  ;;  %v255_v0 = vld [vmem:[%s2126_s8 + $0x120] sm:$0xff]  ;;  %v257_v1 = vld [vmem:[%s2126_s8 + $0x130] sm:$0xff] }
  0x66   : >> { %996 = vmatprep.subr.bf16.mxu0 %v480_v2  ;;  %1283 = vmatprep.subr.bf16.mxu1 %v482_v3  ;;  %v515_v2 = vunpack.c.l.s8.bf16 %v255_v0  ;;  %v517_v3 = vunpack.c.l.s8.bf16 %v257_v1 }
  0x69   : >> { %997 = vmatpush1.bf16.msra.mxu0 %v479_v6  ;;  %1284 = vmatpush1.bf16.msra.mxu1 %v481_v7  ;;  %v262_v6 = vld [vmem:[%s2126_s8 + $0x158] sm:$0xff]  ;;  %v519_v7 = vunpack.c.h.s8.bf16 %v255_v0  ;;  %v277_v0 = vld [vmem:[%s2126_s8 + $0x1d0] sm:$0xff] }
  0x6a   : >> { %998 = vmatprep.subr.bf16.mxu0 %v484_v8  ;;  %1285 = vmatprep.subr.bf16.mxu1 %v486_v9  ;;  %v521_v8 = vunpack.c.h.s8.bf16 %v257_v1  ;;  %v524_v9 = vunpack.c.l.s8.bf16 %v260_v5  ;;  %v526_v10 = vunpack.c.l.s8.bf16 %v262_v6  ;;  %v530_v16 = vunpack.c.h.s8.bf16 %v262_v6 }
  0x6d   : >> { %999 = vmatpush1.bf16.msra.mxu0 %v483_v12  ;;  %1286 = vmatpush1.bf16.msra.mxu1 %v485_v13  ;;  %v261_v12 = vld [vmem:[%s2126_s8 + $0x150] sm:$0xff]  ;;  %v523_v13 = vunpack.c.l.s8.bf16 %v259_v11 }
  0x6e   : >> { %1000 = vmatprep.subr.bf16.mxu0 %v488_v14  ;;  %1287 = vmatprep.subr.bf16.mxu1 %v490_v15  ;;  %v525_v14 = vunpack.c.l.s8.bf16 %v261_v12  ;;  %v528_v15 = vunpack.c.h.s8.bf16 %v260_v5  ;;  %v282_v5 = vld [vmem:[%s2126_s8 + $0x1f8] sm:$0xff] }
  0x71   : >> { %1001 = vmatpush1.bf16.msra.mxu0 %v487_v18  ;;  %1288 = vmatpush1.bf16.msra.mxu1 %v489_v19  ;;  %v266_v18 = vld [vmem:[%s2126_s8 + $0x178] sm:$0xff]  ;;  %v527_v19 = vunpack.c.h.s8.bf16 %v259_v11  ;;  %v281_v11 = vld [vmem:[%s2126_s8 + $0x1f0] sm:$0xff] }
  0x72   : >> { %1002 = vmatprep.subr.bf16.mxu0 %v492_v20  ;;  %1289 = vmatprep.subr.bf16.mxu1 %v494_v21  ;;  %v529_v20 = vunpack.c.h.s8.bf16 %v261_v12  ;;  %v532_v21 = vunpack.c.l.s8.bf16 %v264_v17  ;;  %v534_v22 = vunpack.c.l.s8.bf16 %v266_v18  ;;  %v538_v29 = vunpack.c.h.s8.bf16 %v266_v18  ;;  %v2221_v18 = vld [vmem:[%s2141_s11 + $0x8] sm:$0xff] }
  0x75   : >> { %1003 = vmatpush1.bf16.msra.mxu0 %v491_v24  ;;  %1290 = vmatpush1.bf16.msra.mxu1 %v493_v25  ;;  %v265_v24 = vld [vmem:[%s2126_s8 + $0x170] sm:$0xff]  ;;  %v531_v25 = vunpack.c.l.s8.bf16 %v263_v23 }
  0x76   : >> { %1004 = vmatprep.subr.bf16.mxu0 %v496_v26  ;;  %1291 = vmatprep.subr.bf16.mxu1 %v498_v28  ;;  %v533_v26 = vunpack.c.l.s8.bf16 %v265_v24  ;;  %v536_v28 = vunpack.c.h.s8.bf16 %v264_v17  ;;  %v286_v17 = vld [vmem:[%s2126_s8 + $0x218] sm:$0xff] }
  0x79   : >> { %1005 = vmatpush1.bf16.msra.mxu0 %v495_v31  ;;  %1292 = vmatpush1.bf16.msra.mxu1 %v497_v32  ;;  %v270_v31 = vld [vmem:[%s2126_s8 + $0x198] sm:$0xff]  ;;  %v535_v32 = vunpack.c.h.s8.bf16 %v263_v23  ;;  %v283_v23 = vld [vmem:[%s2126_s8 + $0x200] sm:$0xff] }
  0x7a   : >> { %1006 = vmatprep.subr.bf16.mxu0 %v500_v33  ;;  %1293 = vmatprep.subr.bf16.mxu1 %v502_v34  ;;  %v537_v33 = vunpack.c.h.s8.bf16 %v265_v24  ;;  %v540_v34 = vunpack.c.l.s8.bf16 %v268_v30  ;;  %v542_v35 = vunpack.c.l.s8.bf16 %v270_v31  ;;  %v546_v44 = vunpack.c.h.s8.bf16 %v270_v31  ;;  %v285_v24 = vld [vmem:[%s2126_s8 + $0x210] sm:$0xff]  ;;  %v288_v31 = vld [vmem:[%s2126_s8 + $0x228] sm:$0xff] }
  0x7d   : >> { %1007 = vmatpush1.bf16.msra.mxu0 %v499_v39  ;;  %1294 = vmatpush1.bf16.msra.mxu1 %v501_v40  ;;  %v269_v39 = vld [vmem:[%s2126_s8 + $0x190] sm:$0xff]  ;;  %v539_v40 = vunpack.c.l.s8.bf16 %v267_v38 }
  0x7e   : >> { %1008 = vmatprep.subr.bf16.mxu0 %v504_v41  ;;  %1295 = vmatprep.subr.bf16.mxu1 %v506_v43  ;;  %v541_v41 = vunpack.c.l.s8.bf16 %v269_v39  ;;  %v544_v43 = vunpack.c.h.s8.bf16 %v268_v30  ;;  %v578_v30 = vunpack.c.h.s8.bf16 %v286_v17 }
  0x81   : >> { %1009 = vmatpush1.bf16.msra.mxu0 %v503_v47  ;;  %1296 = vmatpush1.bf16.msra.mxu1 %v505_v48  ;;  %v543_v47 = vunpack.c.h.s8.bf16 %v267_v38  ;;  %v545_v48 = vunpack.c.h.s8.bf16 %v269_v39  ;;  %v580_v38 = vunpack.c.l.s8.bf16 %v288_v31 }
  0x82   : >> { %1019 = vmatprep.subr.bf16.mxu0 %v508_v49  ;;  %1306 = vmatprep.subr.bf16.mxu1 %v510_v50  ;;  %v548_v49 = vunpack.c.l.s8.bf16 %v272_v45  ;;  %v550_v50 = vunpack.c.l.s8.bf16 %v274_v46 }
  0x84   : >> { %1011 = vmatmul.mubr.bf16.vlgmr.msra.gmra.mrb[0].mxu0 %v2153_v42  ;;  %1298 = vmatmul.mubr.bf16.vlgmr.msra.gmra.mrb[0].mxu1 %v2153_v42  ;;  %v520_v42 = vunpack.c.h.s8.bf16 %v256_v57  ;;  %v276_v57 = vld [vmem:[%s2126_s8 + $0x1c8] sm:$0xff] }
  0x85   : >> { %1020 = vmatpush1.bf16.msra.mxu0 %v507_v37  ;;  %1307 = vmatpush1.bf16.msra.mxu1 %v509_v54  ;;  %v547_v37 = vunpack.c.l.s8.bf16 %v271_v51  ;;  %v549_v54 = vunpack.c.l.s8.bf16 %v273_v52 }
  0x86   : >> { %1021 = vmatprep.subr.bf16.mxu0 %v512_v55  ;;  %1308 = vmatprep.subr.bf16.mxu1 %v514_v56  ;;  %v552_v55 = vunpack.c.h.s8.bf16 %v272_v45  ;;  %v554_v56 = vunpack.c.h.s8.bf16 %v274_v46  ;;  %v292_v46 = vld [vmem:[%s2126_s8 + $0x248] sm:$0xff] }
  0x87   : >> { %1051 = vmatprep.mubr.bf16.mxu0 %v921_v59  ;;  %1338 = vmatprep.mubr.bf16.mxu1 %v921_v59  ;;  %v551_v59 = vunpack.c.h.s8.bf16 %v271_v51 }
  0x89   : >> { %1022 = vmatpush1.bf16.msra.mxu0 %v511_v60  ;;  %1309 = vmatpush1.bf16.msra.mxu1 %v513_v61  ;;  %v553_v60 = vunpack.c.h.s8.bf16 %v273_v52  ;;  %v556_v61 = vunpack.c.l.s8.bf16 %v276_v57  ;;  %v291_v52 = vld [vmem:[%s2126_s8 + $0x240] sm:$0xff] }
  0x8a   : >> { %1023 = vmatprep.subr.bf16.mxu0 %v516_v62  ;;  %1310 = vmatprep.subr.bf16.mxu1 %v518_v63  ;;  %v558_v62 = vunpack.c.l.s8.bf16 %v278_v58  ;;  %v275_v63 = vld [vmem:[%s2126_s8 + $0x1c0] sm:$0xff] }
  0x8b   : >> { %v555_v1 = vunpack.c.l.s8.bf16 %v275_v63  ;;  %v559_v6 = vunpack.c.h.s8.bf16 %v275_v63 }
  0x8d   : >> { %1024 = vmatpush1.bf16.msra.mxu0 %v515_v2  ;;  %1311 = vmatpush1.bf16.msra.mxu1 %v517_v3  ;;  %v557_v2 = vunpack.c.l.s8.bf16 %v277_v0  ;;  %v560_v3 = vunpack.c.h.s8.bf16 %v276_v57 }
  0x8e   : >> { %1025 = vmatprep.subr.bf16.mxu0 %v520_v42  ;;  %1312 = vmatprep.subr.bf16.mxu1 %v522_v4  ;;  %v562_v42 = vunpack.c.h.s8.bf16 %v278_v58  ;;  %v280_v4 = vld [vmem:[%s2126_s8 + $0x1e8] sm:$0xff] }
  0x8f   : >> { %v296_v58 = vld [vmem:[%s2126_s8 + $0x268] sm:$0xff] }
  0x91   : >> { %1026 = vmatpush1.bf16.msra.mxu0 %v519_v7  ;;  %1313 = vmatpush1.bf16.msra.mxu1 %v521_v8  ;;  %v561_v7 = vunpack.c.h.s8.bf16 %v277_v0  ;;  %v564_v8 = vunpack.c.l.s8.bf16 %v280_v4  ;;  %v295_v0 = vld [vmem:[%s2126_s8 + $0x260] sm:$0xff] }
  0x92   : >> { %1027 = vmatprep.subr.bf16.mxu0 %v524_v9  ;;  %1314 = vmatprep.subr.bf16.mxu1 %v526_v10  ;;  %v566_v9 = vunpack.c.l.s8.bf16 %v282_v5  ;;  %v279_v10 = vld [vmem:[%s2126_s8 + $0x1e0] sm:$0xff] }
  0x93   : >> { %v563_v12 = vunpack.c.l.s8.bf16 %v279_v10 }
  0x95   : >> { %1028 = vmatpush1.bf16.msra.mxu0 %v523_v13  ;;  %1315 = vmatpush1.bf16.msra.mxu1 %v525_v14  ;;  %v565_v13 = vunpack.c.l.s8.bf16 %v281_v11  ;;  %v568_v14 = vunpack.c.h.s8.bf16 %v280_v4 }
  0x96   : >> { %1029 = vmatprep.subr.bf16.mxu0 %v528_v15  ;;  %1316 = vmatprep.subr.bf16.mxu1 %v530_v16  ;;  %v570_v15 = vunpack.c.h.s8.bf16 %v282_v5  ;;  %v284_v16 = vld [vmem:[%s2126_s8 + $0x208] sm:$0xff] }
  0x97   : >> { %v300_v5 = vld [vmem:[%s2126_s8 + $0x288] sm:$0xff] }
  0x99   : >> { %1030 = vmatpush1.bf16.msra.mxu0 %v527_v19  ;;  %1317 = vmatpush1.bf16.msra.mxu1 %v529_v20  ;;  %v567_v19 = vunpack.c.h.s8.bf16 %v279_v10  ;;  %v569_v20 = vunpack.c.h.s8.bf16 %v281_v11  ;;  %v299_v11 = vld [vmem:[%s2126_s8 + $0x280] sm:$0xff] }
  0x9a   : >> { %1031 = vmatprep.subr.bf16.mxu0 %v532_v21  ;;  %1318 = vmatprep.subr.bf16.mxu1 %v534_v22  ;;  %v572_v21 = vunpack.c.l.s8.bf16 %v284_v16  ;;  %v574_v22 = vunpack.c.l.s8.bf16 %v286_v17  ;;  %v304_v17 = vld [vmem:[%s2126_s8 + $0x2a8] sm:$0xff] }
  0x9d   : >> { %1032 = vmatpush1.bf16.msra.mxu0 %v531_v25  ;;  %1319 = vmatpush1.bf16.msra.mxu1 %v533_v26  ;;  %v2227_v25 = vrot.slane %v2221_v18, %v2146_v36  ;;  %v571_v26 = vunpack.c.l.s8.bf16 %v283_v23 }
  0x9e   : >> { %1033 = vmatprep.subr.bf16.mxu0 %v536_v28  ;;  %1320 = vmatprep.subr.bf16.mxu1 %v538_v29  ;;  %v573_v28 = vunpack.c.l.s8.bf16 %v285_v24  ;;  %v576_v29 = vunpack.c.h.s8.bf16 %v284_v16 }
  0xa1   : >> { %1034 = vmatpush1.bf16.msra.mxu0 %v535_v32  ;;  %1321 = vmatpush1.bf16.msra.mxu1 %v537_v33  ;;  %v290_v32 = vld [vmem:[%s2126_s8 + $0x238] sm:$0xff]  ;;  %v937_v33 = vcombine.high %v2227_v25, %v2227_v25 }
  0xa2   : >> { %1035 = vmatprep.subr.bf16.mxu0 %v540_v34  ;;  %1322 = vmatprep.subr.bf16.mxu1 %v542_v35  ;;  %v575_v34 = vunpack.c.h.s8.bf16 %v283_v23  ;;  %v577_v35 = vunpack.c.h.s8.bf16 %v285_v24  ;;  %v582_v39 = vunpack.c.l.s8.bf16 %v290_v32  ;;  %v586_v45 = vunpack.c.h.s8.bf16 %v290_v32  ;;  %v303_v24 = vld [vmem:[%s2126_s8 + $0x2a0] sm:$0xff]  ;;  %v308_v32 = vld [vmem:[%s2126_s8 + $0x2c8] sm:$0xff] }
  0xa5   : >> { %1036 = vmatpush1.bf16.msra.mxu0 %v539_v40  ;;  %1323 = vmatpush1.bf16.msra.mxu1 %v541_v41  ;;  %v287_v40 = vld [vmem:[%s2126_s8 + $0x220] sm:$0xff]  ;;  %v289_v41 = vld [vmem:[%s2126_s8 + $0x230] sm:$0xff] }
  0xa6   : >> { %1037 = vmatprep.subr.bf16.mxu0 %v544_v43  ;;  %1324 = vmatprep.subr.bf16.mxu1 %v546_v44  ;;  %v579_v43 = vunpack.c.l.s8.bf16 %v287_v40  ;;  %v581_v44 = vunpack.c.l.s8.bf16 %v289_v41 }
  0xa9   : >> { %1038 = vmatpush1.bf16.msra.mxu0 %v543_v47  ;;  %1325 = vmatpush1.bf16.msra.mxu1 %v545_v48  ;;  %v294_v47 = vld [vmem:[%s2126_s8 + $0x258] sm:$0xff]  ;;  %v583_v48 = vunpack.c.h.s8.bf16 %v287_v40  ;;  %v307_v40 = vld [vmem:[%s2126_s8 + $0x2c0] sm:$0xff] }
  0xaa   : >> { %1039 = vmatprep.subr.bf16.mxu0 %v548_v49  ;;  %1326 = vmatprep.subr.bf16.mxu1 %v550_v50  ;;  %v585_v49 = vunpack.c.h.s8.bf16 %v289_v41  ;;  %v588_v50 = vunpack.c.l.s8.bf16 %v292_v46  ;;  %v590_v51 = vunpack.c.l.s8.bf16 %v294_v47  ;;  %v594_v57 = vunpack.c.h.s8.bf16 %v294_v47  ;;  %v309_v41 = vld [vmem:[%s2126_s8 + $0x2d0] sm:$0xff]  ;;  %v314_v47 = vld [vmem:[%s2126_s8 + $0x2f8] sm:$0xff] }
  0xad   : >> { %1040 = vmatpush1.bf16.msra.mxu0 %v547_v37  ;;  %1327 = vmatpush1.bf16.msra.mxu1 %v549_v54  ;;  %v293_v37 = vld [vmem:[%s2126_s8 + $0x250] sm:$0xff]  ;;  %v587_v54 = vunpack.c.l.s8.bf16 %v291_v52 }
  0xae   : >> { %1041 = vmatprep.subr.bf16.mxu0 %v552_v55  ;;  %1328 = vmatprep.subr.bf16.mxu1 %v554_v56  ;;  %v589_v55 = vunpack.c.l.s8.bf16 %v293_v37  ;;  %v592_v56 = vunpack.c.h.s8.bf16 %v292_v46  ;;  %v312_v46 = vld [vmem:[%s2126_s8 + $0x2e8] sm:$0xff] }
  0xb1   : >> { %1042 = vmatpush1.bf16.msra.mxu0 %v551_v59  ;;  %1329 = vmatpush1.bf16.msra.mxu1 %v553_v60  ;;  %v298_v59 = vld [vmem:[%s2126_s8 + $0x278] sm:$0xff]  ;;  %v591_v60 = vunpack.c.h.s8.bf16 %v291_v52  ;;  %v311_v52 = vld [vmem:[%s2126_s8 + $0x2e0] sm:$0xff] }
  0xb2   : >> { %1043 = vmatprep.subr.bf16.mxu0 %v556_v61  ;;  %1330 = vmatprep.subr.bf16.mxu1 %v558_v62  ;;  %v593_v61 = vunpack.c.h.s8.bf16 %v293_v37  ;;  %v596_v62 = vunpack.c.l.s8.bf16 %v296_v58  ;;  %v598_v63 = vunpack.c.l.s8.bf16 %v298_v59  ;;  %v602_v4 = vunpack.c.h.s8.bf16 %v298_v59  ;;  %v313_v37 = vld [vmem:[%s2126_s8 + $0x2f0] sm:$0xff]  ;;  %v318_v59 = vld [vmem:[%s2126_s8 + $0x318] sm:$0xff] }
  0xb5   : >> { %1044 = vmatpush1.bf16.msra.mxu0 %v555_v1  ;;  %1331 = vmatpush1.bf16.msra.mxu1 %v557_v2  ;;  %v297_v1 = vld [vmem:[%s2126_s8 + $0x270] sm:$0xff]  ;;  %v595_v2 = vunpack.c.l.s8.bf16 %v295_v0 }
  0xb6   : >> { %1045 = vmatprep.subr.bf16.mxu0 %v560_v3  ;;  %1332 = vmatprep.subr.bf16.mxu1 %v562_v42  ;;  %v597_v3 = vunpack.c.l.s8.bf16 %v297_v1  ;;  %v600_v42 = vunpack.c.h.s8.bf16 %v296_v58  ;;  %v316_v58 = vld [vmem:[%s2126_s8 + $0x308] sm:$0xff] }
  0xb9   : >> { %1046 = vmatpush1.bf16.msra.mxu0 %v559_v6  ;;  %1333 = vmatpush1.bf16.msra.mxu1 %v561_v7  ;;  %v302_v6 = vld [vmem:[%s2126_s8 + $0x298] sm:$0xff]  ;;  %v599_v7 = vunpack.c.h.s8.bf16 %v295_v0  ;;  %v638_v0 = vunpack.c.l.s8.bf16 %v318_v59 }
  0xba   : >> { %1047 = vmatprep.subr.bf16.mxu0 %v564_v8  ;;  %1334 = vmatprep.subr.bf16.mxu1 %v566_v9  ;;  %v601_v8 = vunpack.c.h.s8.bf16 %v297_v1  ;;  %v604_v9 = vunpack.c.l.s8.bf16 %v300_v5  ;;  %v606_v10 = vunpack.c.l.s8.bf16 %v302_v6  ;;  %v610_v16 = vunpack.c.h.s8.bf16 %v302_v6  ;;  %v315_v1 = vld [vmem:[%s2126_s8 + $0x300] sm:$0xff]  ;;  %v320_v6 = vld [vmem:[%s2126_s8 + $0x328] sm:$0xff] }
  0xbd   : >> { %1048 = vmatpush1.bf16.msra.mxu0 %v563_v12  ;;  %1335 = vmatpush1.bf16.msra.mxu1 %v565_v13  ;;  %v301_v12 = vld [vmem:[%s2126_s8 + $0x290] sm:$0xff]  ;;  %v603_v13 = vunpack.c.l.s8.bf16 %v299_v11 }
  0xbe   : >> { %1049 = vmatprep.subr.bf16.mxu0 %v568_v14  ;;  %1336 = vmatprep.subr.bf16.mxu1 %v570_v15  ;;  %v605_v14 = vunpack.c.l.s8.bf16 %v301_v12  ;;  %v608_v15 = vunpack.c.h.s8.bf16 %v300_v5  ;;  %v642_v5 = vunpack.c.h.s8.bf16 %v318_v59  ;;  %v336_v59 = vld [vmem:[%s2126_s8 + $0x3a8] sm:$0xff] }
  0xc1   : >> { %1050 = vmatpush1.bf16.msra.mxu0 %v567_v19  ;;  %1337 = vmatpush1.bf16.msra.mxu1 %v569_v20  ;;  %v306_v19 = vld [vmem:[%s2126_s8 + $0x2b8] sm:$0xff]  ;;  %v607_v20 = vunpack.c.h.s8.bf16 %v299_v11  ;;  %v644_v11 = vunpack.c.l.s8.bf16 %v320_v6 }
  0xc2   : >> { %1060 = vmatprep.subr.bf16.mxu0 %v572_v21  ;;  %1347 = vmatprep.subr.bf16.mxu1 %v574_v22  ;;  %v609_v21 = vunpack.c.h.s8.bf16 %v301_v12  ;;  %v612_v22 = vunpack.c.l.s8.bf16 %v304_v17  ;;  %v614_v23 = vunpack.c.l.s8.bf16 %v306_v19 }
  0xc4   : >> { %1052 = vmatmul.mubr.bf16.vlgmr.msra.gmra.mrb[0].mxu0 %v2184_v53  ;;  %1339 = vmatmul.mubr.bf16.vlgmr.msra.gmra.mrb[0].mxu1 %v2184_v53  ;;  %v584_v53 = vunpack.c.h.s8.bf16 %v288_v31  ;;  %v618_v31 = vunpack.c.h.s8.bf16 %v306_v19  ;;  %v324_v19 = vld [vmem:[%s2126_s8 + $0x348] sm:$0xff] }
  0xc5   : >> { %1061 = vmatpush1.bf16.msra.mxu0 %v571_v26  ;;  %1348 = vmatpush1.bf16.msra.mxu1 %v573_v28  ;;  %v305_v26 = vld [vmem:[%s2126_s8 + $0x2b0] sm:$0xff]  ;;  %v611_v28 = vunpack.c.l.s8.bf16 %v303_v24 }
  0xc6   : >> { %1062 = vmatprep.subr.bf16.mxu0 %v576_v29  ;;  %1349 = vmatprep.subr.bf16.mxu1 %v578_v30  ;;  %v613_v29 = vunpack.c.l.s8.bf16 %v305_v26  ;;  %v616_v30 = vunpack.c.h.s8.bf16 %v304_v17 }
  0xc7   : >> { %1092 = vmatprep.mubr.bf16.mxu0 %v937_v33  ;;  %1379 = vmatprep.mubr.bf16.mxu1 %v937_v33  ;;  %v310_v33 = vld [vmem:[%s2126_s8 + $0x2d8] sm:$0xff] }
  0xc9   : >> { %1063 = vmatpush1.bf16.msra.mxu0 %v575_v34  ;;  %1350 = vmatpush1.bf16.msra.mxu1 %v577_v35  ;;  %v615_v34 = vunpack.c.h.s8.bf16 %v303_v24  ;;  %v617_v35 = vunpack.c.h.s8.bf16 %v305_v26  ;;  %v323_v26 = vld [vmem:[%s2126_s8 + $0x340] sm:$0xff] }
  0xca   : >> { %1064 = vmatprep.subr.bf16.mxu0 %v580_v38  ;;  %1351 = vmatprep.subr.bf16.mxu1 %v582_v39  ;;  %v620_v38 = vunpack.c.l.s8.bf16 %v308_v32  ;;  %v622_v39 = vunpack.c.l.s8.bf16 %v310_v33 }
  0xcd   : >> { %1065 = vmatpush1.bf16.msra.mxu0 %v579_v43  ;;  %1352 = vmatpush1.bf16.msra.mxu1 %v581_v44  ;;  %v619_v43 = vunpack.c.l.s8.bf16 %v307_v40  ;;  %v621_v44 = vunpack.c.l.s8.bf16 %v309_v41 }
  0xce   : >> { %1066 = vmatprep.subr.bf16.mxu0 %v584_v53  ;;  %1353 = vmatprep.subr.bf16.mxu1 %v586_v45  ;;  %v624_v53 = vunpack.c.h.s8.bf16 %v308_v32  ;;  %v626_v45 = vunpack.c.h.s8.bf16 %v310_v33  ;;  %v328_v33 = vld [vmem:[%s2126_s8 + $0x368] sm:$0xff] }
  0xd1   : >> { %1067 = vmatpush1.bf16.msra.mxu0 %v583_v48  ;;  %1354 = vmatpush1.bf16.msra.mxu1 %v585_v49  ;;  %v623_v48 = vunpack.c.h.s8.bf16 %v307_v40  ;;  %v625_v49 = vunpack.c.h.s8.bf16 %v309_v41  ;;  %v327_v41 = vld [vmem:[%s2126_s8 + $0x360] sm:$0xff] }
  0xd2   : >> { %1068 = vmatprep.subr.bf16.mxu0 %v588_v50  ;;  %1355 = vmatprep.subr.bf16.mxu1 %v590_v51  ;;  %v628_v50 = vunpack.c.l.s8.bf16 %v312_v46  ;;  %v630_v51 = vunpack.c.l.s8.bf16 %v314_v47 }
  0xd5   : >> { %1069 = vmatpush1.bf16.msra.mxu0 %v587_v54  ;;  %1356 = vmatpush1.bf16.msra.mxu1 %v589_v55  ;;  %v627_v54 = vunpack.c.l.s8.bf16 %v311_v52  ;;  %v629_v55 = vunpack.c.l.s8.bf16 %v313_v37 }
  0xd6   : >> { %1070 = vmatprep.subr.bf16.mxu0 %v592_v56  ;;  %1357 = vmatprep.subr.bf16.mxu1 %v594_v57  ;;  %v632_v56 = vunpack.c.h.s8.bf16 %v312_v46  ;;  %v634_v57 = vunpack.c.h.s8.bf16 %v314_v47  ;;  %v332_v47 = vld [vmem:[%s2126_s8 + $0x388] sm:$0xff] }
  0xd9   : >> { %1071 = vmatpush1.bf16.msra.mxu0 %v591_v60  ;;  %1358 = vmatpush1.bf16.msra.mxu1 %v593_v61  ;;  %v922_v60 = vcombine.high %v2221_v18, %v2221_v18  ;;  %v631_v61 = vunpack.c.h.s8.bf16 %v311_v52  ;;  %v640_v18 = vunpack.c.h.s8.bf16 %v316_v58 }
  0xda   : >> { %1072 = vmatprep.subr.bf16.mxu0 %v596_v62  ;;  %1359 = vmatprep.subr.bf16.mxu1 %v598_v63  ;;  %v633_v62 = vunpack.c.h.s8.bf16 %v313_v37  ;;  %v636_v63 = vunpack.c.l.s8.bf16 %v316_v58  ;;  %v331_v37 = vld [vmem:[%s2126_s8 + $0x380] sm:$0xff] }
  0xdd   : >> { %1073 = vmatpush1.bf16.msra.mxu0 %v595_v2  ;;  %1360 = vmatpush1.bf16.msra.mxu1 %v597_v3  ;;  %v317_v2 = vld [vmem:[%s2126_s8 + $0x310] sm:$0xff]  ;;  %v2268_v3 = vrot.slane %v922_v60, %v2146_v36  ;;  %v338_v60 = vld [vmem:[%s2126_s8 + $0x3b8] sm:$0xff] }
  0xde   : >> { %1074 = vmatprep.subr.bf16.mxu0 %v600_v42  ;;  %1361 = vmatprep.subr.bf16.mxu1 %v602_v4  ;;  %v635_v42 = vunpack.c.l.s8.bf16 %v315_v1  ;;  %v637_v4 = vunpack.c.l.s8.bf16 %v317_v2 }
  0xe1   : >> { %1075 = vmatpush1.bf16.msra.mxu0 %v599_v7  ;;  %1362 = vmatpush1.bf16.msra.mxu1 %v601_v8  ;;  %v322_v7 = vld [vmem:[%s2126_s8 + $0x338] sm:$0xff]  ;;  %v938_v8 = vcombine.high %v2268_v3, %v2268_v3 }
  0xe2   : >> { %1076 = vmatprep.subr.bf16.mxu0 %v604_v9  ;;  %1363 = vmatprep.subr.bf16.mxu1 %v606_v10  ;;  %v639_v9 = vunpack.c.h.s8.bf16 %v315_v1  ;;  %v641_v10 = vunpack.c.h.s8.bf16 %v317_v2  ;;  %v646_v12 = vunpack.c.l.s8.bf16 %v322_v7  ;;  %v650_v17 = vunpack.c.h.s8.bf16 %v322_v7  ;;  %v335_v1 = vld [vmem:[%s2126_s8 + $0x3a0] sm:$0xff]  ;;  %v337_v2 = vld [vmem:[%s2126_s8 + $0x3b0] sm:$0xff]  ;;  %v342_v7 = vld [vmem:[%s2126_s8 + $0x3d8] sm:$0xff] }
  0xe5   : >> { %1077 = vmatpush1.bf16.msra.mxu0 %v603_v13  ;;  %1364 = vmatpush1.bf16.msra.mxu1 %v605_v14  ;;  %v319_v13 = vld [vmem:[%s2126_s8 + $0x320] sm:$0xff]  ;;  %v321_v14 = vld [vmem:[%s2126_s8 + $0x330] sm:$0xff] }
  0xe6   : >> { %1078 = vmatprep.subr.bf16.mxu0 %v608_v15  ;;  %1365 = vmatprep.subr.bf16.mxu1 %v610_v16  ;;  %v643_v15 = vunpack.c.l.s8.bf16 %v319_v13  ;;  %v645_v16 = vunpack.c.l.s8.bf16 %v321_v14 }
  0xe9   : >> { %1079 = vmatpush1.bf16.msra.mxu0 %v607_v20  ;;  %1366 = vmatpush1.bf16.msra.mxu1 %v609_v21  ;;  %v326_v20 = vld [vmem:[%s2126_s8 + $0x358] sm:$0xff]  ;;  %v647_v21 = vunpack.c.h.s8.bf16 %v319_v13  ;;  %v341_v13 = vld [vmem:[%s2126_s8 + $0x3d0] sm:$0xff] }
  0xea   : >> { %1080 = vmatprep.subr.bf16.mxu0 %v612_v22  ;;  %1367 = vmatprep.subr.bf16.mxu1 %v614_v23  ;;  %v649_v22 = vunpack.c.h.s8.bf16 %v321_v14  ;;  %v652_v23 = vunpack.c.l.s8.bf16 %v324_v19  ;;  %v654_v24 = vunpack.c.l.s8.bf16 %v326_v20  ;;  %v658_v32 = vunpack.c.h.s8.bf16 %v326_v20 }
  0xed   : >> { %1081 = vmatpush1.bf16.msra.mxu0 %v611_v28  ;;  %1368 = vmatpush1.bf16.msra.mxu1 %v613_v29  ;;  %v325_v28 = vld [vmem:[%s2126_s8 + $0x350] sm:$0xff]  ;;  %v651_v29 = vunpack.c.l.s8.bf16 %v323_v26 }
  0xee   : >> { %1082 = vmatprep.subr.bf16.mxu0 %v616_v30  ;;  %1369 = vmatprep.subr.bf16.mxu1 %v618_v31  ;;  %v653_v30 = vunpack.c.l.s8.bf16 %v325_v28  ;;  %v656_v31 = vunpack.c.h.s8.bf16 %v324_v19  ;;  %v346_v19 = vld [vmem:[%s2126_s8 + $0x3f8] sm:$0xff] }
  0xf1   : >> { %1083 = vmatpush1.bf16.msra.mxu0 %v615_v34  ;;  %1370 = vmatpush1.bf16.msra.mxu1 %v617_v35  ;;  %v330_v34 = vld [vmem:[%s2126_s8 + $0x378] sm:$0xff]  ;;  %v655_v35 = vunpack.c.h.s8.bf16 %v323_v26  ;;  %v345_v26 = vld [vmem:[%s2126_s8 + $0x3f0] sm:$0xff] }
  0xf2   : >> { %1084 = vmatprep.subr.bf16.mxu0 %v620_v38  ;;  %1371 = vmatprep.subr.bf16.mxu1 %v622_v39  ;;  %v657_v38 = vunpack.c.h.s8.bf16 %v325_v28  ;;  %v660_v39 = vunpack.c.l.s8.bf16 %v328_v33  ;;  %v662_v40 = vunpack.c.l.s8.bf16 %v330_v34  ;;  %v666_v46 = vunpack.c.h.s8.bf16 %v330_v34  ;;  %v2305_v34 = vld [vmem:[%s2141_s11 + $0x10] sm:$0xff] }
  0xf5   : >> { %1085 = vmatpush1.bf16.msra.mxu0 %v619_v43  ;;  %1372 = vmatpush1.bf16.msra.mxu1 %v621_v44  ;;  %v329_v43 = vld [vmem:[%s2126_s8 + $0x370] sm:$0xff]  ;;  %v659_v44 = vunpack.c.l.s8.bf16 %v327_v41 }
  0xf6   : >> { %1086 = vmatprep.subr.bf16.mxu0 %v624_v53  ;;  %1373 = vmatprep.subr.bf16.mxu1 %v626_v45  ;;  %v661_v53 = vunpack.c.l.s8.bf16 %v329_v43  ;;  %v664_v45 = vunpack.c.h.s8.bf16 %v328_v33  ;;  %v350_v33 = vld [vmem:[%s2126_s8 + $0x418] sm:$0xff] }
  0xf9   : >> { %1087 = vmatpush1.bf16.msra.mxu0 %v623_v48  ;;  %1374 = vmatpush1.bf16.msra.mxu1 %v625_v49  ;;  %v334_v48 = vld [vmem:[%s2126_s8 + $0x398] sm:$0xff]  ;;  %v663_v49 = vunpack.c.h.s8.bf16 %v327_v41  ;;  %v347_v41 = vld [vmem:[%s2126_s8 + $0x400] sm:$0xff] }
  0xfa   : >> { %1088 = vmatprep.subr.bf16.mxu0 %v628_v50  ;;  %1375 = vmatprep.subr.bf16.mxu1 %v630_v51  ;;  %v665_v50 = vunpack.c.h.s8.bf16 %v329_v43  ;;  %v668_v51 = vunpack.c.l.s8.bf16 %v332_v47  ;;  %v670_v52 = vunpack.c.l.s8.bf16 %v334_v48  ;;  %v674_v58 = vunpack.c.h.s8.bf16 %v334_v48  ;;  %v349_v43 = vld [vmem:[%s2126_s8 + $0x410] sm:$0xff]  ;;  %v352_v48 = vld [vmem:[%s2126_s8 + $0x428] sm:$0xff] }
  0xfd   : >> { %1089 = vmatpush1.bf16.msra.mxu0 %v627_v54  ;;  %1376 = vmatpush1.bf16.msra.mxu1 %v629_v55  ;;  %v333_v54 = vld [vmem:[%s2126_s8 + $0x390] sm:$0xff]  ;;  %v667_v55 = vunpack.c.l.s8.bf16 %v331_v37 }
  0xfe   : >> { %1090 = vmatprep.subr.bf16.mxu0 %v632_v56  ;;  %1377 = vmatprep.subr.bf16.mxu1 %v634_v57  ;;  %v669_v56 = vunpack.c.l.s8.bf16 %v333_v54  ;;  %v672_v57 = vunpack.c.h.s8.bf16 %v332_v47  ;;  %v706_v47 = vunpack.c.h.s8.bf16 %v350_v33 }
 0x101   : >> { %1091 = vmatpush1.bf16.msra.mxu0 %v631_v61  ;;  %1378 = vmatpush1.bf16.msra.mxu1 %v633_v62  ;;  %v671_v61 = vunpack.c.h.s8.bf16 %v331_v37  ;;  %v673_v62 = vunpack.c.h.s8.bf16 %v333_v54  ;;  %v708_v37 = vunpack.c.l.s8.bf16 %v352_v48 }
 0x102   : >> { %1101 = vmatprep.subr.bf16.mxu0 %v636_v63  ;;  %1388 = vmatprep.subr.bf16.mxu1 %v638_v0  ;;  %v676_v63 = vunpack.c.l.s8.bf16 %v336_v59  ;;  %v678_v0 = vunpack.c.l.s8.bf16 %v338_v60 }
 0x104   : >> { %1093 = vmatmul.mubr.bf16.vlgmr.msra.gmra.mrb[0].mxu0 %v2227_v25  ;;  %1380 = vmatmul.mubr.bf16.vlgmr.msra.gmra.mrb[0].mxu1 %v2227_v25  ;;  %v648_v25 = vunpack.c.h.s8.bf16 %v320_v6  ;;  %v340_v6 = vld [vmem:[%s2126_s8 + $0x3c8] sm:$0xff] }
 0x105   : >> { %1102 = vmatpush1.bf16.msra.mxu0 %v635_v42  ;;  %1389 = vmatpush1.bf16.msra.mxu1 %v637_v4  ;;  %v675_v42 = vunpack.c.l.s8.bf16 %v335_v1  ;;  %v677_v4 = vunpack.c.l.s8.bf16 %v337_v2 }
 0x106   : >> { %1103 = vmatprep.subr.bf16.mxu0 %v640_v18  ;;  %1390 = vmatprep.subr.bf16.mxu1 %v642_v5  ;;  %v680_v18 = vunpack.c.h.s8.bf16 %v336_v59  ;;  %v682_v5 = vunpack.c.h.s8.bf16 %v338_v60  ;;  %v356_v60 = vld [vmem:[%s2126_s8 + $0x448] sm:$0xff] }
 0x107   : >> { %1133 = vmatprep.mubr.bf16.mxu0 %v938_v8  ;;  %1420 = vmatprep.mubr.bf16.mxu1 %v938_v8  ;;  %v679_v8 = vunpack.c.h.s8.bf16 %v335_v1 }
 0x109   : >> { %1104 = vmatpush1.bf16.msra.mxu0 %v639_v9  ;;  %1391 = vmatpush1.bf16.msra.mxu1 %v641_v10  ;;  %v681_v9 = vunpack.c.h.s8.bf16 %v337_v2  ;;  %v684_v10 = vunpack.c.l.s8.bf16 %v340_v6  ;;  %v355_v2 = vld [vmem:[%s2126_s8 + $0x440] sm:$0xff] }
 0x10a   : >> { %1105 = vmatprep.subr.bf16.mxu0 %v644_v11  ;;  %1392 = vmatprep.subr.bf16.mxu1 %v646_v12  ;;  %v686_v11 = vunpack.c.l.s8.bf16 %v342_v7  ;;  %v339_v12 = vld [vmem:[%s2126_s8 + $0x3c0] sm:$0xff] }
 0x10b   : >> { %v683_v14 = vunpack.c.l.s8.bf16 %v339_v12  ;;  %v687_v20 = vunpack.c.h.s8.bf16 %v339_v12 }
 0x10d   : >> { %1106 = vmatpush1.bf16.msra.mxu0 %v643_v15  ;;  %1393 = vmatpush1.bf16.msra.mxu1 %v645_v16  ;;  %v685_v15 = vunpack.c.l.s8.bf16 %v341_v13  ;;  %v688_v16 = vunpack.c.h.s8.bf16 %v340_v6 }
 0x10e   : >> { %1107 = vmatprep.subr.bf16.mxu0 %v648_v25  ;;  %1394 = vmatprep.subr.bf16.mxu1 %v650_v17  ;;  %v690_v25 = vunpack.c.h.s8.bf16 %v342_v7  ;;  %v344_v17 = vld [vmem:[%s2126_s8 + $0x3e8] sm:$0xff] }
 0x10f   : >> { %v360_v7 = vld [vmem:[%s2126_s8 + $0x468] sm:$0xff] }
 0x111   : >> { %1108 = vmatpush1.bf16.msra.mxu0 %v647_v21  ;;  %1395 = vmatpush1.bf16.msra.mxu1 %v649_v22  ;;  %v689_v21 = vunpack.c.h.s8.bf16 %v341_v13  ;;  %v692_v22 = vunpack.c.l.s8.bf16 %v344_v17  ;;  %v359_v13 = vld [vmem:[%s2126_s8 + $0x460] sm:$0xff] }
 0x112   : >> { %1109 = vmatprep.subr.bf16.mxu0 %v652_v23  ;;  %1396 = vmatprep.subr.bf16.mxu1 %v654_v24  ;;  %v694_v23 = vunpack.c.l.s8.bf16 %v346_v19  ;;  %v343_v24 = vld [vmem:[%s2126_s8 + $0x3e0] sm:$0xff] }
 0x113   : >> { %v691_v28 = vunpack.c.l.s8.bf16 %v343_v24 }
 0x115   : >> { %1110 = vmatpush1.bf16.msra.mxu0 %v651_v29  ;;  %1397 = vmatpush1.bf16.msra.mxu1 %v653_v30  ;;  %v693_v29 = vunpack.c.l.s8.bf16 %v345_v26  ;;  %v696_v30 = vunpack.c.h.s8.bf16 %v344_v17 }
 0x116   : >> { %1111 = vmatprep.subr.bf16.mxu0 %v656_v31  ;;  %1398 = vmatprep.subr.bf16.mxu1 %v658_v32  ;;  %v698_v31 = vunpack.c.h.s8.bf16 %v346_v19  ;;  %v348_v32 = vld [vmem:[%s2126_s8 + $0x408] sm:$0xff] }
 0x117   : >> { %v364_v19 = vld [vmem:[%s2126_s8 + $0x488] sm:$0xff] }
 0x119   : >> { %1112 = vmatpush1.bf16.msra.mxu0 %v655_v35  ;;  %1399 = vmatpush1.bf16.msra.mxu1 %v657_v38  ;;  %v695_v35 = vunpack.c.h.s8.bf16 %v343_v24  ;;  %v697_v38 = vunpack.c.h.s8.bf16 %v345_v26  ;;  %v363_v26 = vld [vmem:[%s2126_s8 + $0x480] sm:$0xff] }
 0x11a   : >> { %1113 = vmatprep.subr.bf16.mxu0 %v660_v39  ;;  %1400 = vmatprep.subr.bf16.mxu1 %v662_v40  ;;  %v700_v39 = vunpack.c.l.s8.bf16 %v348_v32  ;;  %v702_v40 = vunpack.c.l.s8.bf16 %v350_v33  ;;  %v368_v33 = vld [vmem:[%s2126_s8 + $0x4a8] sm:$0xff] }
 0x11d   : >> { %1114 = vmatpush1.bf16.msra.mxu0 %v659_v44  ;;  %1401 = vmatpush1.bf16.msra.mxu1 %v661_v53  ;;  %v2311_v44 = vrot.slane %v2305_v34, %v2146_v36  ;;  %v699_v53 = vunpack.c.l.s8.bf16 %v347_v41 }
 0x11e   : >> { %1115 = vmatprep.subr.bf16.mxu0 %v664_v45  ;;  %1402 = vmatprep.subr.bf16.mxu1 %v666_v46  ;;  %v701_v45 = vunpack.c.l.s8.bf16 %v349_v43  ;;  %v704_v46 = vunpack.c.h.s8.bf16 %v348_v32 }
 0x121   : >> { %1116 = vmatpush1.bf16.msra.mxu0 %v663_v49  ;;  %1403 = vmatpush1.bf16.msra.mxu1 %v665_v50  ;;  %v354_v49 = vld [vmem:[%s2126_s8 + $0x438] sm:$0xff]  ;;  %v954_v50 = vcombine.high %v2311_v44, %v2311_v44 }
 0x122   : >> { %1117 = vmatprep.subr.bf16.mxu0 %v668_v51  ;;  %1404 = vmatprep.subr.bf16.mxu1 %v670_v52  ;;  %v703_v51 = vunpack.c.h.s8.bf16 %v347_v41  ;;  %v705_v52 = vunpack.c.h.s8.bf16 %v349_v43  ;;  %v710_v54 = vunpack.c.l.s8.bf16 %v354_v49  ;;  %v714_v59 = vunpack.c.h.s8.bf16 %v354_v49  ;;  %v367_v43 = vld [vmem:[%s2126_s8 + $0x4a0] sm:$0xff]  ;;  %v372_v49 = vld [vmem:[%s2126_s8 + $0x4c8] sm:$0xff] }
 0x125   : >> { %1118 = vmatpush1.bf16.msra.mxu0 %v667_v55  ;;  %1405 = vmatpush1.bf16.msra.mxu1 %v669_v56  ;;  %v351_v55 = vld [vmem:[%s2126_s8 + $0x420] sm:$0xff]  ;;  %v353_v56 = vld [vmem:[%s2126_s8 + $0x430] sm:$0xff] }
 0x126   : >> { %1119 = vmatprep.subr.bf16.mxu0 %v672_v57  ;;  %1406 = vmatprep.subr.bf16.mxu1 %v674_v58  ;;  %v707_v57 = vunpack.c.l.s8.bf16 %v351_v55  ;;  %v709_v58 = vunpack.c.l.s8.bf16 %v353_v56 }
 0x129   : >> { %1120 = vmatpush1.bf16.msra.mxu0 %v671_v61  ;;  %1407 = vmatpush1.bf16.msra.mxu1 %v673_v62  ;;  %v358_v61 = vld [vmem:[%s2126_s8 + $0x458] sm:$0xff]  ;;  %v711_v62 = vunpack.c.h.s8.bf16 %v351_v55  ;;  %v371_v55 = vld [vmem:[%s2126_s8 + $0x4c0] sm:$0xff] }
 0x12a   : >> { %1121 = vmatprep.subr.bf16.mxu0 %v676_v63  ;;  %1408 = vmatprep.subr.bf16.mxu1 %v678_v0  ;;  %v713_v63 = vunpack.c.h.s8.bf16 %v353_v56  ;;  %v716_v0 = vunpack.c.l.s8.bf16 %v356_v60  ;;  %v718_v1 = vunpack.c.l.s8.bf16 %v358_v61  ;;  %v722_v6 = vunpack.c.h.s8.bf16 %v358_v61  ;;  %v373_v56 = vld [vmem:[%s2126_s8 + $0x4d0] sm:$0xff]  ;;  %v378_v61 = vld [vmem:[%s2126_s8 + $0x4f8] sm:$0xff] }
 0x12d   : >> { %1122 = vmatpush1.bf16.msra.mxu0 %v675_v42  ;;  %1409 = vmatpush1.bf16.msra.mxu1 %v677_v4  ;;  %v357_v42 = vld [vmem:[%s2126_s8 + $0x450] sm:$0xff]  ;;  %v715_v4 = vunpack.c.l.s8.bf16 %v355_v2 }
 0x12e   : >> { %1123 = vmatprep.subr.bf16.mxu0 %v680_v18  ;;  %1410 = vmatprep.subr.bf16.mxu1 %v682_v5  ;;  %v717_v18 = vunpack.c.l.s8.bf16 %v357_v42  ;;  %v720_v5 = vunpack.c.h.s8.bf16 %v356_v60  ;;  %v376_v60 = vld [vmem:[%s2126_s8 + $0x4e8] sm:$0xff] }
 0x131   : >> { %1124 = vmatpush1.bf16.msra.mxu0 %v679_v8  ;;  %1411 = vmatpush1.bf16.msra.mxu1 %v681_v9  ;;  %v362_v8 = vld [vmem:[%s2126_s8 + $0x478] sm:$0xff]  ;;  %v719_v9 = vunpack.c.h.s8.bf16 %v355_v2  ;;  %v375_v2 = vld [vmem:[%s2126_s8 + $0x4e0] sm:$0xff] }
 0x132   : >> { %1125 = vmatprep.subr.bf16.mxu0 %v684_v10  ;;  %1412 = vmatprep.subr.bf16.mxu1 %v686_v11  ;;  %v721_v10 = vunpack.c.h.s8.bf16 %v357_v42  ;;  %v724_v11 = vunpack.c.l.s8.bf16 %v360_v7  ;;  %v726_v12 = vunpack.c.l.s8.bf16 %v362_v8  ;;  %v730_v17 = vunpack.c.h.s8.bf16 %v362_v8  ;;  %v377_v42 = vld [vmem:[%s2126_s8 + $0x4f0] sm:$0xff]  ;;  %v382_v8 = vld [vmem:[%s2126_s8 + $0x518] sm:$0xff] }
 0x135   : >> { %1126 = vmatpush1.bf16.msra.mxu0 %v683_v14  ;;  %1413 = vmatpush1.bf16.msra.mxu1 %v685_v15  ;;  %v361_v14 = vld [vmem:[%s2126_s8 + $0x470] sm:$0xff]  ;;  %v723_v15 = vunpack.c.l.s8.bf16 %v359_v13 }
 0x136   : >> { %1127 = vmatprep.subr.bf16.mxu0 %v688_v16  ;;  %1414 = vmatprep.subr.bf16.mxu1 %v690_v25  ;;  %v725_v16 = vunpack.c.l.s8.bf16 %v361_v14  ;;  %v728_v25 = vunpack.c.h.s8.bf16 %v360_v7  ;;  %v380_v7 = vld [vmem:[%s2126_s8 + $0x508] sm:$0xff] }
 0x139   : >> { %1128 = vmatpush1.bf16.msra.mxu0 %v687_v20  ;;  %1415 = vmatpush1.bf16.msra.mxu1 %v689_v21  ;;  %v366_v20 = vld [vmem:[%s2126_s8 + $0x498] sm:$0xff]  ;;  %v727_v21 = vunpack.c.h.s8.bf16 %v359_v13  ;;  %v766_v13 = vunpack.c.l.s8.bf16 %v382_v8 }
 0x13a   : >> { %1129 = vmatprep.subr.bf16.mxu0 %v692_v22  ;;  %1416 = vmatprep.subr.bf16.mxu1 %v694_v23  ;;  %v729_v22 = vunpack.c.h.s8.bf16 %v361_v14  ;;  %v732_v23 = vunpack.c.l.s8.bf16 %v364_v19  ;;  %v734_v24 = vunpack.c.l.s8.bf16 %v366_v20  ;;  %v738_v32 = vunpack.c.h.s8.bf16 %v366_v20  ;;  %v379_v14 = vld [vmem:[%s2126_s8 + $0x500] sm:$0xff]  ;;  %v384_v20 = vld [vmem:[%s2126_s8 + $0x528] sm:$0xff] }
 0x13d   : >> { %1130 = vmatpush1.bf16.msra.mxu0 %v691_v28  ;;  %1417 = vmatpush1.bf16.msra.mxu1 %v693_v29  ;;  %v365_v28 = vld [vmem:[%s2126_s8 + $0x490] sm:$0xff]  ;;  %v731_v29 = vunpack.c.l.s8.bf16 %v363_v26 }
 0x13e   : >> { %1131 = vmatprep.subr.bf16.mxu0 %v696_v30  ;;  %1418 = vmatprep.subr.bf16.mxu1 %v698_v31  ;;  %v733_v30 = vunpack.c.l.s8.bf16 %v365_v28  ;;  %v736_v31 = vunpack.c.h.s8.bf16 %v364_v19  ;;  %v770_v19 = vunpack.c.h.s8.bf16 %v382_v8  ;;  %v402_v8 = vld [vmem:[%s2126_s8 + $0x5b8] sm:$0xff] }
 0x141   : >> { %1132 = vmatpush1.bf16.msra.mxu0 %v695_v35  ;;  %1419 = vmatpush1.bf16.msra.mxu1 %v697_v38  ;;  %v370_v35 = vld [vmem:[%s2126_s8 + $0x4b8] sm:$0xff]  ;;  %v735_v38 = vunpack.c.h.s8.bf16 %v363_v26 }
 0x142   : >> { %1142 = vmatprep.subr.bf16.mxu0 %v700_v39  ;;  %1429 = vmatprep.subr.bf16.mxu1 %v702_v40  ;;  %v737_v39 = vunpack.c.h.s8.bf16 %v365_v28  ;;  %v740_v40 = vunpack.c.l.s8.bf16 %v368_v33  ;;  %v742_v41 = vunpack.c.l.s8.bf16 %v370_v35  ;;  %v383_v28 = vld [vmem:[%s2126_s8 + $0x520] sm:$0xff] }
 0x144   : >> { %1134 = vmatmul.mubr.bf16.vlgmr.msra.gmra.mrb[0].mxu0 %v2268_v3  ;;  %1421 = vmatmul.mubr.bf16.vlgmr.msra.gmra.mrb[0].mxu1 %v2268_v3  ;;  %v712_v3 = vunpack.c.h.s8.bf16 %v352_v48  ;;  %v746_v48 = vunpack.c.h.s8.bf16 %v370_v35  ;;  %v390_v35 = vld [vmem:[%s2126_s8 + $0x558] sm:$0xff] }
 0x145   : >> { %1143 = vmatpush1.bf16.msra.mxu0 %v699_v53  ;;  %1430 = vmatpush1.bf16.msra.mxu1 %v701_v45  ;;  %v369_v53 = vld [vmem:[%s2126_s8 + $0x4b0] sm:$0xff]  ;;  %v739_v45 = vunpack.c.l.s8.bf16 %v367_v43 }
 0x146   : >> { %1144 = vmatprep.subr.bf16.mxu0 %v704_v46  ;;  %1431 = vmatprep.subr.bf16.mxu1 %v706_v47  ;;  %v741_v46 = vunpack.c.l.s8.bf16 %v369_v53  ;;  %v744_v47 = vunpack.c.h.s8.bf16 %v368_v33  ;;  %v388_v33 = vld [vmem:[%s2126_s8 + $0x548] sm:$0xff] }
 0x147   : >> { %1174 = vmatprep.mubr.bf16.mxu0 %v954_v50  ;;  %1461 = vmatprep.mubr.bf16.mxu1 %v954_v50  ;;  %v374_v50 = vld [vmem:[%s2126_s8 + $0x4d8] sm:$0xff] }
 0x149   : >> { %1145 = vmatpush1.bf16.msra.mxu0 %v703_v51  ;;  %1432 = vmatpush1.bf16.msra.mxu1 %v705_v52  ;;  %v743_v51 = vunpack.c.h.s8.bf16 %v367_v43  ;;  %v745_v52 = vunpack.c.h.s8.bf16 %v369_v53  ;;  %v387_v43 = vld [vmem:[%s2126_s8 + $0x540] sm:$0xff]  ;;  %v389_v53 = vld [vmem:[%s2126_s8 + $0x550] sm:$0xff] }
 0x14a   : >> { %1146 = vmatprep.subr.bf16.mxu0 %v708_v37  ;;  %1433 = vmatprep.subr.bf16.mxu1 %v710_v54  ;;  %v748_v37 = vunpack.c.l.s8.bf16 %v372_v49  ;;  %v750_v54 = vunpack.c.l.s8.bf16 %v374_v50 }
 0x14d   : >> { %1147 = vmatpush1.bf16.msra.mxu0 %v707_v57  ;;  %1434 = vmatpush1.bf16.msra.mxu1 %v709_v58  ;;  %v747_v57 = vunpack.c.l.s8.bf16 %v371_v55  ;;  %v749_v58 = vunpack.c.l.s8.bf16 %v373_v56 }
 0x14e   : >> { %1148 = vmatprep.subr.bf16.mxu0 %v712_v3  ;;  %1435 = vmatprep.subr.bf16.mxu1 %v714_v59  ;;  %v752_v3 = vunpack.c.h.s8.bf16 %v372_v49  ;;  %v754_v59 = vunpack.c.h.s8.bf16 %v374_v50  ;;  %v392_v49 = vld [vmem:[%s2126_s8 + $0x568] sm:$0xff]  ;;  %v394_v50 = vld [vmem:[%s2126_s8 + $0x578] sm:$0xff] }
 0x151   : >> { %1149 = vmatpush1.bf16.msra.mxu0 %v711_v62  ;;  %1436 = vmatpush1.bf16.msra.mxu1 %v713_v63  ;;  %v751_v62 = vunpack.c.h.s8.bf16 %v371_v55  ;;  %v753_v63 = vunpack.c.h.s8.bf16 %v373_v56  ;;  %v391_v55 = vld [vmem:[%s2126_s8 + $0x560] sm:$0xff]  ;;  %v393_v56 = vld [vmem:[%s2126_s8 + $0x570] sm:$0xff] }
 0x152   : >> { %1150 = vmatprep.subr.bf16.mxu0 %v716_v0  ;;  %1437 = vmatprep.subr.bf16.mxu1 %v718_v1  ;;  %v756_v0 = vunpack.c.l.s8.bf16 %v376_v60  ;;  %v758_v1 = vunpack.c.l.s8.bf16 %v378_v61 }
 0x155   : >> { %1151 = vmatpush1.bf16.msra.mxu0 %v715_v4  ;;  %1438 = vmatpush1.bf16.msra.mxu1 %v717_v18  ;;  %v755_v4 = vunpack.c.l.s8.bf16 %v375_v2  ;;  %v757_v18 = vunpack.c.l.s8.bf16 %v377_v42 }
 0x156   : >> { %1152 = vmatprep.subr.bf16.mxu0 %v720_v5  ;;  %1439 = vmatprep.subr.bf16.mxu1 %v722_v6  ;;  %v760_v5 = vunpack.c.h.s8.bf16 %v376_v60  ;;  %v762_v6 = vunpack.c.h.s8.bf16 %v378_v61  ;;  %v396_v60 = vld [vmem:[%s2126_s8 + $0x588] sm:$0xff]  ;;  %v398_v61 = vld [vmem:[%s2126_s8 + $0x598] sm:$0xff] }
 0x159   : >> { %1153 = vmatpush1.bf16.msra.mxu0 %v719_v9  ;;  %1440 = vmatpush1.bf16.msra.mxu1 %v721_v10  ;;  %v939_v9 = vcombine.high %v2305_v34, %v2305_v34  ;;  %v759_v10 = vunpack.c.h.s8.bf16 %v375_v2  ;;  %v768_v34 = vunpack.c.h.s8.bf16 %v380_v7  ;;  %v395_v2 = vld [vmem:[%s2126_s8 + $0x580] sm:$0xff] }
 0x15a   : >> { %1154 = vmatprep.subr.bf16.mxu0 %v724_v11  ;;  %1441 = vmatprep.subr.bf16.mxu1 %v726_v12  ;;  %v761_v11 = vunpack.c.h.s8.bf16 %v377_v42  ;;  %v764_v12 = vunpack.c.l.s8.bf16 %v380_v7  ;;  %v397_v42 = vld [vmem:[%s2126_s8 + $0x590] sm:$0xff]  ;;  %v400_v7 = vld [vmem:[%s2126_s8 + $0x5a8] sm:$0xff] }
 0x15d   : >> { %1155 = vmatpush1.bf16.msra.mxu0 %v723_v15  ;;  %1442 = vmatpush1.bf16.msra.mxu1 %v725_v16  ;;  %v381_v15 = vld [vmem:[%s2126_s8 + $0x510] sm:$0xff]  ;;  %v2352_v16 = vrot.slane %v939_v9, %v2146_v36  ;;  %v767_v36 = vunpack.c.h.s8.bf16 %v379_v14  ;;  %v799_v9 = vunpack.c.h.s8.bf16 %v395_v2 }
 0x15e   : >> { %1156 = vmatprep.subr.bf16.mxu0 %v728_v25  ;;  %1443 = vmatprep.subr.bf16.mxu1 %v730_v17  ;;  %v763_v25 = vunpack.c.l.s8.bf16 %v379_v14  ;;  %v765_v17 = vunpack.c.l.s8.bf16 %v381_v15  ;;  %v401_v14 = vld [vmem:[%s2126_s8 + $0x5b0] sm:$0xff] }
 0x161   : >> { %1157 = vmatpush1.bf16.msra.mxu0 %v727_v21  ;;  %1444 = vmatpush1.bf16.msra.mxu1 %v729_v22  ;;  %v386_v21 = vld [vmem:[%s2126_s8 + $0x538] sm:$0xff]  ;;  %v955_v22 = vcombine.high %v2352_v16, %v2352_v16 }
 0x162   : >> { %1158 = vmatprep.subr.bf16.mxu0 %v732_v23  ;;  %1445 = vmatprep.subr.bf16.mxu1 %v734_v24  ;;  %v769_v23 = vunpack.c.h.s8.bf16 %v381_v15  ;;  %v772_v24 = vunpack.c.l.s8.bf16 %v384_v20  ;;  %v774_v26 = vunpack.c.l.s8.bf16 %v386_v21 }
 0x165   : >> { %1159 = vmatpush1.bf16.msra.mxu0 %v731_v29  ;;  %1446 = vmatpush1.bf16.msra.mxu1 %v733_v30  ;;  %v385_v29 = vld [vmem:[%s2126_s8 + $0x530] sm:$0xff]  ;;  %v771_v30 = vunpack.c.l.s8.bf16 %v383_v28 }
 0x166   : >> { %1160 = vmatprep.subr.bf16.mxu0 %v736_v31  ;;  %1447 = vmatprep.subr.bf16.mxu1 %v738_v32  ;;  %v773_v31 = vunpack.c.l.s8.bf16 %v385_v29  ;;  %v778_v32 = vunpack.c.h.s8.bf16 %v386_v21 }
 0x169   : >> { %1161 = vmatpush1.bf16.msra.mxu0 %v735_v38  ;;  %1448 = vmatpush1.bf16.msra.mxu1 %v737_v39  ;;  %v775_v38 = vunpack.c.h.s8.bf16 %v383_v28  ;;  %v777_v39 = vunpack.c.h.s8.bf16 %v385_v29 }
 0x16a   : >> { %1162 = vmatprep.subr.bf16.mxu0 %v740_v40  ;;  %1449 = vmatprep.subr.bf16.mxu1 %v742_v41  ;;  %v780_v40 = vunpack.c.l.s8.bf16 %v388_v33  ;;  %v782_v41 = vunpack.c.l.s8.bf16 %v390_v35 }
 0x16d   : >> { %1163 = vmatpush1.bf16.msra.mxu0 %v739_v45  ;;  %1450 = vmatpush1.bf16.msra.mxu1 %v741_v46  ;;  %v779_v45 = vunpack.c.l.s8.bf16 %v387_v43  ;;  %v781_v46 = vunpack.c.l.s8.bf16 %v389_v53 }
 0x16e   : >> { %1164 = vmatprep.subr.bf16.mxu0 %v744_v47  ;;  %1451 = vmatprep.subr.bf16.mxu1 %v746_v48  ;;  %v784_v47 = vunpack.c.h.s8.bf16 %v388_v33  ;;  %v786_v48 = vunpack.c.h.s8.bf16 %v390_v35 }
 0x171   : >> { %1165 = vmatpush1.bf16.msra.mxu0 %v743_v51  ;;  %1452 = vmatpush1.bf16.msra.mxu1 %v745_v52  ;;  %v783_v51 = vunpack.c.h.s8.bf16 %v387_v43  ;;  %v785_v52 = vunpack.c.h.s8.bf16 %v389_v53 }
 0x172   : >> { %1166 = vmatprep.subr.bf16.mxu0 %v748_v37  ;;  %1453 = vmatprep.subr.bf16.mxu1 %v750_v54  ;;  %v788_v37 = vunpack.c.l.s8.bf16 %v392_v49  ;;  %v790_v54 = vunpack.c.l.s8.bf16 %v394_v50 }
 0x175   : >> { %1167 = vmatpush1.bf16.msra.mxu0 %v747_v57  ;;  %1454 = vmatpush1.bf16.msra.mxu1 %v749_v58  ;;  %v787_v57 = vunpack.c.l.s8.bf16 %v391_v55  ;;  %v789_v58 = vunpack.c.l.s8.bf16 %v393_v56 }
 0x176   : >> { %1168 = vmatprep.subr.bf16.mxu0 %v752_v3  ;;  %1455 = vmatprep.subr.bf16.mxu1 %v754_v59  ;;  %v792_v3 = vunpack.c.h.s8.bf16 %v392_v49  ;;  %v794_v59 = vunpack.c.h.s8.bf16 %v394_v50 }
 0x179   : >> { %1169 = vmatpush1.bf16.msra.mxu0 %v751_v62  ;;  %1456 = vmatpush1.bf16.msra.mxu1 %v753_v63  ;;  %v791_v62 = vunpack.c.h.s8.bf16 %v391_v55  ;;  %v793_v63 = vunpack.c.h.s8.bf16 %v393_v56  ;;  %v2391_v55 = vld.sshfl [vmem:[%s2141_s11 + $0x18] sm:$0x33 pattern:$0x76325410] }
 0x17a   : >> { %1170 = vmatprep.subr.bf16.mxu0 %v756_v0  ;;  %1457 = vmatprep.subr.bf16.mxu1 %v758_v1  ;;  %v796_v0 = vunpack.c.l.s8.bf16 %v396_v60  ;;  %v798_v1 = vunpack.c.l.s8.bf16 %v398_v61 }
 0x17d   : >> { %1171 = vmatpush1.bf16.msra.mxu0 %v755_v4  ;;  %1458 = vmatpush1.bf16.msra.mxu1 %v757_v18  ;;  %v795_v4 = vunpack.c.l.s8.bf16 %v395_v2  ;;  %v797_v18 = vunpack.c.l.s8.bf16 %v397_v42  ;;  %v415_v2 = vld [vmem:[%s2126_s8 + $0x620] sm:$0xff] }
 0x17e   : >> { %1172 = vmatprep.subr.bf16.mxu0 %v760_v5  ;;  %1459 = vmatprep.subr.bf16.mxu1 %v762_v6  ;;  %v800_v5 = vunpack.c.h.s8.bf16 %v396_v60  ;;  %v802_v6 = vunpack.c.h.s8.bf16 %v398_v61  ;;  %v418_v60 = vld [vmem:[%s2126_s8 + $0x638] sm:$0xff]  ;;  %v963_v61 = vcombine.high %v2391_v55, %v2391_v55 }
 0x181   : >> { %1173 = vmatpush1.bf16.msra.mxu0 %v759_v10  ;;  %1460 = vmatpush1.bf16.msra.mxu1 %v761_v11  ;;  %v801_v10 = vunpack.c.h.s8.bf16 %v397_v42  ;;  %v804_v11 = vunpack.c.l.s8.bf16 %v400_v7  ;;  %v417_v42 = vld [vmem:[%s2126_s8 + $0x630] sm:$0xff] }
 0x182   : >> { %1183 = vmatprep.subr.bf16.mxu0 %v764_v12  ;;  %1470 = vmatprep.subr.bf16.mxu1 %v766_v13  ;;  %v806_v12 = vunpack.c.l.s8.bf16 %v402_v8  ;;  %v399_v13 = vld [vmem:[%s2126_s8 + $0x5a0] sm:$0xff] }
 0x183   : >> { %v803_v15 = vunpack.c.l.s8.bf16 %v399_v13  ;;  %v807_v21 = vunpack.c.h.s8.bf16 %v399_v13  ;;  %v421_v13 = vld [vmem:[%s2126_s8 + $0x650] sm:$0xff] }
 0x184   : >> { %1175 = vmatmul.mubr.bf16.vlgmr.msra.gmra.mrb[0].mxu0 %v2311_v44  ;;  %1462 = vmatmul.mubr.bf16.vlgmr.msra.gmra.mrb[0].mxu1 %v2311_v44  ;;  %v776_v44 = vunpack.c.h.s8.bf16 %v384_v20  ;;  %v406_v20 = vld [vmem:[%s2126_s8 + $0x5d8] sm:$0xff] }
 0x185   : >> { %1184 = vmatpush1.bf16.msra.mxu0 %v763_v25  ;;  %1471 = vmatpush1.bf16.msra.mxu1 %v765_v17  ;;  %v805_v25 = vunpack.c.l.s8.bf16 %v401_v14  ;;  %v808_v17 = vunpack.c.h.s8.bf16 %v400_v7  ;;  %v422_v7 = vld [vmem:[%s2126_s8 + $0x658] sm:$0xff] }
 0x186   : >> { %1185 = vmatprep.subr.bf16.mxu0 %v768_v34  ;;  %1472 = vmatprep.subr.bf16.mxu1 %v770_v19  ;;  %v810_v34 = vunpack.c.h.s8.bf16 %v402_v8  ;;  %v404_v19 = vld [vmem:[%s2126_s8 + $0x5c8] sm:$0xff]  ;;  %v839_v8 = vunpack.c.h.s8.bf16 %v415_v2 }
 0x187   : >> { %1215 = vmatprep.mubr.bf16.mxu0 %v955_v22  ;;  %1502 = vmatprep.mubr.bf16.mxu1 %v955_v22  ;;  %v809_v22 = vunpack.c.h.s8.bf16 %v401_v14 }
 0x189   : >> { %1186 = vmatpush1.bf16.msra.mxu0 %v767_v36  ;;  %1473 = vmatpush1.bf16.msra.mxu1 %v769_v23  ;;  %v812_v36 = vunpack.c.l.s8.bf16 %v404_v19  ;;  %v814_v23 = vunpack.c.l.s8.bf16 %v406_v20 }
 0x18a   : >> { %1187 = vmatprep.subr.bf16.mxu0 %v772_v24  ;;  %1474 = vmatprep.subr.bf16.mxu1 %v774_v26  ;;  %v403_v24 = vld [vmem:[%s2126_s8 + $0x5c0] sm:$0xff]  ;;  %v405_v26 = vld [vmem:[%s2126_s8 + $0x5d0] sm:$0xff] }
 0x18b   : >> { %v811_v28 = vunpack.c.l.s8.bf16 %v403_v24  ;;  %v813_v29 = vunpack.c.l.s8.bf16 %v405_v26  ;;  %v815_v33 = vunpack.c.h.s8.bf16 %v403_v24  ;;  %v817_v35 = vunpack.c.h.s8.bf16 %v405_v26  ;;  %v425_v24 = vld [vmem:[%s2126_s8 + $0x670] sm:$0xff] }
 0x18d   : >> { %1188 = vmatpush1.bf16.msra.mxu0 %v771_v30  ;;  %1475 = vmatpush1.bf16.msra.mxu1 %v773_v31  ;;  %v816_v30 = vunpack.c.h.s8.bf16 %v404_v19  ;;  %v818_v31 = vunpack.c.h.s8.bf16 %v406_v20  ;;  %v426_v19 = vld [vmem:[%s2126_s8 + $0x678] sm:$0xff] }
 0x18e   : >> { %1189 = vmatprep.subr.bf16.mxu0 %v776_v44  ;;  %1476 = vmatprep.subr.bf16.mxu1 %v778_v32  ;;  %v408_v44 = vld [vmem:[%s2126_s8 + $0x5e8] sm:$0xff]  ;;  %v410_v32 = vld [vmem:[%s2126_s8 + $0x5f8] sm:$0xff] }
 0x191   : >> { %1190 = vmatpush1.bf16.msra.mxu0 %v775_v38  ;;  %1477 = vmatpush1.bf16.msra.mxu1 %v777_v39  ;;  %v820_v38 = vunpack.c.l.s8.bf16 %v408_v44  ;;  %v822_v39 = vunpack.c.l.s8.bf16 %v410_v32 }
 0x192   : >> { %1191 = vmatprep.subr.bf16.mxu0 %v780_v40  ;;  %1478 = vmatprep.subr.bf16.mxu1 %v782_v41  ;;  %v407_v40 = vld [vmem:[%s2126_s8 + $0x5e0] sm:$0xff]  ;;  %v409_v41 = vld [vmem:[%s2126_s8 + $0x5f0] sm:$0xff] }
 0x193   : >> { %v819_v43 = vunpack.c.l.s8.bf16 %v407_v40  ;;  %v821_v53 = vunpack.c.l.s8.bf16 %v409_v41  ;;  %v823_v49 = vunpack.c.h.s8.bf16 %v407_v40  ;;  %v825_v50 = vunpack.c.h.s8.bf16 %v409_v41  ;;  %v429_v40 = vld [vmem:[%s2126_s8 + $0x690] sm:$0xff] }
 0x195   : >> { %1192 = vmatpush1.bf16.msra.mxu0 %v779_v45  ;;  %1479 = vmatpush1.bf16.msra.mxu1 %v781_v46  ;;  %v824_v45 = vunpack.c.h.s8.bf16 %v408_v44  ;;  %v826_v46 = vunpack.c.h.s8.bf16 %v410_v32  ;;  %v430_v44 = vld [vmem:[%s2126_s8 + $0x698] sm:$0xff] }
 0x196   : >> { %1193 = vmatprep.subr.bf16.mxu0 %v784_v47  ;;  %1480 = vmatprep.subr.bf16.mxu1 %v786_v48  ;;  %v412_v47 = vld [vmem:[%s2126_s8 + $0x608] sm:$0xff]  ;;  %v414_v48 = vld [vmem:[%s2126_s8 + $0x618] sm:$0xff] }
 0x199   : >> { %1194 = vmatpush1.bf16.msra.mxu0 %v783_v51  ;;  %1481 = vmatpush1.bf16.msra.mxu1 %v785_v52  ;;  %v828_v51 = vunpack.c.l.s8.bf16 %v412_v47  ;;  %v830_v52 = vunpack.c.l.s8.bf16 %v414_v48 }
 0x19a   : >> { %1195 = vmatprep.subr.bf16.mxu0 %v788_v37  ;;  %1482 = vmatprep.subr.bf16.mxu1 %v790_v54  ;;  %v411_v37 = vld [vmem:[%s2126_s8 + $0x600] sm:$0xff]  ;;  %v413_v54 = vld [vmem:[%s2126_s8 + $0x610] sm:$0xff] }
 0x19b   : >> { %v827_v56 = vunpack.c.l.s8.bf16 %v411_v37 }
 0x19d   : >> { %1196 = vmatpush1.bf16.msra.mxu0 %v787_v57  ;;  %1483 = vmatpush1.bf16.msra.mxu1 %v789_v58  ;;  %v829_v57 = vunpack.c.l.s8.bf16 %v413_v54  ;;  %v832_v58 = vunpack.c.h.s8.bf16 %v412_v47  ;;  %v434_v47 = vld [vmem:[%s2126_s8 + $0x6b8] sm:$0xff] }
 0x19e   : >> { %1197 = vmatprep.subr.bf16.mxu0 %v792_v3  ;;  %1484 = vmatprep.subr.bf16.mxu1 %v794_v59  ;;  %v834_v3 = vunpack.c.h.s8.bf16 %v414_v48  ;;  %v416_v59 = vld [vmem:[%s2126_s8 + $0x628] sm:$0xff] }
 0x1a1   : >> { %1198 = vmatpush1.bf16.msra.mxu0 %v791_v62  ;;  %1485 = vmatpush1.bf16.msra.mxu1 %v793_v63  ;;  %v831_v62 = vunpack.c.h.s8.bf16 %v411_v37  ;;  %v833_v63 = vunpack.c.h.s8.bf16 %v413_v54  ;;  %v433_v37 = vld [vmem:[%s2126_s8 + $0x6b0] sm:$0xff] }
 0x1a2   : >> { %1199 = vmatprep.subr.bf16.mxu0 %v796_v0  ;;  %1486 = vmatprep.subr.bf16.mxu1 %v798_v1  ;;  %v836_v0 = vunpack.c.l.s8.bf16 %v416_v59  ;;  %v838_v1 = vunpack.c.l.s8.bf16 %v418_v60 }
 0x1a5   : >> { %1200 = vmatpush1.bf16.msra.mxu0 %v795_v4  ;;  %1487 = vmatpush1.bf16.msra.mxu1 %v797_v18  ;;  %v835_v4 = vunpack.c.l.s8.bf16 %v415_v2  ;;  %v837_v18 = vunpack.c.l.s8.bf16 %v417_v42 }
 0x1a6   : >> { %1201 = vmatprep.subr.bf16.mxu0 %v800_v5  ;;  %1488 = vmatprep.subr.bf16.mxu1 %v802_v6  ;;  %v842_v5 = vunpack.c.h.s8.bf16 %v418_v60  ;;  %v420_v6 = vld [vmem:[%s2126_s8 + $0x648] sm:$0xff] }
 0x1a9   : >> { %1202 = vmatpush1.bf16.msra.mxu0 %v799_v9  ;;  %1489 = vmatpush1.bf16.msra.mxu1 %v801_v10  ;;  %v841_v9 = vunpack.c.h.s8.bf16 %v417_v42  ;;  %v844_v10 = vunpack.c.l.s8.bf16 %v420_v6 }
 0x1aa   : >> { %1203 = vmatprep.subr.bf16.mxu0 %v804_v11  ;;  %1490 = vmatprep.subr.bf16.mxu1 %v806_v12  ;;  %v846_v11 = vunpack.c.l.s8.bf16 %v422_v7  ;;  %v419_v12 = vld [vmem:[%s2126_s8 + $0x640] sm:$0xff] }
 0x1ab   : >> { %v843_v14 = vunpack.c.l.s8.bf16 %v419_v12  ;;  %v847_v20 = vunpack.c.h.s8.bf16 %v419_v12 }
 0x1ad   : >> { %1204 = vmatpush1.bf16.msra.mxu0 %v803_v15  ;;  %1491 = vmatpush1.bf16.msra.mxu1 %v805_v25  ;;  %v845_v15 = vunpack.c.l.s8.bf16 %v421_v13  ;;  %v848_v25 = vunpack.c.h.s8.bf16 %v420_v6 }
 0x1ae   : >> { %1205 = vmatprep.subr.bf16.mxu0 %v808_v17  ;;  %1492 = vmatprep.subr.bf16.mxu1 %v810_v34  ;;  %v850_v17 = vunpack.c.h.s8.bf16 %v422_v7  ;;  %v424_v34 = vld [vmem:[%s2126_s8 + $0x668] sm:$0xff] }
 0x1b1   : >> { %1206 = vmatpush1.bf16.msra.mxu0 %v807_v21  ;;  %1493 = vmatpush1.bf16.msra.mxu1 %v809_v22  ;;  %v849_v21 = vunpack.c.h.s8.bf16 %v421_v13  ;;  %v852_v22 = vunpack.c.l.s8.bf16 %v424_v34 }
 0x1b2   : >> { %1207 = vmatprep.subr.bf16.mxu0 %v812_v36  ;;  %1494 = vmatprep.subr.bf16.mxu1 %v814_v23  ;;  %v854_v36 = vunpack.c.l.s8.bf16 %v426_v19  ;;  %v423_v23 = vld [vmem:[%s2126_s8 + $0x660] sm:$0xff] }
 0x1b3   : >> { %v851_v26 = vunpack.c.l.s8.bf16 %v423_v23  ;;  %v855_v32 = vunpack.c.h.s8.bf16 %v423_v23 }
 0x1b5   : >> { %1208 = vmatpush1.bf16.msra.mxu0 %v811_v28  ;;  %1495 = vmatpush1.bf16.msra.mxu1 %v813_v29  ;;  %v853_v28 = vunpack.c.l.s8.bf16 %v425_v24  ;;  %v856_v29 = vunpack.c.h.s8.bf16 %v424_v34 }
 0x1b6   : >> { %1209 = vmatprep.subr.bf16.mxu0 %v816_v30  ;;  %1496 = vmatprep.subr.bf16.mxu1 %v818_v31  ;;  %v858_v30 = vunpack.c.h.s8.bf16 %v426_v19  ;;  %v428_v31 = vld [vmem:[%s2126_s8 + $0x688] sm:$0xff] }
 0x1b9   : >> { %1210 = vmatpush1.bf16.msra.mxu0 %v815_v33  ;;  %1497 = vmatpush1.bf16.msra.mxu1 %v817_v35  ;;  %v857_v33 = vunpack.c.h.s8.bf16 %v425_v24  ;;  %v860_v35 = vunpack.c.l.s8.bf16 %v428_v31 }
 0x1ba   : >> { %1211 = vmatprep.subr.bf16.mxu0 %v820_v38  ;;  %1498 = vmatprep.subr.bf16.mxu1 %v822_v39  ;;  %v862_v38 = vunpack.c.l.s8.bf16 %v430_v44  ;;  %v427_v39 = vld [vmem:[%s2126_s8 + $0x680] sm:$0xff] }
 0x1bb   : >> { %v859_v41 = vunpack.c.l.s8.bf16 %v427_v39  ;;  %v863_v48 = vunpack.c.h.s8.bf16 %v427_v39 }
 0x1bd   : >> { %1212 = vmatpush1.bf16.msra.mxu0 %v819_v43  ;;  %1499 = vmatpush1.bf16.msra.mxu1 %v821_v53  ;;  %v861_v43 = vunpack.c.l.s8.bf16 %v429_v40  ;;  %v864_v53 = vunpack.c.h.s8.bf16 %v428_v31 }
 0x1be   : >> { %1213 = vmatprep.subr.bf16.mxu0 %v824_v45  ;;  %1500 = vmatprep.subr.bf16.mxu1 %v826_v46  ;;  %v866_v45 = vunpack.c.h.s8.bf16 %v430_v44  ;;  %v432_v46 = vld [vmem:[%s2126_s8 + $0x6a8] sm:$0xff] }
 0x1c1   : >> { %1214 = vmatpush1.bf16.msra.mxu0 %v823_v49  ;;  %1501 = vmatpush1.bf16.msra.mxu1 %v825_v50  ;;  %v865_v49 = vunpack.c.h.s8.bf16 %v429_v40  ;;  %v868_v50 = vunpack.c.l.s8.bf16 %v432_v46 }
 0x1c2   : >> { %1224 = vmatprep.subr.bf16.mxu0 %v828_v51  ;;  %1511 = vmatprep.subr.bf16.mxu1 %v830_v52  ;;  %v870_v51 = vunpack.c.l.s8.bf16 %v434_v47  ;;  %v431_v52 = vld [vmem:[%s2126_s8 + $0x6a0] sm:$0xff] }
 0x1c3   : >> { %v867_v54 = vunpack.c.l.s8.bf16 %v431_v52  ;;  %v871_v60 = vunpack.c.h.s8.bf16 %v431_v52 }
 0x1c4   : >> { %1216 = vmatmul.mubr.bf16.vlgmr.msra.gmra.mrb[0].mxu0 %v2352_v16  ;;  %1503 = vmatmul.mubr.bf16.vlgmr.msra.gmra.mrb[0].mxu1 %v2352_v16  ;;  %v840_v16 = vunpack.c.h.s8.bf16 %v416_v59  ;;  %v438_v59 = vld [vmem:[%s2126_s8 + $0x6d8] sm:$0xff] }
 0x1c5   : >> { %1225 = vmatpush1.bf16.msra.mxu0 %v827_v56  ;;  %1512 = vmatpush1.bf16.msra.mxu1 %v829_v57  ;;  %v869_v56 = vunpack.c.l.s8.bf16 %v433_v37  ;;  %v872_v57 = vunpack.c.h.s8.bf16 %v432_v46 }
 0x1c6   : >> { %1226 = vmatprep.subr.bf16.mxu0 %v832_v58  ;;  %1513 = vmatprep.subr.bf16.mxu1 %v834_v3  ;;  %v874_v58 = vunpack.c.h.s8.bf16 %v434_v47  ;;  %v436_v3 = vld [vmem:[%s2126_s8 + $0x6c8] sm:$0xff] }
 0x1c7   : >> { %1256 = vmatprep.mubr.bf16.mxu0 %v963_v61  ;;  %1543 = vmatprep.mubr.bf16.mxu1 %v963_v61  ;;  %v873_v61 = vunpack.c.h.s8.bf16 %v433_v37 }
 0x1c9   : >> { %1227 = vmatpush1.bf16.msra.mxu0 %v831_v62  ;;  %1514 = vmatpush1.bf16.msra.mxu1 %v833_v63  ;;  %v876_v62 = vunpack.c.l.s8.bf16 %v436_v3  ;;  %v878_v63 = vunpack.c.l.s8.bf16 %v438_v59 }
 0x1ca   : >> { %1228 = vmatprep.subr.bf16.mxu0 %v836_v0  ;;  %1515 = vmatprep.subr.bf16.mxu1 %v838_v1  ;;  %v435_v0 = vld [vmem:[%s2126_s8 + $0x6c0] sm:$0xff]  ;;  %v437_v1 = vld [vmem:[%s2126_s8 + $0x6d0] sm:$0xff] }
 0x1cb   : >> { %v875_v2 = vunpack.c.l.s8.bf16 %v435_v0  ;;  %v877_v42 = vunpack.c.l.s8.bf16 %v437_v1  ;;  %v879_v6 = vunpack.c.h.s8.bf16 %v435_v0  ;;  %v881_v7 = vunpack.c.h.s8.bf16 %v437_v1 }
 0x1cd   : >> { %1229 = vmatpush1.bf16.msra.mxu0 %v835_v4  ;;  %1516 = vmatpush1.bf16.msra.mxu1 %v837_v18  ;;  %v880_v4 = vunpack.c.h.s8.bf16 %v436_v3  ;;  %v882_v18 = vunpack.c.h.s8.bf16 %v438_v59 }
 0x1ce   : >> { %1230 = vmatprep.subr.bf16.mxu0 %v840_v16  ;;  %1517 = vmatprep.subr.bf16.mxu1 %v842_v5  ;;  %v440_v16 = vld [vmem:[%s2126_s8 + $0x6e8] sm:$0xff]  ;;  %v442_v5 = vld [vmem:[%s2126_s8 + $0x6f8] sm:$0xff] }
 0x1d1   : >> { %1231 = vmatpush1.bf16.msra.mxu0 %v839_v8  ;;  %1518 = vmatpush1.bf16.msra.mxu1 %v841_v9  ;;  %v884_v8 = vunpack.c.l.s8.bf16 %v440_v16  ;;  %v886_v9 = vunpack.c.l.s8.bf16 %v442_v5 }
 0x1d2   : >> { %1232 = vmatprep.subr.bf16.mxu0 %v844_v10  ;;  %1519 = vmatprep.subr.bf16.mxu1 %v846_v11  ;;  %v439_v10 = vld [vmem:[%s2126_s8 + $0x6e0] sm:$0xff]  ;;  %v441_v11 = vld [vmem:[%s2126_s8 + $0x6f0] sm:$0xff] }
 0x1d3   : >> { %v883_v12 = vunpack.c.l.s8.bf16 %v439_v10  ;;  %v885_v13 = vunpack.c.l.s8.bf16 %v441_v11 }
 0x1d5   : >> { %1233 = vmatpush1.bf16.msra.mxu0 %v843_v14  ;;  %1520 = vmatpush1.bf16.msra.mxu1 %v845_v15  ;;  %v888_v14 = vunpack.c.h.s8.bf16 %v440_v16  ;;  %v890_v15 = vunpack.c.h.s8.bf16 %v442_v5 }
 0x1d6   : >> { %1234 = vmatprep.subr.bf16.mxu0 %v848_v25  ;;  %1521 = vmatprep.subr.bf16.mxu1 %v850_v17  ;;  %v887_v25 = vunpack.c.h.s8.bf16 %v439_v10  ;;  %v889_v17 = vunpack.c.h.s8.bf16 %v441_v11 }
 0x1d9   : >> { %1235 = vmatpush1.bf16.msra.mxu0 %v847_v20  ;;  %1522 = vmatpush1.bf16.msra.mxu1 %v849_v21  ;;  %v899_v20 = vld [vmem:[#allocation2] sm:$0xff] }
 0x1da   : >> { %1236 = vmatprep.subr.bf16.mxu0 %v852_v22  ;;  %1523 = vmatprep.subr.bf16.mxu1 %v854_v36  ;;  %v900_v22 = vld [vmem:[#allocation2 + $0x8] sm:$0xff] }
 0x1dd   : >> { %1237 = vmatpush1.bf16.msra.mxu0 %v851_v26  ;;  %1524 = vmatpush1.bf16.msra.mxu1 %v853_v28 }
 0x1de   : >> { %1238 = vmatprep.subr.bf16.mxu0 %v856_v29  ;;  %1525 = vmatprep.subr.bf16.mxu1 %v858_v30 }
 0x1e1   : >> { %1239 = vmatpush1.bf16.msra.mxu0 %v855_v32  ;;  %1526 = vmatpush1.bf16.msra.mxu1 %v857_v33 }
 0x1e2   : >> { %1240 = vmatprep.subr.bf16.mxu0 %v860_v35  ;;  %1527 = vmatprep.subr.bf16.mxu1 %v862_v38 }
 0x1e5   : >> { %1241 = vmatpush1.bf16.msra.mxu0 %v859_v41  ;;  %1528 = vmatpush1.bf16.msra.mxu1 %v861_v43 }
 0x1e6   : >> { %1242 = vmatprep.subr.bf16.mxu0 %v864_v53  ;;  %1529 = vmatprep.subr.bf16.mxu1 %v866_v45 }
 0x1e9   : >> { %1243 = vmatpush1.bf16.msra.mxu0 %v863_v48  ;;  %1530 = vmatpush1.bf16.msra.mxu1 %v865_v49 }
 0x1ea   : >> { %1244 = vmatprep.subr.bf16.mxu0 %v868_v50  ;;  %1531 = vmatprep.subr.bf16.mxu1 %v870_v51 }
 0x1ed   : >> { %1245 = vmatpush1.bf16.msra.mxu0 %v867_v54  ;;  %1532 = vmatpush1.bf16.msra.mxu1 %v869_v56 }
 0x1ee   : >> { %1246 = vmatprep.subr.bf16.mxu0 %v872_v57  ;;  %1533 = vmatprep.subr.bf16.mxu1 %v874_v58 }
 0x1f1   : >> { %1247 = vmatpush1.bf16.msra.mxu0 %v871_v60  ;;  %1534 = vmatpush1.bf16.msra.mxu1 %v873_v61 }
 0x1f2   : >> { %1248 = vmatprep.subr.bf16.mxu0 %v876_v62  ;;  %1535 = vmatprep.subr.bf16.mxu1 %v878_v63 }
 0x1f5   : >> { %1249 = vmatpush1.bf16.msra.mxu0 %v875_v2  ;;  %1536 = vmatpush1.bf16.msra.mxu1 %v877_v42 }
 0x1f6   : >> { %1250 = vmatprep.subr.bf16.mxu0 %v880_v4  ;;  %1537 = vmatprep.subr.bf16.mxu1 %v882_v18 }
 0x1f9   : >> { %1251 = vmatpush1.bf16.msra.mxu0 %v879_v6  ;;  %1538 = vmatpush1.bf16.msra.mxu1 %v881_v7 }
 0x1fa   : >> { %1252 = vmatprep.subr.bf16.mxu0 %v884_v8  ;;  %1539 = vmatprep.subr.bf16.mxu1 %v886_v9 }
 0x1fd   : >> { %1253 = vmatpush1.bf16.msra.mxu0 %v883_v12  ;;  %1540 = vmatpush1.bf16.msra.mxu1 %v885_v13 }
 0x1fe   : >> { %1254 = vmatprep.subr.bf16.mxu0 %v888_v14  ;;  %1541 = vmatprep.subr.bf16.mxu1 %v890_v15 }
 0x201   : >> { %1255 = vmatpush1.bf16.msra.mxu0 %v887_v25  ;;  %1542 = vmatpush1.bf16.msra.mxu1 %v889_v17 }
 0x204   : >> { %1257 = vmatmul.mubr.bf16.vlgmr.msra.gmra.mrb[0].mxu0 %v2391_v55  ;;  %1544 = vmatmul.mubr.bf16.vlgmr.msra.gmra.mrb[0].mxu1 %v2391_v55 }
 0x2d7   : >> { %v1258_v34 = vpop.f32.mrb[0].mxu0  ;;  %v1545_v19 = vpop.f32.mrb[0].mxu1  ;;  %211 = sbr.rel (!%p209_p7) target bundleno = 60 (0x3c), region = 89 }
 0x2d8   : >> { %v1260_v21 = vpop.f32.mrb[1].mxu0  ;;  %v1547_v36 = vpop.f32.mrb[1].mxu1 }
 0x2d9   : >> { %v1556_v23 = vcombine.low %v1258_v34, %v1260_v21  ;;  %v1557_v24 = vcombine.low %v1545_v19, %v1547_v36  ;;  %v1262_v26 = vpop.f32.mrb[2].mxu0  ;;  %v1549_v28 = vpop.f32.mrb[2].mxu1 }
 0x2da   : >> { %v1263_v29 = vpop.f32.mrb[3].mxu0  ;;  %v1550_v30 = vpop.f32.mrb[3].mxu1 }
 0x2db   : >> { %v1560_v31 = vadd.f32 %v1556_v23, %v899_v20  ;;  %v1561_v44 = vadd.f32 %v1557_v24, %v900_v22 }
 0x2dd   : >> { %1562 = vst [vmem:[#allocation2] sm:$0xff] %v1560_v31  ;;  %1563 = vst [vmem:[#allocation2 + $0x8] sm:$0xff] %v1561_v44 }
 0x2de   : > { %1567 = sbr.rel (%p1762_p4) target bundleno = 1128 (0x468), region = 51  ;;  %v1570_v55 = vld [vmem:[%s2488_s2] sm:$0xf] (!%p1762_p4)  ;;  %v1574_v32 = vsub.s32 (!%p1762_p4), 0, %v2136_v27  ;;  %v1578_v33 = vsub.s32 (!%p1762_p4), 1, %v2136_v27  ;;  %v1582_v35 = vsub.s32 (!%p1762_p4), 2, %v2136_v27 }
 0x2df   : > { %v1586_v38 = vsub.s32 (!%p1762_p4), 3, %v2136_v27  ;;  %vm1637_vm0 = vcmask (!%p1762_p4), 1043458   ;;  %vm1610_vm1 = vcmask (!%p1762_p4), 1041408   ;;  %vm1655_vm2 = vcmask (!%p1762_p4), 1024  }
 0x2e0   : > { %v1575_v39 = vrot.slane (!%p1762_p4), %v1570_v55, %v1574_v32  ;;  %v1579_v40 = vrot.slane (!%p1762_p4), %v1570_v55, %v1578_v33  ;;  %v1583_v43 = vrot.slane (!%p1762_p4), %v1570_v55, %v1582_v35  ;;  %vm1670_vm3 = vcmask (!%p1762_p4), 0  }
 0x2e1   : > { %v1587_v53 = vrot.slane (!%p1762_p4), %v1570_v55, %v1586_v38 }
 0x2e2   : > { %v1588_v46 = vcombine.low (!%p1762_p4), %v1575_v39, %v1579_v40 }
 0x2e3   : > { %v1589_v47 = vcombine.low (!%p1762_p4), %v1583_v43, %v1587_v53 }
 0x2e4   : > { %v1568_v41 = vld [vmem:[#allocation2] sm:$0xff] (!%p1762_p4)  ;;  %v1569_v45 = vld [vmem:[#allocation2 + $0x8] sm:$0xff] (!%p1762_p4) }
 0x2e5   : > { %v1592_v48 = vmul.f32 %v1588_v46, %v1568_v41  ;;  %v1593_v49 = vmul.f32 %v1589_v47, %v1569_v45 }
 0x2e7   : > { %v1620_v50 = vmul.f32 %v1592_v48, %v1592_v48  ;;  %v1763_v51 = vrot.slane %v1592_v48, 10  ;;  %v1621_v52 = vmul.f32 %v1593_v49, %v1593_v49  ;;  %v1764_v37 = vrot.slane %v1593_v49, 10 }
 0x2e9   : > { %v1624_v54 = vcombine.high %v1620_v50, %v1620_v50  ;;  %v1638_v56 = vsel %vm1637_vm0, %v1620_v50, 0.0  ;;  %v1628_v27 = vsel %vm1610_vm1, %v1620_v50, 0.0  ;;  %v1602_v57 = vmul.f32 %v1763_v51, %v1592_v48 }
 0x2ea   : > { %v1625_v58 = vcombine.high %v1621_v52, %v1621_v52  ;;  %v1641_v3 = vsel %vm1637_vm0, %v1621_v52, 0.0  ;;  %v1631_v59 = vsel %vm1610_vm1, %v1621_v52, 0.0  ;;  %v1603_v60 = vmul.f32 %v1764_v37, %v1593_v49 }
 0x2eb   : > { %v1639_v61 = vsel %vm1637_vm0, %v1624_v54, 0.0  ;;  %v1629_v62 = vsel %vm1610_vm1, %v1624_v54, 0.0  ;;  %v1606_v63 = vcombine.high %v1602_v57, %v1602_v57  ;;  %v1611_v0 = vsel %vm1610_vm1, %v1602_v57, 0.0 }
 0x2ec   : > { %v1640_v1 = vadd.f32 %v1639_v61, %v1638_v56  ;;  %v1630_v2 = vadd.f32 %v1629_v62, %v1628_v27  ;;  %v1643_v42 = vsel %vm1637_vm0, %v1625_v58, 0.0  ;;  %v1607_v4 = vcombine.high %v1603_v60, %v1603_v60 }
 0x2ed   : > { %v1612_v18 = vsel %vm1610_vm1, %v1606_v63, 0.0  ;;  %v1614_v16 = vsel %vm1610_vm1, %v1603_v60, 0.0  ;;  %v1633_v8 = vsel %vm1610_vm1, %v1625_v58, 0.0 }
 0x2ee   : > { %v1642_v5 = vadd.f32 %v1641_v3, %v1640_v1  ;;  %v1632_v6 = vadd.f32 %v1631_v59, %v1630_v2  ;;  %v1613_v7 = vadd.f32 %v1612_v18, %v1611_v0  ;;  %v1616_v9 = vsel %vm1610_vm1, %v1607_v4, 0.0 }
 0x2f0   : > { %v1644_v10 = vadd.f32 %v1643_v42, %v1642_v5  ;;  %v1615_v11 = vadd.f32 %v1614_v16, %v1613_v7  ;;  %v1634_v12 = vadd.f32 %v1633_v8, %v1632_v6 }
 0x2f2   : > { %1645 = vadd.xlane.f32.xlu0 %v1644_v10  ;;  %v1617_v13 = vadd.f32 %v1616_v9, %v1615_v11 }
 0x2f4   : > { %1618 = vadd.xlane.f32.xlu1 %v1617_v13 }
 0x2f6   : > { %1635 = vadd.xlane.f32.xlu0 %v1634_v12 }
 0x37f   : > { %v1646_v14 = vpop.xlane.xlu0 %1645 }
 0x380   : > { %v1648_v15 = vrot.slane %v1646_v14, 2 }
 0x381   : > { %v1619_v19 = vpop.xlane.xlu1 %1618 }
 0x383   : > { %v1636_v25 = vpop.xlane.xlu0 %1635 }
 0x384   : > { %v1650_v17 = vmul.f32 %v1648_v15, %v1636_v25 }
 0x386   : > { %v1651_v34 = vadd.f32 1e-12, %v1650_v17 }
 0x388   : > { %1886 = vrsqrt.f32 %v1651_v34 }
 0x392   : > { %v1887_v20 = vpop.eup %1886 }
 0x393   : > { %v1653_v21 = vmul.f32 %v1887_v20, %v1619_v19 }
 0x395   : > { %v1654_v22 = vsub.f32 1.0, %v1653_v21 }
 0x397   : > { %v1656_v36 = vsel %vm1655_vm2, %v1654_v22, 0.0 }
 0x398   : > { %1657 = vadd.xlane.f32.xlu1 %v1656_v36 }
 0x425   : > { %v1658_v23 = vpop.xlane.xlu1 %1657 }
 0x426   : > { %v1659_v24 = vrot.slane %v1658_v23, 4 }
 0x428   : > { %v1660_v26 = vadd.f32 %v1659_v24, %v1658_v23 }
 0x42a   : > { %v1661_v28 = vrot.slane %v1660_v26, 2 }
 0x42c   : > { %v1662_v29 = vadd.f32 %v1661_v28, %v1660_v26 }
 0x42e   : > { %v1663_v30 = vrot.slane %v1662_v29, 1 }
 0x430   : > { %v1664_v31 = vadd.f32 %v1663_v30, %v1662_v29 }
 0x432   : > { %1823 = vpush %v1664_v31 }
 0x463   : > { %s1824_s19 = spop %1823 }
 0x464   : > { %s1668_s22 = smul.f32 0.5, %s1824_s19 }
 0x466   : > { %v1669_v44 = vstv %s1668_s22 }
 0x467   : > { %1671 = vst.msk [vmem:[#allocation6] sm:$0x1] %vm1670_vm3, %v1669_v44 }
 0x468 PF: > { %p1836_p5 = scmp.eq.s32.totalorder %s2037_s16, 2  ;;  %s1997_s23 = smov [#allocation6]  }
 0x469   : > { %s1679_s24 = sshll.u32 %s1997_s23, 4  ;;  %s1680_s24 = int_to_ptr.vmem [resolvable:$true] %s1679_s24 }
 0x46a   : > { %s1918_s26 = scalar_lea.vmem %s1680_s24, 16  ;;  %s1924_s27 = scalar_lea.vmem %s1680_s24, 32 }
 0x46b   : > { %p1919_p6 = scmp.ne.s32.totalorder %s1680_s24, %s1918_s26  ;;  %p1925_p0 = scmp.lt.s32.totalorder %s1680_s24, %s1680_s24 }
 0x46c   : > { %p1926_p1 = scmp.lt.s32.totalorder %s1924_s27, %s1918_s26 }
 0x46d   : > { %p1920_p10 = pnand %p1919_p6, %p1836_p5 }
 0x46e   : > { %p1927_p2 = por %p1926_p1, %p1925_p0 }
 0x46f   : > { %p1921_p12 = pneg %p1920_p10 }
 0x471   : > { %p1928_p11 = pnand %p1927_p2, %p1921_p12 }
 0x473   : > { %1931 = shalt.err (!%p1928_p11)
}
 0x474   : > { %s1932_s15 = scalar_lea.hbm %s2489_s3, 16 }
 0x475   : > { %p1933_p13 = scmp.ne.s32.totalorder %s2489_s3, %s1932_s15  ;;  %p1938_p9 = scmp.lt.u32.totalorder %s1932_s15, %s2489_s3 }
 0x477   : > { %p1934_p3 = pnand %p1933_p13, %p1836_p5 }
 0x479   : > { %p1935_p8 = pneg %p1934_p3 }
 0x47b   : > { %p1940_p7 = pnand %p1938_p9, %p1935_p8 }
 0x47d   : > { %1943 = shalt.err (!%p1940_p7)
}
 0x47e   : > { %1828 = dma.vmem_to_hbm [thread:$0]  (%p1836_p5), %s1680_s24, 16, %s2489_s3, [#allocation5]  }
 0x47f   : > { %1969 = dma.done.wait (%p1836_p5), [#allocation5], 16  }
 0x480   : > { %1971 = vsyncadd (%p1836_p5), [#allocation5], 4294967280 }
 0x481 PF: > { %p14_p4 = scmp.ge.s32.totalorder %s2040_s17, 5   ;;  %s2493_s12 = smov %s1978_s13 }
 0x482   : > { %s2494_s13 = smov %s1982_s14  ;;  %s2495_s14 = smov %s2050_s20 }
 0x483   : > { %s2496_s15 = smov %s2040_s17  ;;  %16 = sbr.rel (!%p14_p4) target bundleno = 4 (0x4), region = 100 }
 0x48a   :  { %1692 = vsyncpa [#allocation4], 1 }
 0x48b   :  { %1694 = vsyncpa [#allocation4 + $0x1], 1 }
 0x48c   :  { %1695 = vsyncpa [#allocation5], 1 }
 0x48d   :  { %1697 = vsyncpa [#allocation5 + $0x1], 1 }

</bundles_post_ra>
